<compile_context>
chip_gen: v7x
topology: tpu7x:2x2x1
jax: 0.10.0
libtpu: 0.0.40
codegen_flags: <defaults>
</compile_context>

<pallas_src>
import functools

import jax
import jax.numpy as jnp
import numpy as np
from jax.experimental import pallas as pl
from jax.experimental.pallas import tpu as pltpu

NEG_SLOPE = 0.01          # nn.LeakyReLU default negative_slope
CONV_DIMS = [32, 64, 128]


def _round_up(x, m):
    return (x + m - 1) // m * m


# ---------------------------------------------------------------------------
# Pallas kernel: one fused encoder block for a single image.
#   conv 3x3 stride 2  (as a 2x2 conv over the space-to-depth input, 4 taps)
#   -> zero-padded bf16 intermediate in VMEM
#   -> conv 3x3 stride 1 (9 taps) + bias + LeakyReLU -> output
# Every tap is a contiguous (M_pad, C) slab matmul on the flattened
# (row * S + col) layout, S = Wo + 2.
# ---------------------------------------------------------------------------
def _fused_block_kernel(x_ref, w1_ref, b1_ref, mask_ref, w2_ref, b2_ref,
                        o_ref, zp_ref, *, S, M_pad):
    C1 = o_ref.shape[-1]

    # ---- conv1: 4 shifted-slab matmuls over the space-to-depth input --------
    acc1 = jnp.zeros((M_pad, C1), jnp.float32)
    for db in range(2):
        for cb in range(2):
            lhs = x_ref[pl.ds(db * S + cb, M_pad), :]
            acc1 = acc1 + jnp.dot(lhs, w1_ref[db * 2 + cb],
                                  preferred_element_type=jnp.float32)
    # Mask kills rows whose window straddles the width padding (and the M_pad
    # tail), so the padded intermediate keeps correct zero borders for conv2.
    y1 = (acc1 + b1_ref[...]) * mask_ref[...]

    # ---- padded intermediate stays entirely in VMEM -------------------------
    zp_ref[...] = jnp.zeros_like(zp_ref)
    zp_ref[pl.ds(S + 1, M_pad), :] = y1.astype(zp_ref.dtype)

    # ---- conv2: 9 shifted-slab matmuls + bias + LeakyReLU --------------------
    acc2 = jnp.zeros((M_pad, C1), jnp.float32)
    for kh in range(3):
        for kw in range(3):
            lhs = zp_ref[pl.ds(kh * S + kw, M_pad), :]
            acc2 = acc2 + jnp.dot(lhs, w2_ref[kh * 3 + kw],
                                  preferred_element_type=jnp.float32)
    y2 = acc2 + b2_ref[...]
    y2 = jnp.maximum(y2, NEG_SLOPE * y2)          # LeakyReLU, no compare/select
    o_ref[...] = y2.astype(o_ref.dtype)


# ---------------------------------------------------------------------------
# Wrapper: XLA glue (pad + space-to-depth + weight packing) and pallas_call.
# ---------------------------------------------------------------------------
def fused_block(x_nhwc, w1, b1, w2, b2, out_dtype):
    """One encoder block. x:(N,H,W,Cin), w*: (Cout,Cin,3,3) OIHW -> (N,Ho,Wo,Cout)."""
    N, H, W, Cin = x_nhwc.shape
    C1 = w1.shape[0]
    Ho, Wo = (H + 1) // 2, (W + 1) // 2          # stride-2 output spatial
    S, Hs = Wo + 2, Ho + 2                       # space-to-depth (padded) spatial
    pad_b, pad_r = 2 * Ho + 3 - H, 2 * Wo + 3 - W

    # --- pad + space-to-depth: one cheap XLA pass, replaces the im2col --------
    xp = jnp.pad(x_nhwc.astype(jnp.bfloat16),
                 ((0, 0), (1, pad_b), (1, pad_r), (0, 0)))
    ys2d = (xp.reshape(N, Hs, 2, S, 2, Cin)
              .transpose(0, 1, 3, 2, 4, 5)
              .reshape(N, Hs * S, 4 * Cin))      # flat row index = r*S + c

    M_real = Ho * S                               # wraparound output rows
    M_pad = _round_up(M_real, 8)
    Min_alloc = _round_up(max(Hs * S, (S + 1) + M_pad), 8)
    if Min_alloc > Hs * S:
        ys2d = jnp.pad(ys2d, ((0, 0), (0, Min_alloc - Hs * S), (0, 0)))
    Z_rows = _round_up(2 * S + 2 + M_pad, 8)      # padded-intermediate rows

    # --- weight packing (tiny): stride-2 3x3 conv == 2x2 conv over s2d input --
    # W1p[db*2+cb, (dr*2+dc)*Cin+ci, co] = w1[co, ci, 2db+dr, 2cb+dc] (0 if >2)
    wk = jnp.pad(jnp.transpose(w1, (2, 3, 1, 0)),
                 ((0, 1), (0, 1), (0, 0), (0, 0)))            # (4,4,Cin,C1)
    w1p = (wk.reshape(2, 2, 2, 2, Cin, C1)
             .transpose(0, 2, 1, 3, 4, 5)
             .reshape(4, 4 * Cin, C1).astype(jnp.bfloat16))
    w2p = jnp.transpose(w2, (2, 3, 1, 0)).reshape(9, C1, C1).astype(jnp.bfloat16)
    b1f = b1.astype(jnp.float32).reshape(1, C1)
    b2f = b2.astype(jnp.float32).reshape(1, C1)

    # validity mask for the wraparound rows (garbage width-pad columns -> 0)
    m = np.arange(M_pad)
    mask = jnp.asarray((((m % S) < Wo) & (m < M_real))
                       .astype(np.float32).reshape(M_pad, 1))

    kernel = functools.partial(_fused_block_kernel, S=S, M_pad=M_pad)
    flops = 2 * N * M_pad * (16 * Cin + 9 * C1) * C1
    bytes_accessed = (ys2d.size * 2
                      + N * M_pad * C1 * jnp.dtype(out_dtype).itemsize
                      + w1p.size * 2 + w2p.size * 2
                      + (b1f.size + b2f.size + mask.size) * 4)

    out_flat = pl.pallas_call(
        kernel,
        out_shape=jax.ShapeDtypeStruct((N, M_pad, C1), out_dtype),
        grid=(N,),
        in_specs=[
            pl.BlockSpec((None, Min_alloc, 4 * Cin), lambda n: (n, 0, 0)),  # per-image
            pl.BlockSpec((4, 4 * Cin, C1), lambda n: (0, 0, 0)),            # resident
            pl.BlockSpec((1, C1), lambda n: (0, 0)),                        # resident
            pl.BlockSpec((M_pad, 1), lambda n: (0, 0)),                     # resident
            pl.BlockSpec((9, C1, C1), lambda n: (0, 0, 0)),                 # resident
            pl.BlockSpec((1, C1), lambda n: (0, 0)),                        # resident
        ],
        out_specs=pl.BlockSpec((None, M_pad, C1), lambda n: (n, 0, 0)),
        scratch_shapes=[pltpu.VMEM((Z_rows, C1), jnp.bfloat16)],
        compiler_params=pltpu.CompilerParams(
            dimension_semantics=("parallel",),     # batch split across TCs (v7x)
            vmem_limit_bytes=32 * 1024 * 1024,     # v7x-safe (64 MiB physical)
        ),
        cost_estimate=pl.CostEstimate(
            flops=flops, transcendentals=0, bytes_accessed=bytes_accessed),
    )(ys2d, w1p, b1f, mask, w2p, b2f)

    # strip the 2 wraparound garbage columns per row in XLA
    out = out_flat[:, :M_real, :].reshape(N, Ho, S, C1)[:, :, :Wo, :]
    return out


def lrencoder_forward(x_nchw, params):
    """Pallas implementation of LREncoder.forward. Input/output are NCHW."""
    x = jnp.transpose(x_nchw, (0, 2, 3, 1))          # NCHW -> NHWC
    n_blocks = len(params)
    for bi, (w1, b1, w2, b2) in enumerate(params):
        last = bi == n_blocks - 1
        x = fused_block(x, w1, b1, w2, b2,
                        out_dtype=jnp.float32 if last else jnp.bfloat16)
    return jnp.transpose(x, (0, 3, 1, 2))            # NHWC -> NCHW


# ---------------------------------------------------------------------------
# Deterministic parameter init (shapes from the PyTorch module __init__);
# fan-in scaled so activations stay O(1) through all 6 convs.
# ---------------------------------------------------------------------------
def init_params(key):
    params = []
    in_ch = 3
    for conv_dim in CONV_DIMS:
        key, k1, k2, k3, k4 = jax.random.split(key, 5)
        s1 = (9 * in_ch) ** -0.5
        s2 = (9 * conv_dim) ** -0.5
        w1 = s1 * jax.random.normal(k1, (conv_dim, in_ch, 3, 3), jnp.float32)
        b1 = 0.05 * jax.random.normal(k2, (conv_dim,), jnp.float32)
        w2 = s2 * jax.random.normal(k3, (conv_dim, conv_dim, 3, 3), jnp.float32)
        b2 = 0.05 * jax.random.normal(k4, (conv_dim,), jnp.float32)
        params.append((w1, b1, w2, b2))
        in_ch = conv_dim
    return params


# ---------------------------------------------------------------------------
# Pure-JAX f32 reference (semantics check against lax.conv)
# ---------------------------------------------------------------------------
def _ref_conv(x_nchw, w, b, stride):
    out = jax.lax.conv_general_dilated(
        x_nchw, w, (stride, stride), [(1, 1), (1, 1)],
        dimension_numbers=("NCHW", "OIHW", "NCHW"),
        precision=jax.lax.Precision.HIGHEST)
    return out + b.reshape(1, -1, 1, 1)


def lrencoder_reference(x_nchw, params):
    x = x_nchw
    for (w1, b1, w2, b2) in params:
        x = _ref_conv(x, w1, b1, 2)
        x = _ref_conv(x, w2, b2, 1)
        x = jnp.where(x >= 0, x, NEG_SLOPE * x)
    return x


if __name__ == "__main__":
    key = jax.random.PRNGKey(0)
    kx, kp = jax.random.split(key)

    # small deterministic input, NCHW (3 input channels required by the module)
    x = jax.random.normal(kx, (2, 3, 16, 16), jnp.float32)
    params = init_params(kp)

    out = jax.block_until_ready(jax.jit(lrencoder_forward)(x, params))
    ref = jax.block_until_ready(lrencoder_reference(x, params))

    assert out.shape == (2, 128, 2, 2), out.shape   # 16 -> 8 -> 4 -> 2 spatial, 128 ch
    assert out.dtype == jnp.float32
    # bf16 matmul operands / intermediates with f32 accumulation
    np.testing.assert_allclose(np.asarray(out), np.asarray(ref), rtol=2e-2, atol=2e-2)

    print("KERNEL_OK")
</pallas_src>

<mosaic_0001>
module attributes {stable_mosaic.version = 11 : i64} {
  func.func @_fused_block_kernel(%arg0: i32, %arg1: memref<1x104x12xbf16, #tpu.memory_space<vmem>>, %arg2: memref<4x12x32xbf16, #tpu.memory_space<vmem>>, %arg3: memref<1x32xf32, #tpu.memory_space<vmem>>, %arg4: memref<80x1xf32, #tpu.memory_space<vmem>>, %arg5: memref<9x32x32xbf16, #tpu.memory_space<vmem>>, %arg6: memref<1x32xf32, #tpu.memory_space<vmem>>, %arg7: memref<1x80x32xbf16, #tpu.memory_space<vmem>>, %arg8: memref<104x32xbf16, #tpu.memory_space<vmem>>) attributes {dimension_semantics = [#tpu.dimension_semantics<parallel>], iteration_bounds = array<i64: 2>, scalar_prefetch = 0 : i64, scratch_operands = 1 : i64, tpu.core_type = #tpu.core_type<tc>, window_params = [{transform_indices = @transform_0, window_bounds = array<i64: 1, 104, 12>}, {pipeline_mode = #tpu.pipeline_mode<synchronous>, transform_indices = @transform_1, window_bounds = array<i64: 4, 12, 32>}, {pipeline_mode = #tpu.pipeline_mode<synchronous>, transform_indices = @transform_2, window_bounds = array<i64: 1, 32>}, {pipeline_mode = #tpu.pipeline_mode<synchronous>, transform_indices = @transform_3, window_bounds = array<i64: 80, 1>}, {pipeline_mode = #tpu.pipeline_mode<synchronous>, transform_indices = @transform_4, window_bounds = array<i64: 9, 32, 32>}, {pipeline_mode = #tpu.pipeline_mode<synchronous>, transform_indices = @transform_5, window_bounds = array<i64: 1, 32>}, {transform_indices = @transform_6, window_bounds = array<i64: 1, 80, 32>}]} {
    %cst = arith.constant 0.000000e+00 : f32
    %0 = vector.broadcast %cst : f32 to vector<80x32xf32>
    %c0 = arith.constant 0 : index
    %c0_0 = arith.constant 0 : index
    %c0_1 = arith.constant 0 : index
    %1 = vector.load %arg1[%c0, %c0_0, %c0_1] : memref<1x104x12xbf16, #tpu.memory_space<vmem>>, vector<1x80x12xbf16>
    %2 = vector.shape_cast %1 : vector<1x80x12xbf16> to vector<80x12xbf16>
    %c0_2 = arith.constant 0 : index
    %c0_3 = arith.constant 0 : index
    %c0_4 = arith.constant 0 : index
    %3 = vector.load %arg2[%c0_2, %c0_3, %c0_4] : memref<4x12x32xbf16, #tpu.memory_space<vmem>>, vector<1x12x32xbf16>
    %4 = vector.shape_cast %3 : vector<1x12x32xbf16> to vector<12x32xbf16>
    %cst_5 = arith.constant dense<0.000000e+00> : vector<80x32xf32>
    %5 = tpu.matmul %2, %4, %cst_5 {dimension_numbers = #tpu.dot_dimension_numbers<[1], [0], [0], [1], [0, 0, 1, 1], [], []>} : vector<80x12xbf16>, vector<12x32xbf16>, vector<80x32xf32> -> vector<80x32xf32>
    %6 = arith.addf %0, %5 : vector<80x32xf32>
    %c0_6 = arith.constant 0 : index
    %c1 = arith.constant 1 : index
    %c0_7 = arith.constant 0 : index
    %7 = vector.load %arg1[%c0_6, %c1, %c0_7] : memref<1x104x12xbf16, #tpu.memory_space<vmem>>, vector<1x80x12xbf16>
    %8 = vector.shape_cast %7 : vector<1x80x12xbf16> to vector<80x12xbf16>
    %c1_8 = arith.constant 1 : index
    %c0_9 = arith.constant 0 : index
    %c0_10 = arith.constant 0 : index
    %9 = vector.load %arg2[%c1_8, %c0_9, %c0_10] : memref<4x12x32xbf16, #tpu.memory_space<vmem>>, vector<1x12x32xbf16>
    %10 = vector.shape_cast %9 : vector<1x12x32xbf16> to vector<12x32xbf16>
    %cst_11 = arith.constant dense<0.000000e+00> : vector<80x32xf32>
    %11 = tpu.matmul %8, %10, %cst_11 {dimension_numbers = #tpu.dot_dimension_numbers<[1], [0], [0], [1], [0, 0, 1, 1], [], []>} : vector<80x12xbf16>, vector<12x32xbf16>, vector<80x32xf32> -> vector<80x32xf32>
    %12 = arith.addf %6, %11 : vector<80x32xf32>
    %c0_12 = arith.constant 0 : index
    %c10 = arith.constant 10 : index
    %c0_13 = arith.constant 0 : index
    %13 = vector.load %arg1[%c0_12, %c10, %c0_13] : memref<1x104x12xbf16, #tpu.memory_space<vmem>>, vector<1x80x12xbf16>
    %14 = vector.shape_cast %13 : vector<1x80x12xbf16> to vector<80x12xbf16>
    %c2 = arith.constant 2 : index
    %c0_14 = arith.constant 0 : index
    %c0_15 = arith.constant 0 : index
    %15 = vector.load %arg2[%c2, %c0_14, %c0_15] : memref<4x12x32xbf16, #tpu.memory_space<vmem>>, vector<1x12x32xbf16>
    %16 = vector.shape_cast %15 : vector<1x12x32xbf16> to vector<12x32xbf16>
    %cst_16 = arith.constant dense<0.000000e+00> : vector<80x32xf32>
    %17 = tpu.matmul %14, %16, %cst_16 {dimension_numbers = #tpu.dot_dimension_numbers<[1], [0], [0], [1], [0, 0, 1, 1], [], []>} : vector<80x12xbf16>, vector<12x32xbf16>, vector<80x32xf32> -> vector<80x32xf32>
    %18 = arith.addf %12, %17 : vector<80x32xf32>
    %c0_17 = arith.constant 0 : index
    %c11 = arith.constant 11 : index
    %c0_18 = arith.constant 0 : index
    %19 = vector.load %arg1[%c0_17, %c11, %c0_18] : memref<1x104x12xbf16, #tpu.memory_space<vmem>>, vector<1x80x12xbf16>
    %20 = vector.shape_cast %19 : vector<1x80x12xbf16> to vector<80x12xbf16>
    %c3 = arith.constant 3 : index
    %c0_19 = arith.constant 0 : index
    %c0_20 = arith.constant 0 : index
    %21 = vector.load %arg2[%c3, %c0_19, %c0_20] : memref<4x12x32xbf16, #tpu.memory_space<vmem>>, vector<1x12x32xbf16>
    %22 = vector.shape_cast %21 : vector<1x12x32xbf16> to vector<12x32xbf16>
    %cst_21 = arith.constant dense<0.000000e+00> : vector<80x32xf32>
    %23 = tpu.matmul %20, %22, %cst_21 {dimension_numbers = #tpu.dot_dimension_numbers<[1], [0], [0], [1], [0, 0, 1, 1], [], []>} : vector<80x12xbf16>, vector<12x32xbf16>, vector<80x32xf32> -> vector<80x32xf32>
    %24 = arith.addf %18, %23 : vector<80x32xf32>
    %c0_22 = arith.constant 0 : index
    %c0_23 = arith.constant 0 : index
    %25 = vector.load %arg3[%c0_22, %c0_23] : memref<1x32xf32, #tpu.memory_space<vmem>>, vector<1x32xf32>
    %26 = vector.broadcast %25 : vector<1x32xf32> to vector<80x32xf32>
    %27 = arith.addf %24, %26 : vector<80x32xf32>
    %c0_24 = arith.constant 0 : index
    %c0_25 = arith.constant 0 : index
    %28 = vector.load %arg4[%c0_24, %c0_25] : memref<80x1xf32, #tpu.memory_space<vmem>>, vector<80x1xf32>
    %29 = vector.broadcast %28 : vector<80x1xf32> to vector<80x32xf32>
    %30 = arith.mulf %27, %29 : vector<80x32xf32>
    %cst_26 = arith.constant 0.000000e+00 : bf16
    %31 = vector.broadcast %cst_26 : bf16 to vector<104x32xbf16>
    %c0_27 = arith.constant 0 : index
    %c0_28 = arith.constant 0 : index
    %32 = vector.load %arg8[%c0_27, %c0_28] : memref<104x32xbf16, #tpu.memory_space<vmem>>, vector<104x32xbf16>
    tpu.vector_store %arg8[%c0_27, %c0_28], %31 {strides = array<i32>} : memref<104x32xbf16, #tpu.memory_space<vmem>>, vector<104x32xbf16>,
    %33 = arith.truncf %30 : vector<80x32xf32> to vector<80x32xbf16>
    %c11_29 = arith.constant 11 : index
    %c0_30 = arith.constant 0 : index
    %34 = vector.load %arg8[%c11_29, %c0_30] : memref<104x32xbf16, #tpu.memory_space<vmem>>, vector<80x32xbf16>
    tpu.vector_store %arg8[%c11_29, %c0_30], %33 {strides = array<i32>} : memref<104x32xbf16, #tpu.memory_space<vmem>>, vector<80x32xbf16>,
    %cst_31 = arith.constant 0.000000e+00 : f32
    %35 = vector.broadcast %cst_31 : f32 to vector<80x32xf32>
    %c0_32 = arith.constant 0 : index
    %c0_33 = arith.constant 0 : index
    %36 = vector.load %arg8[%c0_32, %c0_33] : memref<104x32xbf16, #tpu.memory_space<vmem>>, vector<80x32xbf16>
    %c0_34 = arith.constant 0 : index
    %c0_35 = arith.constant 0 : index
    %c0_36 = arith.constant 0 : index
    %37 = vector.load %arg5[%c0_34, %c0_35, %c0_36] : memref<9x32x32xbf16, #tpu.memory_space<vmem>>, vector<1x32x32xbf16>
    %38 = vector.shape_cast %37 : vector<1x32x32xbf16> to vector<32x32xbf16>
    %cst_37 = arith.constant dense<0.000000e+00> : vector<80x32xf32>
    %39 = tpu.matmul %36, %38, %cst_37 {dimension_numbers = #tpu.dot_dimension_numbers<[1], [0], [0], [1], [0, 0, 1, 1], [], []>} : vector<80x32xbf16>, vector<32x32xbf16>, vector<80x32xf32> -> vector<80x32xf32>
    %40 = arith.addf %35, %39 : vector<80x32xf32>
    %c1_38 = arith.constant 1 : index
    %c0_39 = arith.constant 0 : index
    %41 = vector.load %arg8[%c1_38, %c0_39] : memref<104x32xbf16, #tpu.memory_space<vmem>>, vector<80x32xbf16>
    %c1_40 = arith.constant 1 : index
    %c0_41 = arith.constant 0 : index
    %c0_42 = arith.constant 0 : index
    %42 = vector.load %arg5[%c1_40, %c0_41, %c0_42] : memref<9x32x32xbf16, #tpu.memory_space<vmem>>, vector<1x32x32xbf16>
    %43 = vector.shape_cast %42 : vector<1x32x32xbf16> to vector<32x32xbf16>
    %cst_43 = arith.constant dense<0.000000e+00> : vector<80x32xf32>
    %44 = tpu.matmul %41, %43, %cst_43 {dimension_numbers = #tpu.dot_dimension_numbers<[1], [0], [0], [1], [0, 0, 1, 1], [], []>} : vector<80x32xbf16>, vector<32x32xbf16>, vector<80x32xf32> -> vector<80x32xf32>
    %45 = arith.addf %40, %44 : vector<80x32xf32>
    %c2_44 = arith.constant 2 : index
    %c0_45 = arith.constant 0 : index
    %46 = vector.load %arg8[%c2_44, %c0_45] : memref<104x32xbf16, #tpu.memory_space<vmem>>, vector<80x32xbf16>
    %c2_46 = arith.constant 2 : index
    %c0_47 = arith.constant 0 : index
    %c0_48 = arith.constant 0 : index
    %47 = vector.load %arg5[%c2_46, %c0_47, %c0_48] : memref<9x32x32xbf16, #tpu.memory_space<vmem>>, vector<1x32x32xbf16>
    %48 = vector.shape_cast %47 : vector<1x32x32xbf16> to vector<32x32xbf16>
    %cst_49 = arith.constant dense<0.000000e+00> : vector<80x32xf32>
    %49 = tpu.matmul %46, %48, %cst_49 {dimension_numbers = #tpu.dot_dimension_numbers<[1], [0], [0], [1], [0, 0, 1, 1], [], []>} : vector<80x32xbf16>, vector<32x32xbf16>, vector<80x32xf32> -> vector<80x32xf32>
    %50 = arith.addf %45, %49 : vector<80x32xf32>
    %c10_50 = arith.constant 10 : index
    %c0_51 = arith.constant 0 : index
    %51 = vector.load %arg8[%c10_50, %c0_51] : memref<104x32xbf16, #tpu.memory_space<vmem>>, vector<80x32xbf16>
    %c3_52 = arith.constant 3 : index
    %c0_53 = arith.constant 0 : index
    %c0_54 = arith.constant 0 : index
    %52 = vector.load %arg5[%c3_52, %c0_53, %c0_54] : memref<9x32x32xbf16, #tpu.memory_space<vmem>>, vector<1x32x32xbf16>
    %53 = vector.shape_cast %52 : vector<1x32x32xbf16> to vector<32x32xbf16>
    %cst_55 = arith.constant dense<0.000000e+00> : vector<80x32xf32>
    %54 = tpu.matmul %51, %53, %cst_55 {dimension_numbers = #tpu.dot_dimension_numbers<[1], [0], [0], [1], [0, 0, 1, 1], [], []>} : vector<80x32xbf16>, vector<32x32xbf16>, vector<80x32xf32> -> vector<80x32xf32>
    %55 = arith.addf %50, %54 : vector<80x32xf32>
    %c11_56 = arith.constant 11 : index
    %c0_57 = arith.constant 0 : index
    %56 = vector.load %arg8[%c11_56, %c0_57] : memref<104x32xbf16, #tpu.memory_space<vmem>>, vector<80x32xbf16>
    %c4 = arith.constant 4 : index
    %c0_58 = arith.constant 0 : index
    %c0_59 = arith.constant 0 : index
    %57 = vector.load %arg5[%c4, %c0_58, %c0_59] : memref<9x32x32xbf16, #tpu.memory_space<vmem>>, vector<1x32x32xbf16>
    %58 = vector.shape_cast %57 : vector<1x32x32xbf16> to vector<32x32xbf16>
    %cst_60 = arith.constant dense<0.000000e+00> : vector<80x32xf32>
    %59 = tpu.matmul %56, %58, %cst_60 {dimension_numbers = #tpu.dot_dimension_numbers<[1], [0], [0], [1], [0, 0, 1, 1], [], []>} : vector<80x32xbf16>, vector<32x32xbf16>, vector<80x32xf32> -> vector<80x32xf32>
    %60 = arith.addf %55, %59 : vector<80x32xf32>
    %c12 = arith.constant 12 : index
    %c0_61 = arith.constant 0 : index
    %61 = vector.load %arg8[%c12, %c0_61] : memref<104x32xbf16, #tpu.memory_space<vmem>>, vector<80x32xbf16>
    %c5 = arith.constant 5 : index
    %c0_62 = arith.constant 0 : index
    %c0_63 = arith.constant 0 : index
    %62 = vector.load %arg5[%c5, %c0_62, %c0_63] : memref<9x32x32xbf16, #tpu.memory_space<vmem>>, vector<1x32x32xbf16>
    %63 = vector.shape_cast %62 : vector<1x32x32xbf16> to vector<32x32xbf16>
    %cst_64 = arith.constant dense<0.000000e+00> : vector<80x32xf32>
    %64 = tpu.matmul %61, %63, %cst_64 {dimension_numbers = #tpu.dot_dimension_numbers<[1], [0], [0], [1], [0, 0, 1, 1], [], []>} : vector<80x32xbf16>, vector<32x32xbf16>, vector<80x32xf32> -> vector<80x32xf32>
    %65 = arith.addf %60, %64 : vector<80x32xf32>
    %c20 = arith.constant 20 : index
    %c0_65 = arith.constant 0 : index
    %66 = vector.load %arg8[%c20, %c0_65] : memref<104x32xbf16, #tpu.memory_space<vmem>>, vector<80x32xbf16>
    %c6 = arith.constant 6 : index
    %c0_66 = arith.constant 0 : index
    %c0_67 = arith.constant 0 : index
    %67 = vector.load %arg5[%c6, %c0_66, %c0_67] : memref<9x32x32xbf16, #tpu.memory_space<vmem>>, vector<1x32x32xbf16>
    %68 = vector.shape_cast %67 : vector<1x32x32xbf16> to vector<32x32xbf16>
    %cst_68 = arith.constant dense<0.000000e+00> : vector<80x32xf32>
    %69 = tpu.matmul %66, %68, %cst_68 {dimension_numbers = #tpu.dot_dimension_numbers<[1], [0], [0], [1], [0, 0, 1, 1], [], []>} : vector<80x32xbf16>, vector<32x32xbf16>, vector<80x32xf32> -> vector<80x32xf32>
    %70 = arith.addf %65, %69 : vector<80x32xf32>
    %c21 = arith.constant 21 : index
    %c0_69 = arith.constant 0 : index
    %71 = vector.load %arg8[%c21, %c0_69] : memref<104x32xbf16, #tpu.memory_space<vmem>>, vector<80x32xbf16>
    %c7 = arith.constant 7 : index
    %c0_70 = arith.constant 0 : index
    %c0_71 = arith.constant 0 : index
    %72 = vector.load %arg5[%c7, %c0_70, %c0_71] : memref<9x32x32xbf16, #tpu.memory_space<vmem>>, vector<1x32x32xbf16>
    %73 = vector.shape_cast %72 : vector<1x32x32xbf16> to vector<32x32xbf16>
    %cst_72 = arith.constant dense<0.000000e+00> : vector<80x32xf32>
    %74 = tpu.matmul %71, %73, %cst_72 {dimension_numbers = #tpu.dot_dimension_numbers<[1], [0], [0], [1], [0, 0, 1, 1], [], []>} : vector<80x32xbf16>, vector<32x32xbf16>, vector<80x32xf32> -> vector<80x32xf32>
    %75 = arith.addf %70, %74 : vector<80x32xf32>
    %c22 = arith.constant 22 : index
    %c0_73 = arith.constant 0 : index
    %76 = vector.load %arg8[%c22, %c0_73] : memref<104x32xbf16, #tpu.memory_space<vmem>>, vector<80x32xbf16>
    %c8 = arith.constant 8 : index
    %c0_74 = arith.constant 0 : index
    %c0_75 = arith.constant 0 : index
    %77 = vector.load %arg5[%c8, %c0_74, %c0_75] : memref<9x32x32xbf16, #tpu.memory_space<vmem>>, vector<1x32x32xbf16>
    %78 = vector.shape_cast %77 : vector<1x32x32xbf16> to vector<32x32xbf16>
    %cst_76 = arith.constant dense<0.000000e+00> : vector<80x32xf32>
    %79 = tpu.matmul %76, %78, %cst_76 {dimension_numbers = #tpu.dot_dimension_numbers<[1], [0], [0], [1], [0, 0, 1, 1], [], []>} : vector<80x32xbf16>, vector<32x32xbf16>, vector<80x32xf32> -> vector<80x32xf32>
    %80 = arith.addf %75, %79 : vector<80x32xf32>
    %c0_77 = arith.constant 0 : index
    %c0_78 = arith.constant 0 : index
    %81 = vector.load %arg6[%c0_77, %c0_78] : memref<1x32xf32, #tpu.memory_space<vmem>>, vector<1x32xf32>
    %82 = vector.broadcast %81 : vector<1x32xf32> to vector<80x32xf32>
    %83 = arith.addf %80, %82 : vector<80x32xf32>
    %cst_79 = arith.constant 0.00999999977 : f32
    %84 = vector.broadcast %cst_79 : f32 to vector<80x32xf32>
    %85 = arith.mulf %84, %83 : vector<80x32xf32>
    %86 = arith.maximumf %83, %85 : vector<80x32xf32>
    %87 = arith.truncf %86 : vector<80x32xf32> to vector<80x32xbf16>
    %c0_80 = arith.constant 0 : index
    %c0_81 = arith.constant 0 : index
    %c0_82 = arith.constant 0 : index
    %88 = vector.load %arg7[%c0_80, %c0_81, %c0_82] : memref<1x80x32xbf16, #tpu.memory_space<vmem>>, vector<1x80x32xbf16>
    %89 = vector.shape_cast %88 : vector<1x80x32xbf16> to vector<80x32xbf16>
    %90 = vector.shape_cast %87 : vector<80x32xbf16> to vector<1x80x32xbf16>
    tpu.vector_store %arg7[%c0_80, %c0_81, %c0_82], %90 {strides = array<i32>} : memref<1x80x32xbf16, #tpu.memory_space<vmem>>, vector<1x80x32xbf16>,
    return
  }
  func.func @transform_0(%arg0: i32) -> (i32, i32, i32) {
    %c0_i32 = arith.constant 0 : i32
    %c0_i32_0 = arith.constant 0 : i32
    %c0_i32_1 = arith.constant 0 : i32
    return %arg0, %c0_i32, %c0_i32_0 : i32, i32, i32
  }
  func.func @transform_1(%arg0: i32) -> (i32, i32, i32) {
    %c0_i32 = arith.constant 0 : i32
    %c0_i32_0 = arith.constant 0 : i32
    %c0_i32_1 = arith.constant 0 : i32
    %c0_i32_2 = arith.constant 0 : i32
    return %c0_i32, %c0_i32_0, %c0_i32_1 : i32, i32, i32
  }
  func.func @transform_2(%arg0: i32) -> (i32, i32) {
    %c0_i32 = arith.constant 0 : i32
    %c0_i32_0 = arith.constant 0 : i32
    %c0_i32_1 = arith.constant 0 : i32
    return %c0_i32, %c0_i32_0 : i32, i32
  }
  func.func @transform_3(%arg0: i32) -> (i32, i32) {
    %c0_i32 = arith.constant 0 : i32
    %c0_i32_0 = arith.constant 0 : i32
    %c0_i32_1 = arith.constant 0 : i32
    return %c0_i32, %c0_i32_0 : i32, i32
  }
  func.func @transform_4(%arg0: i32) -> (i32, i32, i32) {
    %c0_i32 = arith.constant 0 : i32
    %c0_i32_0 = arith.constant 0 : i32
    %c0_i32_1 = arith.constant 0 : i32
    %c0_i32_2 = arith.constant 0 : i32
    return %c0_i32, %c0_i32_0, %c0_i32_1 : i32, i32, i32
  }
  func.func @transform_5(%arg0: i32) -> (i32, i32) {
    %c0_i32 = arith.constant 0 : i32
    %c0_i32_0 = arith.constant 0 : i32
    %c0_i32_1 = arith.constant 0 : i32
    return %c0_i32, %c0_i32_0 : i32, i32
  }
  func.func @transform_6(%arg0: i32) -> (i32, i32, i32) {
    %c0_i32 = arith.constant 0 : i32
    %c0_i32_0 = arith.constant 0 : i32
    %c0_i32_1 = arith.constant 0 : i32
    return %arg0, %c0_i32, %c0_i32_0 : i32, i32, i32
  }
}

module attributes {stable_mosaic.version = 11 : i64} {
  func.func @_fused_block_kernel(%arg0: i32, %arg1: memref<1x40x128xbf16, #tpu.memory_space<vmem>>, %arg2: memref<4x128x64xbf16, #tpu.memory_space<vmem>>, %arg3: memref<1x64xf32, #tpu.memory_space<vmem>>, %arg4: memref<24x1xf32, #tpu.memory_space<vmem>>, %arg5: memref<9x64x64xbf16, #tpu.memory_space<vmem>>, %arg6: memref<1x64xf32, #tpu.memory_space<vmem>>, %arg7: memref<1x24x64xbf16, #tpu.memory_space<vmem>>, %arg8: memref<40x64xbf16, #tpu.memory_space<vmem>>) attributes {dimension_semantics = [#tpu.dimension_semantics<parallel>], iteration_bounds = array<i64: 2>, scalar_prefetch = 0 : i64, scratch_operands = 1 : i64, tpu.core_type = #tpu.core_type<tc>, window_params = [{transform_indices = @transform_0, window_bounds = array<i64: 1, 40, 128>}, {pipeline_mode = #tpu.pipeline_mode<synchronous>, transform_indices = @transform_1, window_bounds = array<i64: 4, 128, 64>}, {pipeline_mode = #tpu.pipeline_mode<synchronous>, transform_indices = @transform_2, window_bounds = array<i64: 1, 64>}, {pipeline_mode = #tpu.pipeline_mode<synchronous>, transform_indices = @transform_3, window_bounds = array<i64: 24, 1>}, {pipeline_mode = #tpu.pipeline_mode<synchronous>, transform_indices = @transform_4, window_bounds = array<i64: 9, 64, 64>}, {pipeline_mode = #tpu.pipeline_mode<synchronous>, transform_indices = @transform_5, window_bounds = array<i64: 1, 64>}, {transform_indices = @transform_6, window_bounds = array<i64: 1, 24, 64>}]} {
    %cst = arith.constant 0.000000e+00 : f32
    %0 = vector.broadcast %cst : f32 to vector<24x64xf32>
    %c0 = arith.constant 0 : index
    %c0_0 = arith.constant 0 : index
    %c0_1 = arith.constant 0 : index
    %1 = vector.load %arg1[%c0, %c0_0, %c0_1] : memref<1x40x128xbf16, #tpu.memory_space<vmem>>, vector<1x24x128xbf16>
    %2 = vector.shape_cast %1 : vector<1x24x128xbf16> to vector<24x128xbf16>
    %c0_2 = arith.constant 0 : index
    %c0_3 = arith.constant 0 : index
    %c0_4 = arith.constant 0 : index
    %3 = vector.load %arg2[%c0_2, %c0_3, %c0_4] : memref<4x128x64xbf16, #tpu.memory_space<vmem>>, vector<1x128x64xbf16>
    %4 = vector.shape_cast %3 : vector<1x128x64xbf16> to vector<128x64xbf16>
    %cst_5 = arith.constant dense<0.000000e+00> : vector<24x64xf32>
    %5 = tpu.matmul %2, %4, %cst_5 {dimension_numbers = #tpu.dot_dimension_numbers<[1], [0], [0], [1], [0, 0, 1, 1], [], []>} : vector<24x128xbf16>, vector<128x64xbf16>, vector<24x64xf32> -> vector<24x64xf32>
    %6 = arith.addf %0, %5 : vector<24x64xf32>
    %c0_6 = arith.constant 0 : index
    %c1 = arith.constant 1 : index
    %c0_7 = arith.constant 0 : index
    %7 = vector.load %arg1[%c0_6, %c1, %c0_7] : memref<1x40x128xbf16, #tpu.memory_space<vmem>>, vector<1x24x128xbf16>
    %8 = vector.shape_cast %7 : vector<1x24x128xbf16> to vector<24x128xbf16>
    %c1_8 = arith.constant 1 : index
    %c0_9 = arith.constant 0 : index
    %c0_10 = arith.constant 0 : index
    %9 = vector.load %arg2[%c1_8, %c0_9, %c0_10] : memref<4x128x64xbf16, #tpu.memory_space<vmem>>, vector<1x128x64xbf16>
    %10 = vector.shape_cast %9 : vector<1x128x64xbf16> to vector<128x64xbf16>
    %cst_11 = arith.constant dense<0.000000e+00> : vector<24x64xf32>
    %11 = tpu.matmul %8, %10, %cst_11 {dimension_numbers = #tpu.dot_dimension_numbers<[1], [0], [0], [1], [0, 0, 1, 1], [], []>} : vector<24x128xbf16>, vector<128x64xbf16>, vector<24x64xf32> -> vector<24x64xf32>
    %12 = arith.addf %6, %11 : vector<24x64xf32>
    %c0_12 = arith.constant 0 : index
    %c6 = arith.constant 6 : index
    %c0_13 = arith.constant 0 : index
    %13 = vector.load %arg1[%c0_12, %c6, %c0_13] : memref<1x40x128xbf16, #tpu.memory_space<vmem>>, vector<1x24x128xbf16>
    %14 = vector.shape_cast %13 : vector<1x24x128xbf16> to vector<24x128xbf16>
    %c2 = arith.constant 2 : index
    %c0_14 = arith.constant 0 : index
    %c0_15 = arith.constant 0 : index
    %15 = vector.load %arg2[%c2, %c0_14, %c0_15] : memref<4x128x64xbf16, #tpu.memory_space<vmem>>, vector<1x128x64xbf16>
    %16 = vector.shape_cast %15 : vector<1x128x64xbf16> to vector<128x64xbf16>
    %cst_16 = arith.constant dense<0.000000e+00> : vector<24x64xf32>
    %17 = tpu.matmul %14, %16, %cst_16 {dimension_numbers = #tpu.dot_dimension_numbers<[1], [0], [0], [1], [0, 0, 1, 1], [], []>} : vector<24x128xbf16>, vector<128x64xbf16>, vector<24x64xf32> -> vector<24x64xf32>
    %18 = arith.addf %12, %17 : vector<24x64xf32>
    %c0_17 = arith.constant 0 : index
    %c7 = arith.constant 7 : index
    %c0_18 = arith.constant 0 : index
    %19 = vector.load %arg1[%c0_17, %c7, %c0_18] : memref<1x40x128xbf16, #tpu.memory_space<vmem>>, vector<1x24x128xbf16>
    %20 = vector.shape_cast %19 : vector<1x24x128xbf16> to vector<24x128xbf16>
    %c3 = arith.constant 3 : index
    %c0_19 = arith.constant 0 : index
    %c0_20 = arith.constant 0 : index
    %21 = vector.load %arg2[%c3, %c0_19, %c0_20] : memref<4x128x64xbf16, #tpu.memory_space<vmem>>, vector<1x128x64xbf16>
    %22 = vector.shape_cast %21 : vector<1x128x64xbf16> to vector<128x64xbf16>
    %cst_21 = arith.constant dense<0.000000e+00> : vector<24x64xf32>
    %23 = tpu.matmul %20, %22, %cst_21 {dimension_numbers = #tpu.dot_dimension_numbers<[1], [0], [0], [1], [0, 0, 1, 1], [], []>} : vector<24x128xbf16>, vector<128x64xbf16>, vector<24x64xf32> -> vector<24x64xf32>
    %24 = arith.addf %18, %23 : vector<24x64xf32>
    %c0_22 = arith.constant 0 : index
    %c0_23 = arith.constant 0 : index
    %25 = vector.load %arg3[%c0_22, %c0_23] : memref<1x64xf32, #tpu.memory_space<vmem>>, vector<1x64xf32>
    %26 = vector.broadcast %25 : vector<1x64xf32> to vector<24x64xf32>
    %27 = arith.addf %24, %26 : vector<24x64xf32>
    %c0_24 = arith.constant 0 : index
    %c0_25 = arith.constant 0 : index
    %28 = vector.load %arg4[%c0_24, %c0_25] : memref<24x1xf32, #tpu.memory_space<vmem>>, vector<24x1xf32>
    %29 = vector.broadcast %28 : vector<24x1xf32> to vector<24x64xf32>
    %30 = arith.mulf %27, %29 : vector<24x64xf32>
    %cst_26 = arith.constant 0.000000e+00 : bf16
    %31 = vector.broadcast %cst_26 : bf16 to vector<40x64xbf16>
    %c0_27 = arith.constant 0 : index
    %c0_28 = arith.constant 0 : index
    %32 = vector.load %arg8[%c0_27, %c0_28] : memref<40x64xbf16, #tpu.memory_space<vmem>>, vector<40x64xbf16>
    tpu.vector_store %arg8[%c0_27, %c0_28], %31 {strides = array<i32>} : memref<40x64xbf16, #tpu.memory_space<vmem>>, vector<40x64xbf16>,
    %33 = arith.truncf %30 : vector<24x64xf32> to vector<24x64xbf16>
    %c7_29 = arith.constant 7 : index
    %c0_30 = arith.constant 0 : index
    %34 = vector.load %arg8[%c7_29, %c0_30] : memref<40x64xbf16, #tpu.memory_space<vmem>>, vector<24x64xbf16>
    tpu.vector_store %arg8[%c7_29, %c0_30], %33 {strides = array<i32>} : memref<40x64xbf16, #tpu.memory_space<vmem>>, vector<24x64xbf16>,
    %cst_31 = arith.constant 0.000000e+00 : f32
    %35 = vector.broadcast %cst_31 : f32 to vector<24x64xf32>
    %c0_32 = arith.constant 0 : index
    %c0_33 = arith.constant 0 : index
    %36 = vector.load %arg8[%c0_32, %c0_33] : memref<40x64xbf16, #tpu.memory_space<vmem>>, vector<24x64xbf16>
    %c0_34 = arith.constant 0 : index
    %c0_35 = arith.constant 0 : index
    %c0_36 = arith.constant 0 : index
    %37 = vector.load %arg5[%c0_34, %c0_35, %c0_36] : memref<9x64x64xbf16, #tpu.memory_space<vmem>>, vector<1x64x64xbf16>
    %38 = vector.shape_cast %37 : vector<1x64x64xbf16> to vector<64x64xbf16>
    %cst_37 = arith.constant dense<0.000000e+00> : vector<24x64xf32>
    %39 = tpu.matmul %36, %38, %cst_37 {dimension_numbers = #tpu.dot_dimension_numbers<[1], [0], [0], [1], [0, 0, 1, 1], [], []>} : vector<24x64xbf16>, vector<64x64xbf16>, vector<24x64xf32> -> vector<24x64xf32>
    %40 = arith.addf %35, %39 : vector<24x64xf32>
    %c1_38 = arith.constant 1 : index
    %c0_39 = arith.constant 0 : index
    %41 = vector.load %arg8[%c1_38, %c0_39] : memref<40x64xbf16, #tpu.memory_space<vmem>>, vector<24x64xbf16>
    %c1_40 = arith.constant 1 : index
    %c0_41 = arith.constant 0 : index
    %c0_42 = arith.constant 0 : index
    %42 = vector.load %arg5[%c1_40, %c0_41, %c0_42] : memref<9x64x64xbf16, #tpu.memory_space<vmem>>, vector<1x64x64xbf16>
    %43 = vector.shape_cast %42 : vector<1x64x64xbf16> to vector<64x64xbf16>
    %cst_43 = arith.constant dense<0.000000e+00> : vector<24x64xf32>
    %44 = tpu.matmul %41, %43, %cst_43 {dimension_numbers = #tpu.dot_dimension_numbers<[1], [0], [0], [1], [0, 0, 1, 1], [], []>} : vector<24x64xbf16>, vector<64x64xbf16>, vector<24x64xf32> -> vector<24x64xf32>
    %45 = arith.addf %40, %44 : vector<24x64xf32>
    %c2_44 = arith.constant 2 : index
    %c0_45 = arith.constant 0 : index
    %46 = vector.load %arg8[%c2_44, %c0_45] : memref<40x64xbf16, #tpu.memory_space<vmem>>, vector<24x64xbf16>
    %c2_46 = arith.constant 2 : index
    %c0_47 = arith.constant 0 : index
    %c0_48 = arith.constant 0 : index
    %47 = vector.load %arg5[%c2_46, %c0_47, %c0_48] : memref<9x64x64xbf16, #tpu.memory_space<vmem>>, vector<1x64x64xbf16>
    %48 = vector.shape_cast %47 : vector<1x64x64xbf16> to vector<64x64xbf16>
    %cst_49 = arith.constant dense<0.000000e+00> : vector<24x64xf32>
    %49 = tpu.matmul %46, %48, %cst_49 {dimension_numbers = #tpu.dot_dimension_numbers<[1], [0], [0], [1], [0, 0, 1, 1], [], []>} : vector<24x64xbf16>, vector<64x64xbf16>, vector<24x64xf32> -> vector<24x64xf32>
    %50 = arith.addf %45, %49 : vector<24x64xf32>
    %c6_50 = arith.constant 6 : index
    %c0_51 = arith.constant 0 : index
    %51 = vector.load %arg8[%c6_50, %c0_51] : memref<40x64xbf16, #tpu.memory_space<vmem>>, vector<24x64xbf16>
    %c3_52 = arith.constant 3 : index
    %c0_53 = arith.constant 0 : index
    %c0_54 = arith.constant 0 : index
    %52 = vector.load %arg5[%c3_52, %c0_53, %c0_54] : memref<9x64x64xbf16, #tpu.memory_space<vmem>>, vector<1x64x64xbf16>
    %53 = vector.shape_cast %52 : vector<1x64x64xbf16> to vector<64x64xbf16>
    %cst_55 = arith.constant dense<0.000000e+00> : vector<24x64xf32>
    %54 = tpu.matmul %51, %53, %cst_55 {dimension_numbers = #tpu.dot_dimension_numbers<[1], [0], [0], [1], [0, 0, 1, 1], [], []>} : vector<24x64xbf16>, vector<64x64xbf16>, vector<24x64xf32> -> vector<24x64xf32>
    %55 = arith.addf %50, %54 : vector<24x64xf32>
    %c7_56 = arith.constant 7 : index
    %c0_57 = arith.constant 0 : index
    %56 = vector.load %arg8[%c7_56, %c0_57] : memref<40x64xbf16, #tpu.memory_space<vmem>>, vector<24x64xbf16>
    %c4 = arith.constant 4 : index
    %c0_58 = arith.constant 0 : index
    %c0_59 = arith.constant 0 : index
    %57 = vector.load %arg5[%c4, %c0_58, %c0_59] : memref<9x64x64xbf16, #tpu.memory_space<vmem>>, vector<1x64x64xbf16>
    %58 = vector.shape_cast %57 : vector<1x64x64xbf16> to vector<64x64xbf16>
    %cst_60 = arith.constant dense<0.000000e+00> : vector<24x64xf32>
    %59 = tpu.matmul %56, %58, %cst_60 {dimension_numbers = #tpu.dot_dimension_numbers<[1], [0], [0], [1], [0, 0, 1, 1], [], []>} : vector<24x64xbf16>, vector<64x64xbf16>, vector<24x64xf32> -> vector<24x64xf32>
    %60 = arith.addf %55, %59 : vector<24x64xf32>
    %c8 = arith.constant 8 : index
    %c0_61 = arith.constant 0 : index
    %61 = vector.load %arg8[%c8, %c0_61] : memref<40x64xbf16, #tpu.memory_space<vmem>>, vector<24x64xbf16>
    %c5 = arith.constant 5 : index
    %c0_62 = arith.constant 0 : index
    %c0_63 = arith.constant 0 : index
    %62 = vector.load %arg5[%c5, %c0_62, %c0_63] : memref<9x64x64xbf16, #tpu.memory_space<vmem>>, vector<1x64x64xbf16>
    %63 = vector.shape_cast %62 : vector<1x64x64xbf16> to vector<64x64xbf16>
    %cst_64 = arith.constant dense<0.000000e+00> : vector<24x64xf32>
    %64 = tpu.matmul %61, %63, %cst_64 {dimension_numbers = #tpu.dot_dimension_numbers<[1], [0], [0], [1], [0, 0, 1, 1], [], []>} : vector<24x64xbf16>, vector<64x64xbf16>, vector<24x64xf32> -> vector<24x64xf32>
    %65 = arith.addf %60, %64 : vector<24x64xf32>
    %c12 = arith.constant 12 : index
    %c0_65 = arith.constant 0 : index
    %66 = vector.load %arg8[%c12, %c0_65] : memref<40x64xbf16, #tpu.memory_space<vmem>>, vector<24x64xbf16>
    %c6_66 = arith.constant 6 : index
    %c0_67 = arith.constant 0 : index
    %c0_68 = arith.constant 0 : index
    %67 = vector.load %arg5[%c6_66, %c0_67, %c0_68] : memref<9x64x64xbf16, #tpu.memory_space<vmem>>, vector<1x64x64xbf16>
    %68 = vector.shape_cast %67 : vector<1x64x64xbf16> to vector<64x64xbf16>
    %cst_69 = arith.constant dense<0.000000e+00> : vector<24x64xf32>
    %69 = tpu.matmul %66, %68, %cst_69 {dimension_numbers = #tpu.dot_dimension_numbers<[1], [0], [0], [1], [0, 0, 1, 1], [], []>} : vector<24x64xbf16>, vector<64x64xbf16>, vector<24x64xf32> -> vector<24x64xf32>
    %70 = arith.addf %65, %69 : vector<24x64xf32>
    %c13 = arith.constant 13 : index
    %c0_70 = arith.constant 0 : index
    %71 = vector.load %arg8[%c13, %c0_70] : memref<40x64xbf16, #tpu.memory_space<vmem>>, vector<24x64xbf16>
    %c7_71 = arith.constant 7 : index
    %c0_72 = arith.constant 0 : index
    %c0_73 = arith.constant 0 : index
    %72 = vector.load %arg5[%c7_71, %c0_72, %c0_73] : memref<9x64x64xbf16, #tpu.memory_space<vmem>>, vector<1x64x64xbf16>
    %73 = vector.shape_cast %72 : vector<1x64x64xbf16> to vector<64x64xbf16>
    %cst_74 = arith.constant dense<0.000000e+00> : vector<24x64xf32>
    %74 = tpu.matmul %71, %73, %cst_74 {dimension_numbers = #tpu.dot_dimension_numbers<[1], [0], [0], [1], [0, 0, 1, 1], [], []>} : vector<24x64xbf16>, vector<64x64xbf16>, vector<24x64xf32> -> vector<24x64xf32>
    %75 = arith.addf %70, %74 : vector<24x64xf32>
    %c14 = arith.constant 14 : index
    %c0_75 = arith.constant 0 : index
    %76 = vector.load %arg8[%c14, %c0_75] : memref<40x64xbf16, #tpu.memory_space<vmem>>, vector<24x64xbf16>
    %c8_76 = arith.constant 8 : index
    %c0_77 = arith.constant 0 : index
    %c0_78 = arith.constant 0 : index
    %77 = vector.load %arg5[%c8_76, %c0_77, %c0_78] : memref<9x64x64xbf16, #tpu.memory_space<vmem>>, vector<1x64x64xbf16>
    %78 = vector.shape_cast %77 : vector<1x64x64xbf16> to vector<64x64xbf16>
    %cst_79 = arith.constant dense<0.000000e+00> : vector<24x64xf32>
    %79 = tpu.matmul %76, %78, %cst_79 {dimension_numbers = #tpu.dot_dimension_numbers<[1], [0], [0], [1], [0, 0, 1, 1], [], []>} : vector<24x64xbf16>, vector<64x64xbf16>, vector<24x64xf32> -> vector<24x64xf32>
    %80 = arith.addf %75, %79 : vector<24x64xf32>
    %c0_80 = arith.constant 0 : index
    %c0_81 = arith.constant 0 : index
    %81 = vector.load %arg6[%c0_80, %c0_81] : memref<1x64xf32, #tpu.memory_space<vmem>>, vector<1x64xf32>
    %82 = vector.broadcast %81 : vector<1x64xf32> to vector<24x64xf32>
    %83 = arith.addf %80, %82 : vector<24x64xf32>
    %cst_82 = arith.constant 0.00999999977 : f32
    %84 = vector.broadcast %cst_82 : f32 to vector<24x64xf32>
    %85 = arith.mulf %84, %83 : vector<24x64xf32>
    %86 = arith.maximumf %83, %85 : vector<24x64xf32>
    %87 = arith.truncf %86 : vector<24x64xf32> to vector<24x64xbf16>
    %c0_83 = arith.constant 0 : index
    %c0_84 = arith.constant 0 : index
    %c0_85 = arith.constant 0 : index
    %88 = vector.load %arg7[%c0_83, %c0_84, %c0_85] : memref<1x24x64xbf16, #tpu.memory_space<vmem>>, vector<1x24x64xbf16>
    %89 = vector.shape_cast %88 : vector<1x24x64xbf16> to vector<24x64xbf16>
    %90 = vector.shape_cast %87 : vector<24x64xbf16> to vector<1x24x64xbf16>
    tpu.vector_store %arg7[%c0_83, %c0_84, %c0_85], %90 {strides = array<i32>} : memref<1x24x64xbf16, #tpu.memory_space<vmem>>, vector<1x24x64xbf16>,
    return
  }
  func.func @transform_0(%arg0: i32) -> (i32, i32, i32) {
    %c0_i32 = arith.constant 0 : i32
    %c0_i32_0 = arith.constant 0 : i32
    %c0_i32_1 = arith.constant 0 : i32
    return %arg0, %c0_i32, %c0_i32_0 : i32, i32, i32
  }
  func.func @transform_1(%arg0: i32) -> (i32, i32, i32) {
    %c0_i32 = arith.constant 0 : i32
    %c0_i32_0 = arith.constant 0 : i32
    %c0_i32_1 = arith.constant 0 : i32
    %c0_i32_2 = arith.constant 0 : i32
    return %c0_i32, %c0_i32_0, %c0_i32_1 : i32, i32, i32
  }
  func.func @transform_2(%arg0: i32) -> (i32, i32) {
    %c0_i32 = arith.constant 0 : i32
    %c0_i32_0 = arith.constant 0 : i32
    %c0_i32_1 = arith.constant 0 : i32
    return %c0_i32, %c0_i32_0 : i32, i32
  }
  func.func @transform_3(%arg0: i32) -> (i32, i32) {
    %c0_i32 = arith.constant 0 : i32
    %c0_i32_0 = arith.constant 0 : i32
    %c0_i32_1 = arith.constant 0 : i32
    return %c0_i32, %c0_i32_0 : i32, i32
  }
  func.func @transform_4(%arg0: i32) -> (i32, i32, i32) {
    %c0_i32 = arith.constant 0 : i32
    %c0_i32_0 = arith.constant 0 : i32
    %c0_i32_1 = arith.constant 0 : i32
    %c0_i32_2 = arith.constant 0 : i32
    return %c0_i32, %c0_i32_0, %c0_i32_1 : i32, i32, i32
  }
  func.func @transform_5(%arg0: i32) -> (i32, i32) {
    %c0_i32 = arith.constant 0 : i32
    %c0_i32_0 = arith.constant 0 : i32
    %c0_i32_1 = arith.constant 0 : i32
    return %c0_i32, %c0_i32_0 : i32, i32
  }
  func.func @transform_6(%arg0: i32) -> (i32, i32, i32) {
    %c0_i32 = arith.constant 0 : i32
    %c0_i32_0 = arith.constant 0 : i32
    %c0_i32_1 = arith.constant 0 : i32
    return %arg0, %c0_i32, %c0_i32_0 : i32, i32, i32
  }
}

module attributes {stable_mosaic.version = 11 : i64} {
  func.func @_fused_block_kernel(%arg0: i32, %arg1: memref<1x16x256xbf16, #tpu.memory_space<vmem>>, %arg2: memref<4x256x128xbf16, #tpu.memory_space<vmem>>, %arg3: memref<1x128xf32, #tpu.memory_space<vmem>>, %arg4: memref<8x1xf32, #tpu.memory_space<vmem>>, %arg5: memref<9x128x128xbf16, #tpu.memory_space<vmem>>, %arg6: memref<1x128xf32, #tpu.memory_space<vmem>>, %arg7: memref<1x8x128xf32, #tpu.memory_space<vmem>>, %arg8: memref<24x128xbf16, #tpu.memory_space<vmem>>) attributes {dimension_semantics = [#tpu.dimension_semantics<parallel>], iteration_bounds = array<i64: 2>, scalar_prefetch = 0 : i64, scratch_operands = 1 : i64, tpu.core_type = #tpu.core_type<tc>, window_params = [{transform_indices = @transform_0, window_bounds = array<i64: 1, 16, 256>}, {pipeline_mode = #tpu.pipeline_mode<synchronous>, transform_indices = @transform_1, window_bounds = array<i64: 4, 256, 128>}, {pipeline_mode = #tpu.pipeline_mode<synchronous>, transform_indices = @transform_2, window_bounds = array<i64: 1, 128>}, {pipeline_mode = #tpu.pipeline_mode<synchronous>, transform_indices = @transform_3, window_bounds = array<i64: 8, 1>}, {pipeline_mode = #tpu.pipeline_mode<synchronous>, transform_indices = @transform_4, window_bounds = array<i64: 9, 128, 128>}, {pipeline_mode = #tpu.pipeline_mode<synchronous>, transform_indices = @transform_5, window_bounds = array<i64: 1, 128>}, {transform_indices = @transform_6, window_bounds = array<i64: 1, 8, 128>}]} {
    %cst = arith.constant 0.000000e+00 : f32
    %0 = vector.broadcast %cst : f32 to vector<8x128xf32>
    %c0 = arith.constant 0 : index
    %c0_0 = arith.constant 0 : index
    %c0_1 = arith.constant 0 : index
    %1 = vector.load %arg1[%c0, %c0_0, %c0_1] : memref<1x16x256xbf16, #tpu.memory_space<vmem>>, vector<1x8x256xbf16>
    %2 = vector.shape_cast %1 : vector<1x8x256xbf16> to vector<8x256xbf16>
    %c0_2 = arith.constant 0 : index
    %c0_3 = arith.constant 0 : index
    %c0_4 = arith.constant 0 : index
    %3 = vector.load %arg2[%c0_2, %c0_3, %c0_4] : memref<4x256x128xbf16, #tpu.memory_space<vmem>>, vector<1x256x128xbf16>
    %4 = vector.shape_cast %3 : vector<1x256x128xbf16> to vector<256x128xbf16>
    %cst_5 = arith.constant dense<0.000000e+00> : vector<8x128xf32>
    %5 = tpu.matmul %2, %4, %cst_5 {dimension_numbers = #tpu.dot_dimension_numbers<[1], [0], [0], [1], [0, 0, 1, 1], [], []>} : vector<8x256xbf16>, vector<256x128xbf16>, vector<8x128xf32> -> vector<8x128xf32>
    %6 = arith.addf %0, %5 : vector<8x128xf32>
    %c0_6 = arith.constant 0 : index
    %c1 = arith.constant 1 : index
    %c0_7 = arith.constant 0 : index
    %7 = vector.load %arg1[%c0_6, %c1, %c0_7] : memref<1x16x256xbf16, #tpu.memory_space<vmem>>, vector<1x8x256xbf16>
    %8 = vector.shape_cast %7 : vector<1x8x256xbf16> to vector<8x256xbf16>
    %c1_8 = arith.constant 1 : index
    %c0_9 = arith.constant 0 : index
    %c0_10 = arith.constant 0 : index
    %9 = vector.load %arg2[%c1_8, %c0_9, %c0_10] : memref<4x256x128xbf16, #tpu.memory_space<vmem>>, vector<1x256x128xbf16>
    %10 = vector.shape_cast %9 : vector<1x256x128xbf16> to vector<256x128xbf16>
    %cst_11 = arith.constant dense<0.000000e+00> : vector<8x128xf32>
    %11 = tpu.matmul %8, %10, %cst_11 {dimension_numbers = #tpu.dot_dimension_numbers<[1], [0], [0], [1], [0, 0, 1, 1], [], []>} : vector<8x256xbf16>, vector<256x128xbf16>, vector<8x128xf32> -> vector<8x128xf32>
    %12 = arith.addf %6, %11 : vector<8x128xf32>
    %c0_12 = arith.constant 0 : index
    %c4 = arith.constant 4 : index
    %c0_13 = arith.constant 0 : index
    %13 = vector.load %arg1[%c0_12, %c4, %c0_13] : memref<1x16x256xbf16, #tpu.memory_space<vmem>>, vector<1x8x256xbf16>
    %14 = vector.shape_cast %13 : vector<1x8x256xbf16> to vector<8x256xbf16>
    %c2 = arith.constant 2 : index
    %c0_14 = arith.constant 0 : index
    %c0_15 = arith.constant 0 : index
    %15 = vector.load %arg2[%c2, %c0_14, %c0_15] : memref<4x256x128xbf16, #tpu.memory_space<vmem>>, vector<1x256x128xbf16>
    %16 = vector.shape_cast %15 : vector<1x256x128xbf16> to vector<256x128xbf16>
    %cst_16 = arith.constant dense<0.000000e+00> : vector<8x128xf32>
    %17 = tpu.matmul %14, %16, %cst_16 {dimension_numbers = #tpu.dot_dimension_numbers<[1], [0], [0], [1], [0, 0, 1, 1], [], []>} : vector<8x256xbf16>, vector<256x128xbf16>, vector<8x128xf32> -> vector<8x128xf32>
    %18 = arith.addf %12, %17 : vector<8x128xf32>
    %c0_17 = arith.constant 0 : index
    %c5 = arith.constant 5 : index
    %c0_18 = arith.constant 0 : index
    %19 = vector.load %arg1[%c0_17, %c5, %c0_18] : memref<1x16x256xbf16, #tpu.memory_space<vmem>>, vector<1x8x256xbf16>
    %20 = vector.shape_cast %19 : vector<1x8x256xbf16> to vector<8x256xbf16>
    %c3 = arith.constant 3 : index
    %c0_19 = arith.constant 0 : index
    %c0_20 = arith.constant 0 : index
    %21 = vector.load %arg2[%c3, %c0_19, %c0_20] : memref<4x256x128xbf16, #tpu.memory_space<vmem>>, vector<1x256x128xbf16>
    %22 = vector.shape_cast %21 : vector<1x256x128xbf16> to vector<256x128xbf16>
    %cst_21 = arith.constant dense<0.000000e+00> : vector<8x128xf32>
    %23 = tpu.matmul %20, %22, %cst_21 {dimension_numbers = #tpu.dot_dimension_numbers<[1], [0], [0], [1], [0, 0, 1, 1], [], []>} : vector<8x256xbf16>, vector<256x128xbf16>, vector<8x128xf32> -> vector<8x128xf32>
    %24 = arith.addf %18, %23 : vector<8x128xf32>
    %c0_22 = arith.constant 0 : index
    %c0_23 = arith.constant 0 : index
    %25 = vector.load %arg3[%c0_22, %c0_23] : memref<1x128xf32, #tpu.memory_space<vmem>>, vector<1x128xf32>
    %26 = vector.broadcast %25 : vector<1x128xf32> to vector<8x128xf32>
    %27 = arith.addf %24, %26 : vector<8x128xf32>
    %c0_24 = arith.constant 0 : index
    %c0_25 = arith.constant 0 : index
    %28 = vector.load %arg4[%c0_24, %c0_25] : memref<8x1xf32, #tpu.memory_space<vmem>>, vector<8x1xf32>
    %29 = vector.broadcast %28 : vector<8x1xf32> to vector<8x128xf32>
    %30 = arith.mulf %27, %29 : vector<8x128xf32>
    %cst_26 = arith.constant 0.000000e+00 : bf16
    %31 = vector.broadcast %cst_26 : bf16 to vector<24x128xbf16>
    %c0_27 = arith.constant 0 : index
    %c0_28 = arith.constant 0 : index
    %32 = vector.load %arg8[%c0_27, %c0_28] : memref<24x128xbf16, #tpu.memory_space<vmem>>, vector<24x128xbf16>
    tpu.vector_store %arg8[%c0_27, %c0_28], %31 {strides = array<i32>} : memref<24x128xbf16, #tpu.memory_space<vmem>>, vector<24x128xbf16>,
    %33 = arith.truncf %30 : vector<8x128xf32> to vector<8x128xbf16>
    %c5_29 = arith.constant 5 : index
    %c0_30 = arith.constant 0 : index
    %34 = vector.load %arg8[%c5_29, %c0_30] : memref<24x128xbf16, #tpu.memory_space<vmem>>, vector<8x128xbf16>
    tpu.vector_store %arg8[%c5_29, %c0_30], %33 {strides = array<i32>} : memref<24x128xbf16, #tpu.memory_space<vmem>>, vector<8x128xbf16>,
    %cst_31 = arith.constant 0.000000e+00 : f32
    %35 = vector.broadcast %cst_31 : f32 to vector<8x128xf32>
    %c0_32 = arith.constant 0 : index
    %c0_33 = arith.constant 0 : index
    %36 = vector.load %arg8[%c0_32, %c0_33] : memref<24x128xbf16, #tpu.memory_space<vmem>>, vector<8x128xbf16>
    %c0_34 = arith.constant 0 : index
    %c0_35 = arith.constant 0 : index
    %c0_36 = arith.constant 0 : index
    %37 = vector.load %arg5[%c0_34, %c0_35, %c0_36] : memref<9x128x128xbf16, #tpu.memory_space<vmem>>, vector<1x128x128xbf16>
    %38 = vector.shape_cast %37 : vector<1x128x128xbf16> to vector<128x128xbf16>
    %cst_37 = arith.constant dense<0.000000e+00> : vector<8x128xf32>
    %39 = tpu.matmul %36, %38, %cst_37 {dimension_numbers = #tpu.dot_dimension_numbers<[1], [0], [0], [1], [0, 0, 1, 1], [], []>} : vector<8x128xbf16>, vector<128x128xbf16>, vector<8x128xf32> -> vector<8x128xf32>
    %40 = arith.addf %35, %39 : vector<8x128xf32>
    %c1_38 = arith.constant 1 : index
    %c0_39 = arith.constant 0 : index
    %41 = vector.load %arg8[%c1_38, %c0_39] : memref<24x128xbf16, #tpu.memory_space<vmem>>, vector<8x128xbf16>
    %c1_40 = arith.constant 1 : index
    %c0_41 = arith.constant 0 : index
    %c0_42 = arith.constant 0 : index
    %42 = vector.load %arg5[%c1_40, %c0_41, %c0_42] : memref<9x128x128xbf16, #tpu.memory_space<vmem>>, vector<1x128x128xbf16>
    %43 = vector.shape_cast %42 : vector<1x128x128xbf16> to vector<128x128xbf16>
    %cst_43 = arith.constant dense<0.000000e+00> : vector<8x128xf32>
    %44 = tpu.matmul %41, %43, %cst_43 {dimension_numbers = #tpu.dot_dimension_numbers<[1], [0], [0], [1], [0, 0, 1, 1], [], []>} : vector<8x128xbf16>, vector<128x128xbf16>, vector<8x128xf32> -> vector<8x128xf32>
    %45 = arith.addf %40, %44 : vector<8x128xf32>
    %c2_44 = arith.constant 2 : index
    %c0_45 = arith.constant 0 : index
    %46 = vector.load %arg8[%c2_44, %c0_45] : memref<24x128xbf16, #tpu.memory_space<vmem>>, vector<8x128xbf16>
    %c2_46 = arith.constant 2 : index
    %c0_47 = arith.constant 0 : index
    %c0_48 = arith.constant 0 : index
    %47 = vector.load %arg5[%c2_46, %c0_47, %c0_48] : memref<9x128x128xbf16, #tpu.memory_space<vmem>>, vector<1x128x128xbf16>
    %48 = vector.shape_cast %47 : vector<1x128x128xbf16> to vector<128x128xbf16>
    %cst_49 = arith.constant dense<0.000000e+00> : vector<8x128xf32>
    %49 = tpu.matmul %46, %48, %cst_49 {dimension_numbers = #tpu.dot_dimension_numbers<[1], [0], [0], [1], [0, 0, 1, 1], [], []>} : vector<8x128xbf16>, vector<128x128xbf16>, vector<8x128xf32> -> vector<8x128xf32>
    %50 = arith.addf %45, %49 : vector<8x128xf32>
    %c4_50 = arith.constant 4 : index
    %c0_51 = arith.constant 0 : index
    %51 = vector.load %arg8[%c4_50, %c0_51] : memref<24x128xbf16, #tpu.memory_space<vmem>>, vector<8x128xbf16>
    %c3_52 = arith.constant 3 : index
    %c0_53 = arith.constant 0 : index
    %c0_54 = arith.constant 0 : index
    %52 = vector.load %arg5[%c3_52, %c0_53, %c0_54] : memref<9x128x128xbf16, #tpu.memory_space<vmem>>, vector<1x128x128xbf16>
    %53 = vector.shape_cast %52 : vector<1x128x128xbf16> to vector<128x128xbf16>
    %cst_55 = arith.constant dense<0.000000e+00> : vector<8x128xf32>
    %54 = tpu.matmul %51, %53, %cst_55 {dimension_numbers = #tpu.dot_dimension_numbers<[1], [0], [0], [1], [0, 0, 1, 1], [], []>} : vector<8x128xbf16>, vector<128x128xbf16>, vector<8x128xf32> -> vector<8x128xf32>
    %55 = arith.addf %50, %54 : vector<8x128xf32>
    %c5_56 = arith.constant 5 : index
    %c0_57 = arith.constant 0 : index
    %56 = vector.load %arg8[%c5_56, %c0_57] : memref<24x128xbf16, #tpu.memory_space<vmem>>, vector<8x128xbf16>
    %c4_58 = arith.constant 4 : index
    %c0_59 = arith.constant 0 : index
    %c0_60 = arith.constant 0 : index
    %57 = vector.load %arg5[%c4_58, %c0_59, %c0_60] : memref<9x128x128xbf16, #tpu.memory_space<vmem>>, vector<1x128x128xbf16>
    %58 = vector.shape_cast %57 : vector<1x128x128xbf16> to vector<128x128xbf16>
    %cst_61 = arith.constant dense<0.000000e+00> : vector<8x128xf32>
    %59 = tpu.matmul %56, %58, %cst_61 {dimension_numbers = #tpu.dot_dimension_numbers<[1], [0], [0], [1], [0, 0, 1, 1], [], []>} : vector<8x128xbf16>, vector<128x128xbf16>, vector<8x128xf32> -> vector<8x128xf32>
    %60 = arith.addf %55, %59 : vector<8x128xf32>
    %c6 = arith.constant 6 : index
    %c0_62 = arith.constant 0 : index
    %61 = vector.load %arg8[%c6, %c0_62] : memref<24x128xbf16, #tpu.memory_space<vmem>>, vector<8x128xbf16>
    %c5_63 = arith.constant 5 : index
    %c0_64 = arith.constant 0 : index
    %c0_65 = arith.constant 0 : index
    %62 = vector.load %arg5[%c5_63, %c0_64, %c0_65] : memref<9x128x128xbf16, #tpu.memory_space<vmem>>, vector<1x128x128xbf16>
    %63 = vector.shape_cast %62 : vector<1x128x128xbf16> to vector<128x128xbf16>
    %cst_66 = arith.constant dense<0.000000e+00> : vector<8x128xf32>
    %64 = tpu.matmul %61, %63, %cst_66 {dimension_numbers = #tpu.dot_dimension_numbers<[1], [0], [0], [1], [0, 0, 1, 1], [], []>} : vector<8x128xbf16>, vector<128x128xbf16>, vector<8x128xf32> -> vector<8x128xf32>
    %65 = arith.addf %60, %64 : vector<8x128xf32>
    %c8 = arith.constant 8 : index
    %c0_67 = arith.constant 0 : index
    %66 = vector.load %arg8[%c8, %c0_67] : memref<24x128xbf16, #tpu.memory_space<vmem>>, vector<8x128xbf16>
    %c6_68 = arith.constant 6 : index
    %c0_69 = arith.constant 0 : index
    %c0_70 = arith.constant 0 : index
    %67 = vector.load %arg5[%c6_68, %c0_69, %c0_70] : memref<9x128x128xbf16, #tpu.memory_space<vmem>>, vector<1x128x128xbf16>
    %68 = vector.shape_cast %67 : vector<1x128x128xbf16> to vector<128x128xbf16>
    %cst_71 = arith.constant dense<0.000000e+00> : vector<8x128xf32>
    %69 = tpu.matmul %66, %68, %cst_71 {dimension_numbers = #tpu.dot_dimension_numbers<[1], [0], [0], [1], [0, 0, 1, 1], [], []>} : vector<8x128xbf16>, vector<128x128xbf16>, vector<8x128xf32> -> vector<8x128xf32>
    %70 = arith.addf %65, %69 : vector<8x128xf32>
    %c9 = arith.constant 9 : index
    %c0_72 = arith.constant 0 : index
    %71 = vector.load %arg8[%c9, %c0_72] : memref<24x128xbf16, #tpu.memory_space<vmem>>, vector<8x128xbf16>
    %c7 = arith.constant 7 : index
    %c0_73 = arith.constant 0 : index
    %c0_74 = arith.constant 0 : index
    %72 = vector.load %arg5[%c7, %c0_73, %c0_74] : memref<9x128x128xbf16, #tpu.memory_space<vmem>>, vector<1x128x128xbf16>
    %73 = vector.shape_cast %72 : vector<1x128x128xbf16> to vector<128x128xbf16>
    %cst_75 = arith.constant dense<0.000000e+00> : vector<8x128xf32>
    %74 = tpu.matmul %71, %73, %cst_75 {dimension_numbers = #tpu.dot_dimension_numbers<[1], [0], [0], [1], [0, 0, 1, 1], [], []>} : vector<8x128xbf16>, vector<128x128xbf16>, vector<8x128xf32> -> vector<8x128xf32>
    %75 = arith.addf %70, %74 : vector<8x128xf32>
    %c10 = arith.constant 10 : index
    %c0_76 = arith.constant 0 : index
    %76 = vector.load %arg8[%c10, %c0_76] : memref<24x128xbf16, #tpu.memory_space<vmem>>, vector<8x128xbf16>
    %c8_77 = arith.constant 8 : index
    %c0_78 = arith.constant 0 : index
    %c0_79 = arith.constant 0 : index
    %77 = vector.load %arg5[%c8_77, %c0_78, %c0_79] : memref<9x128x128xbf16, #tpu.memory_space<vmem>>, vector<1x128x128xbf16>
    %78 = vector.shape_cast %77 : vector<1x128x128xbf16> to vector<128x128xbf16>
    %cst_80 = arith.constant dense<0.000000e+00> : vector<8x128xf32>
    %79 = tpu.matmul %76, %78, %cst_80 {dimension_numbers = #tpu.dot_dimension_numbers<[1], [0], [0], [1], [0, 0, 1, 1], [], []>} : vector<8x128xbf16>, vector<128x128xbf16>, vector<8x128xf32> -> vector<8x128xf32>
    %80 = arith.addf %75, %79 : vector<8x128xf32>
    %c0_81 = arith.constant 0 : index
    %c0_82 = arith.constant 0 : index
    %81 = vector.load %arg6[%c0_81, %c0_82] : memref<1x128xf32, #tpu.memory_space<vmem>>, vector<1x128xf32>
    %82 = vector.broadcast %81 : vector<1x128xf32> to vector<8x128xf32>
    %83 = arith.addf %80, %82 : vector<8x128xf32>
    %cst_83 = arith.constant 0.00999999977 : f32
    %84 = vector.broadcast %cst_83 : f32 to vector<8x128xf32>
    %85 = arith.mulf %84, %83 : vector<8x128xf32>
    %86 = arith.maximumf %83, %85 : vector<8x128xf32>
    %c0_84 = arith.constant 0 : index
    %c0_85 = arith.constant 0 : index
    %c0_86 = arith.constant 0 : index
    %87 = vector.load %arg7[%c0_84, %c0_85, %c0_86] : memref<1x8x128xf32, #tpu.memory_space<vmem>>, vector<1x8x128xf32>
    %88 = vector.shape_cast %87 : vector<1x8x128xf32> to vector<8x128xf32>
    %89 = vector.shape_cast %86 : vector<8x128xf32> to vector<1x8x128xf32>
    tpu.vector_store %arg7[%c0_84, %c0_85, %c0_86], %89 {strides = array<i32>} : memref<1x8x128xf32, #tpu.memory_space<vmem>>, vector<1x8x128xf32>,
    return
  }
  func.func @transform_0(%arg0: i32) -> (i32, i32, i32) {
    %c0_i32 = arith.constant 0 : i32
    %c0_i32_0 = arith.constant 0 : i32
    %c0_i32_1 = arith.constant 0 : i32
    return %arg0, %c0_i32, %c0_i32_0 : i32, i32, i32
  }
  func.func @transform_1(%arg0: i32) -> (i32, i32, i32) {
    %c0_i32 = arith.constant 0 : i32
    %c0_i32_0 = arith.constant 0 : i32
    %c0_i32_1 = arith.constant 0 : i32
    %c0_i32_2 = arith.constant 0 : i32
    return %c0_i32, %c0_i32_0, %c0_i32_1 : i32, i32, i32
  }
  func.func @transform_2(%arg0: i32) -> (i32, i32) {
    %c0_i32 = arith.constant 0 : i32
    %c0_i32_0 = arith.constant 0 : i32
    %c0_i32_1 = arith.constant 0 : i32
    return %c0_i32, %c0_i32_0 : i32, i32
  }
  func.func @transform_3(%arg0: i32) -> (i32, i32) {
    %c0_i32 = arith.constant 0 : i32
    %c0_i32_0 = arith.constant 0 : i32
    %c0_i32_1 = arith.constant 0 : i32
    return %c0_i32, %c0_i32_0 : i32, i32
  }
  func.func @transform_4(%arg0: i32) -> (i32, i32, i32) {
    %c0_i32 = arith.constant 0 : i32
    %c0_i32_0 = arith.constant 0 : i32
    %c0_i32_1 = arith.constant 0 : i32
    %c0_i32_2 = arith.constant 0 : i32
    return %c0_i32, %c0_i32_0, %c0_i32_1 : i32, i32, i32
  }
  func.func @transform_5(%arg0: i32) -> (i32, i32) {
    %c0_i32 = arith.constant 0 : i32
    %c0_i32_0 = arith.constant 0 : i32
    %c0_i32_1 = arith.constant 0 : i32
    return %c0_i32, %c0_i32_0 : i32, i32
  }
  func.func @transform_6(%arg0: i32) -> (i32, i32, i32) {
    %c0_i32 = arith.constant 0 : i32
    %c0_i32_0 = arith.constant 0 : i32
    %c0_i32_1 = arith.constant 0 : i32
    return %arg0, %c0_i32, %c0_i32_0 : i32, i32, i32
  }
}

</mosaic_0001>

<bundles_post_ra>
// kernel: lrencoder_forward.3
= control target key start
LH: loop header
LB: loop body
LE: loop exit
PB: predicated region body
PF: predicated region fallthrough
CT: control target
= control target key end

     0   :  { %s3342_s21 = smov 0   ;;  %s4024_s0 = inlined_call_operand.vmem [shape: bf16[2,104,12], index: 0, kind: input, shape index: {}]   ;;  %s4025_s1 = inlined_call_operand.vmem [shape: bf16[4,12,32], index: 1, kind: input, shape index: {}]   ;;  %s4026_s2 = inlined_call_operand.vmem [shape: f32[1,32], index: 2, kind: input, shape index: {}]   ;;  %s4027_s3 = inlined_call_operand.vmem [shape: f32[80,1], index: 3, kind: input, shape index: {}]   ;;  %s4028_s4 = inlined_call_operand.vmem [shape: bf16[9,32,32], index: 4, kind: input, shape index: {}]   ;;  %s4029_s5 = inlined_call_operand.vmem [shape: f32[1,32], index: 5, kind: input, shape index: {}]   ;;  %s4030_s6 = inlined_call_operand.vmem [shape: bf16[2,80,32], index: 6, kind: output, shape index: {}]  }
   0x1 LB: > { %s2619_s22 = sadd.s32 4294967295, %s3302_s21   ;;  %p2623_p0 = scmp.ge.s32.totalorder %s3302_s21, 1  ;;  %s3302_s21 = sphi %s3342_s21, %s16_s21  }
   0x2   : > { %p212_p1 = scmp.lt.s32.totalorder %s3302_s21, 3 }
   0x4   : > { %p213_p2 = pnand %p2623_p0, %p212_p1 }
   0x5   : > { %vm363_vm0 = vcmask (!%p213_p2), 1045504   ;;  %v3304_v0 = vmov (!%p213_p2), 0.0   ;;  %v3239_v1 = vld [vmem:[%s4025_s1 + $0x8] sm:$0x3f] (!%p213_p2)   ;;  %p242_p3 = scmp.lt.s32.totalorder (!%p213_p2), %s2619_s22, 1  ;;  %vm3305_vm1 = vmmov (!%p213_p2), 0  }
   0x6   : > { %216 = sbr.rel (%p213_p2) target bundleno = 749 (0x2ed), region = 44  ;;  %3222 = vmatprep.subr.bf16.mxu1 (!%p213_p2), %v3304_v0  ;;  %2918 = vmatprep.subr.bf16.mxu0 (!%p213_p2), %v3304_v0  ;;  %v365_v2 = vsel (!%p213_p2), %vm363_vm0, %v3239_v1, 0  ;;  %v875_v3 = vld [vmem:[%s4027_s3] sm:$0xff] (!%p213_p2)  ;;  %vm297_vm2 = vsmask.f32 (!%p213_p2), 7424  ;;  %v3306_v4 = vmov (!%p213_p2), 0  }
   0x7   : > { %2920 = vmatprep.mubr.msk.bf16.mxu0 (!%p213_p2), %vm3305_vm1, %v3304_v0  ;;  %2932 = vmatprep.mubr.msk.bf16.mxu1 (!%p213_p2), %vm3305_vm1, %v3304_v0  ;;  %v876_v5 = vld [vmem:[%s4027_s3 + $0x8] sm:$0xff] (!%p213_p2)  ;;  %v877_v6 = vld [vmem:[%s4027_s3 + $0x10] sm:$0xff] (!%p213_p2)  ;;  %v878_v7 = vld [vmem:[%s4027_s3 + $0x18] sm:$0xff] (!%p213_p2)  ;;  %vm347_vm3 = vcmask (!%p213_p2), 97280   ;;  %vm573_vm4 = vcmask (!%p213_p2), 1046528   ;;  %vm945_vm6 = vcmask (!%p213_p2), 257024  }
   0x8   : > { %3223 = vmatpush3.bf16.msra.mxu1 (!%p213_p2), %v365_v2  ;;  %2919 = vmatpush3.bf16.msra.mxu0 (!%p213_p2), %v365_v2  ;;  %v3248_v10 = vld [vmem:[%s4025_s1 + $0x10] sm:$0x3f] (!%p213_p2)   ;;  %v3244_v16 = vld [vmem:[%s4025_s1] sm:$0x3f] (!%p213_p2)   ;;  %v880_v44 = vld [vmem:[%s4027_s3 + $0x28] sm:$0xff] (!%p213_p2)  ;;  %vm1102_vm7 = vcmask (!%p213_p2), 257025  }
   0x9   : > { %2940 = vmatprep.subr.bf16.mxu1 (!%p213_p2), %v3304_v0  ;;  %2962 = vmatprep.subr.bf16.mxu0 (!%p213_p2), %v3304_v0  ;;  %v879_v23 = vld [vmem:[%s4027_s3 + $0x20] sm:$0xff] (!%p213_p2)  ;;  %v606_v30 = vsel (!%p213_p2), %vm363_vm0, %v3248_v10, 0  ;;  %v456_v35 = vsel (!%p213_p2), %vm363_vm0, %v3244_v16, 0  ;;  %v881_v41 = vld [vmem:[%s4027_s3 + $0x30] sm:$0xff] (!%p213_p2)  ;;  %v3247_v47 = vld [vmem:[%s4025_s1 + $0x18] sm:$0x3f] (!%p213_p2)  }
   0xa   : > { %3237 = vset.pattern.permute.xlu0 (!%p213_p2), %v3306_v4  ;;  %3238 = vset.pattern.permute.xlu1 (!%p213_p2), %v3306_v4  ;;  %v883_v45 = vld [vmem:[%s4027_s3 + $0x40] sm:$0xff] (!%p213_p2)  ;;  %v882_v50 = vld [vmem:[%s4027_s3 + $0x38] sm:$0xff] (!%p213_p2)  ;;  %v773_v52 = vsel (!%p213_p2), %vm363_vm0, %v3247_v47, 0  ;;  %v884_v55 = vld [vmem:[%s4027_s3 + $0x48] sm:$0xff] (!%p213_p2)  ;;  %vm698_vm5 = vsmask.f32 (!%p213_p2), 6400 }
   0xb   : > { %887 = vperm.xlu0 (!%p213_p2), %3237, %v875_v3   ;;  %897 = vperm.xlu1 (!%p213_p2), %3238, %v877_v6   ;;  %947 = vst.msk [vmem:[#allocation2 + $0x4] sm:$0xf] (!%p213_p2), %vm945_vm6, %v3306_v4  ;;  %946 = vst.msk [vmem:[#allocation2] sm:$0xf] (!%p213_p2), %vm945_vm6, %v3306_v4  ;;  %v3257_v47 = vld [vmem:[%s4028_s4 + $0x18] sm:$0xff] (!%p213_p2)   ;;  %vm1226_vm13 = vcmask (!%p213_p2), 261120  }
   0xc   : > { %948 = vst.msk [vmem:[#allocation2 + $0x8] sm:$0xf] (!%p213_p2), %vm945_vm6, %v3306_v4  ;;  %949 = vst.msk [vmem:[#allocation2 + $0xc] sm:$0xf] (!%p213_p2), %vm945_vm6, %v3306_v4  ;;  %vm1103_vm8 = vsmask.f32 (!%p213_p2), 7942 }
   0xd   : > { %s4034_s22 = smov (!%p242_p3, %s2619_s22), 1  ;;  %950 = vst.msk [vmem:[#allocation2 + $0x10] sm:$0xf] %vm945_vm6, %v3306_v4  ;;  %951 = vst.msk [vmem:[#allocation2 + $0x14] sm:$0xf] %vm945_vm6, %v3306_v4  ;;  %vm1117_vm14 = vcmask 254976  }
   0xe   : > { %s3224_s25 = smul.u32 52, %s4034_s22  ;;  %952 = vst.msk [vmem:[#allocation2 + $0x18] sm:$0xf] %vm945_vm6, %v3306_v4  ;;  %953 = vst.msk [vmem:[#allocation2 + $0x1c] sm:$0xf] %vm945_vm6, %v3306_v4 }
   0xf   : > { %892 = vperm.xlu0 %3237, %v876_v5   ;;  %902 = vperm.xlu1 %3238, %v878_v7   ;;  %954 = vst.msk [vmem:[#allocation2 + $0x20] sm:$0xf] %vm945_vm6, %v3306_v4  ;;  %955 = vst.msk [vmem:[#allocation2 + $0x24] sm:$0xf] %vm945_vm6, %v3306_v4  ;;  %vm989_vm9 = vsmask.f32 1280 }
  0x10   : > { %s3371_s30 = scalar_lea.vmem %s4024_s0, %s3224_s25  ;;  %956 = vst.msk [vmem:[#allocation2 + $0x28] sm:$0xf] %vm945_vm6, %v3306_v4  ;;  %957 = vst.msk [vmem:[#allocation2 + $0x2c] sm:$0xf] %vm945_vm6, %v3306_v4  ;;  %vm990_vm10 = vsmask.f32 5392 }
  0x11   : > { %v3385_v8 = vld [vmem:[%s3371_s30] sm:$0xff]   ;;  %v3388_v9 = vld [vmem:[%s3371_s30 + $0x8] sm:$0xff]   ;;  %v3397_v14 = vld [vmem:[%s3371_s30 + $0x18] sm:$0xff]   ;;  %958 = vst.msk [vmem:[#allocation2 + $0x30] sm:$0xf] %vm945_vm6, %v3306_v4  ;;  %s3225_s29 = smul.u32 40, %s4034_s22 }
  0x12   : > { %v299_v11 = vshrl.u32 %v3385_v8, 16  ;;  %v301_v12 = vshll.u32 %v3385_v8, 16  ;;  %v306_v13 = vshll.u32 %v3388_v9, 16  ;;  %v3400_v15 = vld [vmem:[%s3371_s30 + $0x20] sm:$0xff]   ;;  %v310_v17 = vshrl.u32 %v3388_v9, 16  ;;  %v3409_v22 = vld [vmem:[%s3371_s30 + $0x10] sm:$0xff]   ;;  %vm1104_vm11 = vmand %vm1102_vm7, %vm1103_vm8 }
  0x13   : > { %v322_v20 = vshll.u32 %v3397_v14, 16  ;;  %v326_v21 = vshrl.u32 %v3397_v14, 16  ;;  %v330_v24 = vshll.u32 %v3400_v15, 16  ;;  %v3246_v25 = vld [vmem:[%s3371_s30 + $0x28] ss:$0 sps:$4 sm:$0x11]   ;;  %907 = vperm.xlu0 %3237, %v879_v23   ;;  %912 = vperm.xlu1 %3238, %v880_v44   ;;  %vm3598_vm12 = vmor %vm989_vm9, %vm990_vm10  ;;  %s3988_s9 = scalar_lea.vmem %s4030_s6, %s3225_s29 }
  0x14   : > { %v303_v18 = vrot.slane %v301_v12, 1  ;;  %v308_v19 = vrot.slane %v306_v13, 1  ;;  %v314_v28 = vshll.u32 %v3409_v22, 16  ;;  %v334_v33 = vshrl.u32 %v3400_v15, 16  ;;  %v3250_v48 = vld [vmem:[%s3371_s30 + $0xc] sm:$0xff]   ;;  %v3251_v57 = vld [vmem:[%s3371_s30 + $0x14] sm:$0xff]   ;;  %vm1118_vm15 = vmand %vm1117_vm14, %vm989_vm9 }
  0x15   : > { %v324_v27 = vrot.slane %v322_v20, 1  ;;  %v332_v29 = vrot.slane %v330_v24, 1  ;;  %v338_v34 = vshll.u32 %v3246_v25, 16  ;;  %v318_v43 = vshrl.u32 %v3409_v22, 16  ;;  %v3249_v49 = vld [vmem:[%s3371_s30 + $0x4] sm:$0xfe]  }
  0x16   : > { %v304_v26 = vor.u32 %v303_v18, %v299_v11  ;;  %v312_v37 = vor.u32 %v310_v17, %v308_v19  ;;  %v316_v38 = vrot.slane %v314_v28, 1  ;;  %v575_v53 = vrot.slane %v3250_v48, 1  ;;  %v3252_v61 = vld [vmem:[%s3371_s30 + $0x1c] sm:$0xff]   ;;  %v3253_v1 = vld [vmem:[%s3371_s30 + $0x24] sm:$0xff]   ;;  %v3256_v44 = vld [vmem:[%s4028_s4 + $0x10] sm:$0xff]  }
  0x17   : > { %v328_v32 = vor.u32 %v326_v21, %v324_v27  ;;  %v336_v39 = vor.u32 %v334_v33, %v332_v29  ;;  %v340_v40 = vrot.slane %v338_v34, 1  ;;  %917 = vperm.xlu0 %3237, %v881_v41   ;;  %922 = vperm.xlu1 %3238, %v882_v50   ;;  %v574_v54 = vrot.slane %v3249_v49, 1 }
  0x18   : > { %v309_v31 = vsel %vm297_vm2, %v304_v26, %v308_v19  ;;  %v317_v42 = vsel %vm297_vm2, %v312_v37, %v316_v38  ;;  %v320_v51 = vor.u32 %v318_v43, %v316_v38  ;;  %v577_v59 = vrot.slane %v3251_v57, 1 }
  0x19   : > { %2921 = vmatmul.mubr.msk.bf16.vlgmr.msra.gmra.mrb[0].mxu0 %vm347_vm3, %v309_v31  ;;  %v333_v36 = vsel %vm297_vm2, %v328_v32, %v332_v29  ;;  %v341_v46 = vsel %vm297_vm2, %v336_v39, %v340_v40  ;;  %v576_v58 = vsel %vm573_vm4, %v574_v54, %v575_v53  ;;  %v579_v62 = vrot.slane %v3252_v61, 1 }
  0x1a   : > { %2924 = vmatprep.mubr.msk.bf16.mxu0 %vm3305_vm1, %v3304_v0  ;;  %2963 = vmatpush3.bf16.msra.mxu0 %v606_v30  ;;  %v325_v56 = vsel %vm297_vm2, %v320_v51, %v324_v27  ;;  %v578_v60 = vsel %vm573_vm4, %v575_v53, %v577_v59  ;;  %v581_v2 = vrot.slane %v3253_v1, 1  ;;  %v700_v3 = vshrl.u32 %v3249_v49, 16 }
  0x1b   : > { %2933 = vmatmul.mubr.msk.bf16.vlgmr.msra.gmra.mrb[0].mxu1 %vm347_vm3, %v333_v36  ;;  %3006 = vmatprep.subr.bf16.mxu0 %v3304_v0  ;;  %v580_v63 = vsel %vm573_vm4, %v577_v59, %v579_v62  ;;  %v703_v5 = vshll.u32 %v3249_v49, 16  ;;  %v708_v6 = vshrl.u32 %v3250_v48, 16  ;;  %v711_v7 = vshll.u32 %v3250_v48, 16 }
  0x1c   : > { %2941 = vmatpush3.bf16.msra.mxu1 %v456_v35  ;;  %2936 = vmatprep.mubr.msk.bf16.mxu1 %vm3305_vm1, %v3304_v0  ;;  %v702_v10 = vrot.slane %v700_v3, 1  ;;  %v717_v18 = vshrl.u32 %v3251_v57, 16  ;;  %v720_v19 = vshll.u32 %v3251_v57, 16  ;;  %v726_v24 = vshrl.u32 %v3252_v61, 16 }
  0x1d   : > { %2984 = vmatprep.subr.bf16.mxu1 %v3304_v0  ;;  %927 = vperm.xlu0 %3237, %v883_v45   ;;  %v705_v11 = vrot.slane %v703_v5, 2  ;;  %v710_v12 = vrot.slane %v708_v6, 1  ;;  %v713_v13 = vrot.slane %v711_v7, 2  ;;  %v729_v25 = vshll.u32 %v3252_v61, 16  ;;  %v3258_v45 = vld [vmem:[%s4028_s4] sm:$0xff]  }
  0x1e   : > { %932 = vperm.xlu1 %3238, %v884_v55   ;;  %v722_v23 = vrot.slane %v720_v19, 2  ;;  %v728_v27 = vrot.slane %v726_v24, 1  ;;  %v735_v30 = vshrl.u32 %v3253_v1, 16  ;;  %v738_v31 = vshll.u32 %v3253_v1, 16 }
  0x1f   : > { %v706_v16 = vor.u32 %v705_v11, %v702_v10  ;;  %v714_v17 = vor.u32 %v713_v13, %v710_v12  ;;  %v731_v28 = vrot.slane %v729_v25, 2  ;;  %v3255_v35 = vld [vmem:[%s3371_s30 + $0x2c] ss:$0 sps:$4 sm:$0x33]  }
  0x20   : > { %v737_v33 = vrot.slane %v735_v30, 1  ;;  %v740_v34 = vrot.slane %v738_v31, 2  ;;  %v744_v37 = vshrl.u32 %v3255_v35, 16  ;;  %v747_v38 = vshll.u32 %v3255_v35, 16 }
  0x21   : > { %2925 = vmatmul.mubr.msk.bf16.gmra.mrb[4].mxu0 %vm347_vm3, %v317_v42  ;;  %v715_v21 = vsel %vm698_vm5, %v706_v16, %v714_v17  ;;  %v732_v29 = vor.u32 %v731_v28, %v728_v27 }
  0x22   : > { %2928 = vmatprep.mubr.msk.bf16.mxu0 %vm3305_vm1, %v3304_v0  ;;  %v741_v36 = vor.u32 %v740_v34, %v737_v33  ;;  %v746_v40 = vrot.slane %v744_v37, 1  ;;  %v749_v41 = vrot.slane %v747_v38, 2 }
  0x23   : > { %2937 = vmatmul.mubr.msk.bf16.gmra.mrb[4].mxu1 %vm347_vm3, %v341_v46  ;;  %v3259_v46 = vld [vmem:[%s4028_s4 + $0x8] sm:$0xff]  }
  0x24   : > { %2942 = vmatprep.mubr.msk.bf16.mxu1 %vm3305_vm1, %v3304_v0  ;;  %v742_v39 = vsel %vm698_vm5, %v732_v29, %v741_v36  ;;  %v750_v42 = vor.u32 %v749_v41, %v746_v40 }
  0x26   : > { %v751_v43 = vsel %vm698_vm5, %v741_v36, %v750_v42 }
  0x29   : > { %2929 = vmatmul.mubr.msk.bf16.gmra.mrb[8].mxu0 %vm347_vm3, %v325_v56 }
  0x2a   : > { %2964 = vmatprep.mubr.msk.bf16.mxu0 %vm3305_vm1, %v3304_v0 }
  0x2b   : > { %2943 = vmatmul.mubr.msk.bf16.vlgmr.msra.gmra.mrb[8].mxu1 %vm347_vm3, %v3385_v8  ;;  %v582_v8 = vsel %vm573_vm4, %v579_v62, %v581_v2 }
  0x2c   : > { %2985 = vmatpush3.bf16.msra.mxu1 %v773_v52  ;;  %2946 = vmatprep.mubr.msk.bf16.mxu1 %vm3305_vm1, %v3304_v0 }
  0x2d   : > { %3030 = vmatprep.subr.bf16.mxu1 %v3304_v0 }
  0x31   : > { %2965 = vmatmul.mubr.msk.bf16.vlgmr.msra.gmra.mrb[12].mxu0 %vm347_vm3, %v576_v58 }
  0x32   : > { %2968 = vmatprep.mubr.msk.bf16.mxu0 %vm3305_vm1, %v3304_v0  ;;  %3007 = vmatpush3.bf16.msra.mxu0 %v3256_v44 }
  0x33   : > { %2947 = vmatmul.mubr.msk.bf16.gmra.mrb[12].mxu1 %vm347_vm3, %v3388_v9  ;;  %v3254_v9 = vld [vmem:[%s3371_s30 + $0x2c] ss:$0 sps:$4 sm:$0x11]   ;;  %3008 = vmatprep.subr.bf16.mxu0 %v3304_v0 }
  0x34   : > { %2950 = vmatprep.mubr.msk.bf16.mxu1 %vm3305_vm1, %v3304_v0 }
  0x36   : > { %3009 = vmatpush3.bf16.msra.mxu0 %v3257_v47 }
  0x37   : > { %3054 = vmatprep.subr.bf16.mxu0 %v3304_v0 }
  0x39   : > { %2969 = vmatmul.mubr.msk.bf16.gmra.mrb[16].mxu0 %vm347_vm3, %v578_v60 }
  0x3a   : > { %2972 = vmatprep.mubr.msk.bf16.mxu0 %vm3305_vm1, %v3304_v0 }
  0x3b   : > { %2951 = vmatmul.mubr.msk.bf16.gmra.mrb[16].mxu1 %vm347_vm3, %v3409_v22  ;;  %v719_v22 = vrot.slane %v717_v18, 1 }
  0x3c   : > { %2954 = vmatprep.mubr.msk.bf16.mxu1 %vm3305_vm1, %v3304_v0 }
  0x41   : > { %2973 = vmatmul.mubr.msk.bf16.gmra.mrb[20].mxu0 %vm347_vm3, %v580_v63 }
  0x42   : > { %2976 = vmatprep.mubr.msk.bf16.mxu0 %vm3305_vm1, %v3304_v0 }
  0x43   : > { %2955 = vmatmul.mubr.msk.bf16.gmra.mrb[20].mxu1 %vm347_vm3, %v3397_v14  ;;  %v583_v14 = vrot.slane %v3254_v9, 1 }
  0x44   : > { %2958 = vmatprep.mubr.msk.bf16.mxu1 %vm3305_vm1, %v3304_v0 }
  0x45   : > { %v584_v20 = vsel %vm573_vm4, %v581_v2, %v583_v14 }
  0x49   : > { %2977 = vmatmul.mubr.msk.bf16.gmra.mrb[24].mxu0 %vm347_vm3, %v582_v8 }
  0x4a   : > { %2980 = vmatprep.mubr.msk.bf16.mxu0 %vm3305_vm1, %v3304_v0 }
  0x4b   : > { %2959 = vmatmul.mubr.msk.bf16.gmra.mrb[24].mxu1 %vm347_vm3, %v3400_v15  ;;  %v723_v15 = vor.u32 %v722_v23, %v719_v22 }
  0x4c   : > { %2986 = vmatprep.mubr.msk.bf16.mxu1 %vm3305_vm1, %v3304_v0 }
  0x4d   : > { %v724_v26 = vsel %vm698_vm5, %v714_v17, %v723_v15  ;;  %v733_v32 = vsel %vm698_vm5, %v723_v15, %v732_v29 }
  0x51   : > { %2981 = vmatmul.mubr.msk.bf16.gmra.mrb[28].mxu0 %vm347_vm3, %v584_v20 }
  0x52   : > { %3010 = vmatprep.mubr.msk.bf16.mxu0 %vm3305_vm1, %v3304_v0 }
  0x53   : > { %2987 = vmatmul.mubr.msk.bf16.vlgmr.msra.gmra.mrb[28].mxu1 %vm347_vm3, %v715_v21 }
  0x54   : > { %2990 = vmatprep.mubr.msk.bf16.mxu1 %vm3305_vm1, %v3304_v0  ;;  %3031 = vmatpush3.bf16.msra.mxu1 %v3258_v45 }
  0x55   : > { %3032 = vmatprep.subr.bf16.mxu1 %v3304_v0 }
  0x58   : > { %3033 = vmatpush3.bf16.msra.mxu1 %v3259_v46 }
  0x59   : > { %3078 = vmatprep.subr.bf16.mxu1 %v3304_v0 }
  0x5b   : > { %2991 = vmatmul.mubr.msk.bf16.gmra.mrb[32].mxu1 %vm347_vm3, %v724_v26 }
  0x5c   : > { %2994 = vmatprep.mubr.msk.bf16.mxu1 %vm3305_vm1, %v3304_v0 }
  0x63   : > { %2995 = vmatmul.mubr.msk.bf16.gmra.mrb[36].mxu1 %vm347_vm3, %v733_v32 }
  0x64   : > { %2998 = vmatprep.mubr.msk.bf16.mxu1 %vm3305_vm1, %v3304_v0 }
  0x6b   : > { %2999 = vmatmul.mubr.msk.bf16.gmra.mrb[40].mxu1 %vm347_vm3, %v742_v39 }
  0x6c   : > { %3002 = vmatprep.mubr.msk.bf16.mxu1 %vm3305_vm1, %v3304_v0 }
  0x73   : > { %3003 = vmatmul.mubr.msk.bf16.gmra.mrb[44].mxu1 %vm347_vm3, %v751_v43  ;;  %vm2355_vm3 = vcmask 1044480  }
  0x74   : > { %3034 = vmatprep.mubr.msk.bf16.mxu1 %vm3305_vm1, %v3304_v0 }
  0xec   : > { %v401_v4 = vpop.f32.mrb[0].mxu0 }
  0xed   : > { %v2922_v48 = vpop.f32.mrb[1].mxu0 }
  0xee   : > { %v425_v49 = vpop.f32.mrb[0].mxu1  ;;  %v404_v50 = vpop.f32.mrb[2].mxu0 }
  0xef   : > { %v2934_v51 = vpop.f32.mrb[1].mxu1  ;;  %v2923_v52 = vpop.f32.mrb[3].mxu0 }
  0xf0   : > { %v428_v53 = vpop.f32.mrb[2].mxu1 }
  0xf1   : > { %v2935_v54 = vpop.f32.mrb[3].mxu1 }
  0xf4   : > { %v409_v55 = vpop.f32.mrb[4].mxu0 }
  0xf5   : > { %v2926_v56 = vpop.f32.mrb[5].mxu0 }
  0xf6   : > { %v433_v57 = vpop.f32.mrb[4].mxu1  ;;  %v412_v58 = vpop.f32.mrb[6].mxu0 }
  0xf7   : > { %v2938_v59 = vpop.f32.mrb[5].mxu1  ;;  %v2927_v60 = vpop.f32.mrb[7].mxu0 }
  0xf8   : > { %v436_v61 = vpop.f32.mrb[6].mxu1 }
  0xf9   : > { %v2939_v62 = vpop.f32.mrb[7].mxu1 }
  0xfa   : > { %v888_v62 = vpop.permute.xlu0 %887 }
  0xfc   : > { %v417_v63 = vpop.f32.mrb[8].mxu0 }
  0xfd   : > { %v2930_v1 = vpop.f32.mrb[9].mxu0 }
  0xfe   : > { %v492_v2 = vpop.f32.mrb[8].mxu1  ;;  %v420_v3 = vpop.f32.mrb[10].mxu0 }
  0xff   : > { %v493_v5 = vadd.f32 %v492_v2, %v401_v4  ;;  %v2944_v6 = vpop.f32.mrb[9].mxu1  ;;  %v2931_v7 = vpop.f32.mrb[11].mxu0  ;;  %v3587_v2 = vld [vmem:[%s4026_s2] ss:$0 sm:$0xff] }
 0x100   : > { %v495_v8 = vpop.f32.mrb[10].mxu1 }
 0x101   : > { %v496_v9 = vadd.f32 %v495_v8, %v404_v50  ;;  %v2945_v10 = vpop.f32.mrb[11].mxu1 }
 0x104   : > { %v642_v11 = vpop.f32.mrb[12].mxu0 }
 0x105   : > { %v681_v12 = vadd.f32 %v642_v11, %v493_v5  ;;  %v2966_v13 = vpop.f32.mrb[13].mxu0 }
 0x106   : > { %v500_v14 = vpop.f32.mrb[12].mxu1  ;;  %v645_v16 = vpop.f32.mrb[14].mxu0 }
 0x107   : > { %v501_v17 = vadd.f32 %v500_v14, %v409_v55  ;;  %v2948_v18 = vpop.f32.mrb[13].mxu1  ;;  %v682_v19 = vadd.f32 %v645_v16, %v496_v9  ;;  %v2967_v20 = vpop.f32.mrb[15].mxu0 }
 0x108   : > { %v503_v21 = vpop.f32.mrb[14].mxu1  ;;  %v893_v14 = vpop.permute.xlu0 %892 }
 0x109   : > { %v504_v22 = vadd.f32 %v503_v21, %v412_v58  ;;  %v2949_v23 = vpop.f32.mrb[15].mxu1  ;;  %v898_v20 = vpop.permute.xlu1 %897 }
 0x10c   : > { %v650_v15 = vpop.f32.mrb[16].mxu0 }
 0x10d   : > { %v683_v24 = vadd.f32 %v650_v15, %v501_v17  ;;  %v2970_v25 = vpop.f32.mrb[17].mxu0 }
 0x10e   : > { %v508_v26 = vpop.f32.mrb[16].mxu1  ;;  %v653_v27 = vpop.f32.mrb[18].mxu0 }
 0x10f   : > { %v509_v28 = vadd.f32 %v508_v26, %v417_v63  ;;  %v2952_v29 = vpop.f32.mrb[17].mxu1  ;;  %v3572_v30 = vadd.f32 %v653_v27, %v504_v22  ;;  %v2971_v31 = vpop.f32.mrb[19].mxu0 }
 0x110   : > { %v511_v32 = vpop.f32.mrb[18].mxu1  ;;  %v1105_v31 = vld [vmem:[#allocation2 + $0x4] sm:$0xe] }
 0x111   : > { %v512_v33 = vadd.f32 %v511_v32, %v420_v3  ;;  %v2953_v34 = vpop.f32.mrb[19].mxu1 }
 0x114   : > { %v658_v35 = vpop.f32.mrb[20].mxu0 }
 0x115   : > { %v3574_v36 = vadd.f32 %v658_v35, %v509_v28  ;;  %v2974_v37 = vpop.f32.mrb[21].mxu0 }
 0x116   : > { %v516_v38 = vpop.f32.mrb[20].mxu1  ;;  %v661_v39 = vpop.f32.mrb[22].mxu0 }
 0x117   : > { %v517_v40 = vadd.f32 %v516_v38, %v425_v49  ;;  %v2956_v41 = vpop.f32.mrb[21].mxu1  ;;  %v3576_v42 = vadd.f32 %v661_v39, %v512_v33  ;;  %v2975_v43 = vpop.f32.mrb[23].mxu0 }
 0x118   : > { %v519_v44 = vpop.f32.mrb[22].mxu1 }
 0x119   : > { %v520_v45 = vadd.f32 %v519_v44, %v428_v53  ;;  %v2957_v46 = vpop.f32.mrb[23].mxu1 }
 0x11c   : > { %v666_v47 = vpop.f32.mrb[24].mxu0 }
 0x11d   : > { %v3578_v4 = vadd.f32 %v666_v47, %v517_v40  ;;  %v2978_v48 = vpop.f32.mrb[25].mxu0  ;;  %v903_v40 = vpop.permute.xlu1 %902 }
 0x11e   : > { %v524_v50 = vpop.f32.mrb[24].mxu1  ;;  %v669_v51 = vpop.f32.mrb[26].mxu0 }
 0x11f   : > { %v525_v52 = vadd.f32 %v524_v50, %v433_v57  ;;  %v2960_v54 = vpop.f32.mrb[25].mxu1  ;;  %v3580_v55 = vadd.f32 %v669_v51, %v520_v45  ;;  %v2979_v56 = vpop.f32.mrb[27].mxu0 }
 0x120   : > { %v527_v58 = vpop.f32.mrb[26].mxu1 }
 0x121   : > { %v528_v49 = vadd.f32 %v527_v58, %v436_v61  ;;  %v2961_v59 = vpop.f32.mrb[27].mxu1 }
 0x124   : > { %v674_v60 = vpop.f32.mrb[28].mxu0 }
 0x125   : > { %v3582_v63 = vadd.f32 %v674_v60, %v525_v52  ;;  %v2982_v53 = vpop.f32.mrb[29].mxu0  ;;  %v908_v60 = vpop.permute.xlu0 %907 }
 0x126   : > { %v809_v1 = vpop.f32.mrb[28].mxu1  ;;  %v677_v3 = vpop.f32.mrb[30].mxu0 }
 0x127   : > { %v848_v57 = vadd.f32 %v809_v1, %v681_v12  ;;  %v2988_v5 = vpop.f32.mrb[29].mxu1  ;;  %v3589_v6 = vadd.f32 %v677_v3, %v528_v49  ;;  %v2983_v7 = vpop.f32.mrb[31].mxu0 }
 0x128   : > { %v812_v8 = vpop.f32.mrb[30].mxu1  ;;  %v1122_v5 = vld [vmem:[#allocation2] sm:$0xf] }
 0x129   : > { %v865_v61 = vadd.f32 %v3587_v2, %v848_v57  ;;  %v849_v9 = vadd.f32 %v812_v8, %v682_v19  ;;  %v2989_v10 = vpop.f32.mrb[31].mxu1  ;;  %v913_v8 = vpop.permute.xlu1 %912 }
 0x12b   : > { %v935_v11 = vmul.f32 %v888_v62, %v865_v61  ;;  %v866_v13 = vadd.f32 %v3587_v2, %v849_v9 }
 0x12d   : > { %v2811_v16 = vpack.c.bf16 %v935_v11, %v935_v11  ;;  %v936_v17 = vmul.f32 %v893_v14, %v866_v13 }
 0x12e   : > { %v817_v18 = vpop.f32.mrb[32].mxu1 }
 0x12f   : > { %v993_v12 = vshrl.u32 %v2811_v16, 16  ;;  %v996_v21 = vshll.u32 %v2811_v16, 16  ;;  %v2812_v22 = vpack.c.bf16 %v936_v17, %v936_v17  ;;  %v850_v23 = vadd.f32 %v817_v18, %v683_v24  ;;  %v2992_v15 = vpop.f32.mrb[33].mxu1 }
 0x130   : > { %v820_v25 = vpop.f32.mrb[34].mxu1 }
 0x131   : > { %v995_v19 = vrot.slane %v993_v12, 6  ;;  %v998_v26 = vrot.slane %v996_v21, 7  ;;  %v1002_v27 = vshrl.u32 %v2812_v22, 16  ;;  %v1005_v28 = vshll.u32 %v2812_v22, 16  ;;  %v2993_v29 = vpop.f32.mrb[35].mxu1 }
 0x132   : > { %v867_v32 = vadd.f32 %v3587_v2, %v850_v23  ;;  %v851_v33 = vadd.f32 %v820_v25, %v3572_v30 }
 0x133   : > { %v999_v34 = vor.u32 %v998_v26, %v995_v19  ;;  %v1004_v35 = vrot.slane %v1002_v27, 6  ;;  %v1007_v24 = vrot.slane %v1005_v28, 7 }
 0x134   : > { %v937_v38 = vmul.f32 %v898_v20, %v867_v32  ;;  %v868_v39 = vadd.f32 %v3587_v2, %v851_v33 }
 0x135   : > { %v1000_v41 = vrot.slane %v999_v34, 4  ;;  %v1106_v43 = vsel %vm1104_vm11, %v999_v34, %v1105_v31  ;;  %v1008_v44 = vor.u32 %v1007_v24, %v1004_v35  ;;  %v918_v24 = vpop.permute.xlu0 %917 }
 0x136   : > { %1107 = vst [vmem:[#allocation2 + $0x4] sm:$0xe] %v1106_v43  ;;  %v2813_v45 = vpack.c.bf16 %v937_v38, %v937_v38  ;;  %v938_v46 = vmul.f32 %v903_v40, %v868_v39  ;;  %v825_v47 = vpop.f32.mrb[36].mxu1 }
 0x137   : > { %v1009_v30 = vsel %vm3598_vm12, %v1000_v41, %v1008_v44  ;;  %v852_v48 = vadd.f32 %v825_v47, %v3574_v36  ;;  %v2996_v50 = vpop.f32.mrb[37].mxu1  ;;  %v1010_v7 = vrot.slane %v1008_v44, 4 }
 0x138   : > { %1108 = vst.msk [vmem:[#allocation2 + $0x8] sm:$0xf] %vm945_vm6, %v1009_v30  ;;  %v1012_v51 = vshrl.u32 %v2813_v45, 16  ;;  %v1015_v52 = vshll.u32 %v2813_v45, 16  ;;  %v2814_v54 = vpack.c.bf16 %v938_v46, %v938_v46  ;;  %v828_v56 = vpop.f32.mrb[38].mxu1  ;;  %v923_v45 = vpop.permute.xlu1 %922 }
 0x139   : > { %v869_v58 = vadd.f32 %v3587_v2, %v852_v48  ;;  %v853_v49 = vadd.f32 %v828_v56, %v3576_v42  ;;  %v2997_v59 = vpop.f32.mrb[39].mxu1  ;;  %v3267_v42 = vld [vmem:[%s4028_s4 + $0x30] sm:$0xff]  }
 0x13a   : > { %v1014_v62 = vrot.slane %v1012_v51, 6  ;;  %v1017_v53 = vrot.slane %v1015_v52, 7  ;;  %v1022_v1 = vshrl.u32 %v2814_v54, 16  ;;  %v1025_v3 = vshll.u32 %v2814_v54, 16 }
 0x13b   : > { %v939_v57 = vmul.f32 %v908_v60, %v869_v58  ;;  %v870_v36 = vadd.f32 %v3587_v2, %v853_v49 }
 0x13c   : > { %v1018_v61 = vor.u32 %v1017_v53, %v1014_v62  ;;  %v1024_v9 = vrot.slane %v1022_v1, 6  ;;  %v1027_v10 = vrot.slane %v1025_v3, 7 }
 0x13d   : > { %v2815_v11 = vpack.c.bf16 %v939_v57, %v939_v57  ;;  %v940_v13 = vmul.f32 %v913_v8, %v870_v36  ;;  %v3610_v14 = vld [vmem:[#allocation2 + $0x4] sm:$0xf]  ;;  %v928_v36 = vpop.permute.xlu0 %927 }
 0x13e   : > { %v1019_v16 = vsel %vm3598_vm12, %v1010_v7, %v1018_v61  ;;  %v1020_v17 = vrot.slane %v1018_v61, 4  ;;  %v1028_v18 = vor.u32 %v1027_v10, %v1024_v9  ;;  %v833_v20 = vpop.f32.mrb[40].mxu1  ;;  %v3618_v12 = vcombine.low %v1122_v5, %v3610_v14 }
 0x13f   : > { %1109 = vst.msk [vmem:[#allocation2 + $0xc] sm:$0xf] %vm945_vm6, %v1019_v16  ;;  %v1032_v21 = vshrl.u32 %v2815_v11, 16  ;;  %v1035_v22 = vshll.u32 %v2815_v11, 16  ;;  %v2816_v23 = vpack.c.bf16 %v940_v13, %v940_v13  ;;  %v854_v15 = vadd.f32 %v833_v20, %v3578_v4  ;;  %v3000_v25 = vpop.f32.mrb[41].mxu1  ;;  %v3268_v4 = vld [vmem:[%s4028_s4 + $0x38] sm:$0xff]  }
 0x140   : > { %v1029_v19 = vsel %vm3598_vm12, %v1020_v17, %v1028_v18  ;;  %v836_v26 = vpop.f32.mrb[42].mxu1  ;;  %3035 = vmatmul.mubr.msk.bf16.vlgmr.msra.gmra.mrb[48].mxu1 %vm1226_vm13, %v3618_v12  ;;  %v1030_v33 = vrot.slane %v1028_v18, 4  ;;  %v1173_v41 = vshll.u32 %v3618_v12, 16 }
 0x141   : > { %1110 = vst.msk [vmem:[#allocation2 + $0x10] sm:$0xf] %vm945_vm6, %v1029_v19  ;;  %v1034_v27 = vrot.slane %v1032_v21, 6  ;;  %v1037_v28 = vrot.slane %v1035_v22, 7  ;;  %v1042_v29 = vshrl.u32 %v2816_v23, 16  ;;  %v1045_v31 = vshll.u32 %v2816_v23, 16  ;;  %3038 = vmatprep.mubr.msk.bf16.mxu1 %vm3305_vm1, %v3304_v0  ;;  %3079 = vmatpush3.bf16.msra.mxu1 %v3267_v42  ;;  %v933_v42 = vpop.permute.xlu1 %932 }
 0x142   : > { %v3001_v32 = vpop.f32.mrb[43].mxu1  ;;  %v871_v34 = vadd.f32 %v3587_v2, %v854_v15  ;;  %v855_v35 = vadd.f32 %v836_v26, %v3580_v55  ;;  %3080 = vmatprep.subr.bf16.mxu1 %v3304_v0  ;;  %v1175_v58 = vrot.slane %v1173_v41, 1 }
 0x143   : > { %v1038_v38 = vor.u32 %v1037_v28, %v1034_v27  ;;  %v1044_v39 = vrot.slane %v1042_v29, 6  ;;  %v1047_v40 = vrot.slane %v1045_v31, 7  ;;  %v3266_v29 = vld [vmem:[%s4028_s4 + $0x28] sm:$0xff]  }
 0x144   : > { %v941_v43 = vmul.f32 %v918_v24, %v871_v34  ;;  %v872_v44 = vadd.f32 %v3587_v2, %v855_v35 }
 0x145   : > { %v1039_v46 = vsel %vm3598_vm12, %v1030_v33, %v1038_v38  ;;  %v1040_v47 = vrot.slane %v1038_v38, 4  ;;  %v1048_v30 = vor.u32 %v1047_v40, %v1044_v39  ;;  %3081 = vmatpush3.bf16.msra.mxu1 %v3268_v4 }
 0x146   : > { %1111 = vst.msk [vmem:[#allocation2 + $0x14] sm:$0xf] %vm945_vm6, %v1039_v46  ;;  %v2817_v55 = vpack.c.bf16 %v941_v43, %v941_v43  ;;  %v942_v48 = vmul.f32 %v923_v45, %v872_v44  ;;  %v841_v50 = vpop.f32.mrb[44].mxu1  ;;  %v3640_v51 = vld [vmem:[#allocation2 + $0x8] sm:$0xff]   ;;  %3126 = vmatprep.subr.bf16.mxu1 %v3304_v0 }
 0x147   : > { %v1049_v52 = vsel %vm3598_vm12, %v1040_v47, %v1048_v30  ;;  %v856_v54 = vadd.f32 %v841_v50, %v3582_v63  ;;  %v3004_v56 = vpop.f32.mrb[45].mxu1  ;;  %v1178_v53 = vshll.u32 %v3640_v51, 16  ;;  %v1171_v63 = vshrl.u32 %v3618_v12, 16 }
 0x148   : > { %1112 = vst.msk [vmem:[#allocation2 + $0x18] sm:$0xf] %vm945_vm6, %v1049_v52  ;;  %v1052_v49 = vshrl.u32 %v2817_v55, 16  ;;  %v1055_v59 = vshll.u32 %v2817_v55, 16  ;;  %v2818_v60 = vpack.c.bf16 %v942_v48, %v942_v48  ;;  %v844_v62 = vpop.f32.mrb[46].mxu1  ;;  %3039 = vmatmul.mubr.msk.bf16.gmra.mrb[52].mxu1 %vm1226_vm13, %v3640_v51  ;;  %v1050_v16 = vrot.slane %v1048_v30, 4 }
 0x149   : > { %v873_v1 = vadd.f32 %v3587_v2, %v856_v54  ;;  %v857_v3 = vadd.f32 %v844_v62, %v3589_v6  ;;  %v3005_v57 = vpop.f32.mrb[47].mxu1  ;;  %3042 = vmatprep.mubr.msk.bf16.mxu1 %vm3305_vm1, %v3304_v0  ;;  %v1176_v11 = vor.u32 %v1175_v58, %v1171_v63  ;;  %v1180_v13 = vrot.slane %v1178_v53, 1  ;;  %v3262_v6 = vld [vmem:[%s4028_s4 + $0x20] sm:$0xff]   ;;  %v1119_v30 = vld [vmem:[#allocation2 + $0x2c] sm:$0x3] }
 0x14a   : > { %v1054_v5 = vrot.slane %v1052_v49, 6  ;;  %v1057_v7 = vrot.slane %v1055_v59, 7  ;;  %v1062_v8 = vshrl.u32 %v2818_v60, 16  ;;  %v1065_v61 = vshll.u32 %v2818_v60, 16  ;;  %v3705_v60 = vld [vmem:[#allocation2 + $0x8] sm:$0xf] }
 0x14b   : > { %v943_v9 = vmul.f32 %v928_v36, %v873_v1  ;;  %v874_v10 = vadd.f32 %v3587_v2, %v857_v3  ;;  %v1181_v22 = vsel %vm297_vm2, %v1176_v11, %v1180_v13  ;;  %v1182_v32 = vshrl.u32 %v3640_v51, 16  ;;  %v3711_v1 = vld [vmem:[#allocation2 + $0xc] sm:$0xff]   ;;  %v1540_v3 = vld [vmem:[#allocation2 + $0x4] sm:$0xe] }
 0x14c   : > { %v1058_v17 = vor.u32 %v1057_v7, %v1054_v5  ;;  %v1064_v18 = vrot.slane %v1062_v8, 6  ;;  %v1067_v20 = vrot.slane %v1065_v61, 7  ;;  %3011 = vmatmul.mubr.msk.bf16.vlgmr.msra.gmra.mrb[32].mxu0 %vm1226_vm13, %v1181_v22  ;;  %v3718_v36 = vcombine.low %v1540_v3, %v3705_v60 }
 0x14d   : > { %v2819_v12 = vpack.c.bf16 %v943_v9, %v943_v9  ;;  %v944_v21 = vmul.f32 %v933_v42, %v874_v10  ;;  %v3660_v23 = vld [vmem:[#allocation2 + $0x10] sm:$0xff]   ;;  %3055 = vmatpush3.bf16.msra.mxu0 %v3262_v6  ;;  %3014 = vmatprep.mubr.msk.bf16.mxu0 %vm3305_vm1, %v3304_v0  ;;  %v1184_v24 = vor.u32 %v1182_v32, %v1180_v13  ;;  %v1585_v8 = vrot.slane %v3711_v1, 1 }
 0x14e   : > { %v1059_v2 = vsel %vm3598_vm12, %v1050_v16, %v1058_v17  ;;  %v1060_v15 = vrot.slane %v1058_v17, 4  ;;  %v1068_v25 = vor.u32 %v1067_v20, %v1064_v18  ;;  %v1186_v28 = vshll.u32 %v3660_v23, 16  ;;  %3056 = vmatprep.subr.bf16.mxu0 %v3304_v0  ;;  %v3278_v10 = vld [vmem:[%s4028_s4 + $0x50] sm:$0xff]   ;;  %v3279_v17 = vld [vmem:[%s4028_s4 + $0x58] sm:$0xff]   ;;  %v1410_v20 = vld [vmem:[#allocation2] sm:$0xe] }
 0x14f   : > { %1113 = vst.msk [vmem:[#allocation2 + $0x1c] sm:$0xf] %vm945_vm6, %v1059_v2  ;;  %v1072_v19 = vshrl.u32 %v2819_v12, 16  ;;  %v1075_v26 = vshll.u32 %v2819_v12, 16  ;;  %v2820_v27 = vpack.c.bf16 %v944_v21, %v944_v21  ;;  %v1190_v52 = vshrl.u32 %v3660_v23, 16  ;;  %v3734_v6 = vld [vmem:[#allocation2 + $0x14] sm:$0xff]  }
 0x150   : > { %v1069_v31 = vsel %vm3598_vm12, %v1060_v15, %v1068_v25  ;;  %3043 = vmatmul.mubr.msk.bf16.gmra.mrb[56].mxu1 %vm1226_vm13, %v3660_v23  ;;  %v1188_v38 = vrot.slane %v1186_v28, 1  ;;  %v1070_v39 = vrot.slane %v1068_v25, 4  ;;  %v1584_v61 = vrot.slane %v3718_v36, 1  ;;  %v3277_v28 = vld [vmem:[%s4028_s4 + $0x48] sm:$0xff]  }
 0x151   : > { %1114 = vst.msk [vmem:[#allocation2 + $0x20] sm:$0xf] %vm945_vm6, %v1069_v31  ;;  %v1074_v4 = vrot.slane %v1072_v19, 6  ;;  %v1077_v33 = vrot.slane %v1075_v26, 7  ;;  %v1082_v34 = vshrl.u32 %v2820_v27, 16  ;;  %v1085_v35 = vshll.u32 %v2820_v27, 16  ;;  %3046 = vmatprep.mubr.msk.bf16.mxu1 %vm3305_vm1, %v3304_v0  ;;  %3057 = vmatpush3.bf16.msra.mxu0 %v3266_v29 }
 0x152   : > { %v1189_v44 = vsel %vm297_vm2, %v1184_v24, %v1188_v38  ;;  %3102 = vmatprep.subr.bf16.mxu0 %v3304_v0  ;;  %v1192_v37 = vor.u32 %v1190_v52, %v1188_v38  ;;  %v1586_v11 = vsel %vm573_vm4, %v1584_v61, %v1585_v8  ;;  %v1587_v18 = vrot.slane %v3734_v6, 1  ;;  %v3273_v19 = vld [vmem:[%s4028_s4 + $0x40] sm:$0xff]   ;;  %v3283_v61 = vld [vmem:[%s4028_s4 + $0x68] sm:$0xff]  }
 0x153   : > { %v1078_v40 = vor.u32 %v1077_v33, %v1074_v4  ;;  %v1084_v41 = vrot.slane %v1082_v34, 6  ;;  %v1087_v43 = vrot.slane %v1085_v35, 7  ;;  %v2708_v22 = vcombine.low %v1410_v20, %v3610_v14  ;;  %v1877_v38 = vld [vmem:[#allocation2 + $0x4] sm:$0xc] }
 0x154   : > { %3015 = vmatmul.mubr.msk.bf16.gmra.mrb[36].mxu0 %vm1226_vm13, %v1189_v44  ;;  %v1588_v21 = vsel %vm573_vm4, %v1585_v8, %v1587_v18  ;;  %v1420_v15 = vrot.slane %v3640_v51, 1  ;;  %v1422_v29 = vrot.slane %v3660_v23, 1  ;;  %v1715_v52 = vshrl.u32 %v3718_v36, 16 }
 0x155   : > { %v1079_v45 = vsel %vm3598_vm12, %v1070_v39, %v1078_v40  ;;  %v1080_v46 = vrot.slane %v1078_v40, 4  ;;  %v1088_v47 = vor.u32 %v1087_v43, %v1084_v41  ;;  %3018 = vmatprep.mubr.msk.bf16.mxu0 %vm3305_vm1, %v3304_v0  ;;  %v1419_v25 = vrot.slane %v2708_v22, 1 }
 0x156   : > { %1115 = vst.msk [vmem:[#allocation2 + $0x24] sm:$0xf] %vm945_vm6, %v1079_v45  ;;  %v3688_v55 = vld [vmem:[#allocation2 + $0x18] sm:$0xff]   ;;  %v1423_v32 = vsel %vm573_vm4, %v1420_v15, %v1422_v29  ;;  %v2749_v40 = vcombine.low %v1877_v38, %v3705_v60  ;;  %v1888_v41 = vrot.slane %v3711_v1, 2  ;;  %v3284_v45 = vld [vmem:[%s4028_s4 + $0x70] sm:$0xff]  }
 0x157   : > { %v1089_v48 = vsel %vm3598_vm12, %v1080_v46, %v1088_v47  ;;  %v1090_v50 = vrot.slane %v1088_v47, 4  ;;  %v1194_v54 = vshll.u32 %v3688_v55, 16  ;;  %v1198_v62 = vshrl.u32 %v3688_v55, 16 }
 0x158   : > { %1116 = vst.msk [vmem:[#allocation2 + $0x28] sm:$0xf] %vm945_vm6, %v1089_v48  ;;  %3047 = vmatmul.mubr.msk.bf16.gmra.mrb[60].mxu1 %vm1226_vm13, %v3688_v55  ;;  %v3751_v2 = vld [vmem:[#allocation2 + $0x1c] sm:$0xff]   ;;  %v1421_v27 = vsel %vm573_vm4, %v1419_v25, %v1420_v15  ;;  %v1424_v23 = vrot.slane %v3688_v55, 1  ;;  %v1887_v44 = vrot.slane %v2749_v40, 2  ;;  %v1726_v55 = vshll.u32 %v3711_v1, 16 }
 0x159   : > { %v1120_v56 = vsel %vm1118_vm15, %v1090_v50, %v1119_v30  ;;  %3050 = vmatprep.mubr.msk.bf16.mxu1 %vm3305_vm1, %v3304_v0  ;;  %v1196_v58 = vrot.slane %v1194_v54, 1  ;;  %v1589_v26 = vrot.slane %v3751_v2, 1  ;;  %v1723_v30 = vshrl.u32 %v3711_v1, 16  ;;  %v3285_v48 = vld [vmem:[%s4028_s4 + $0x78] sm:$0xff]  }
 0x15a   : > { %1121 = vst [vmem:[#allocation2 + $0x2c] sm:$0x3] %v1120_v56  ;;  %v1425_v35 = vsel %vm573_vm4, %v1422_v29, %v1424_v23  ;;  %v1889_v46 = vsel %vm363_vm0, %v1887_v44, %v1888_v41  ;;  %v1890_v50 = vrot.slane %v3734_v6, 2  ;;  %v1718_v54 = vshll.u32 %v3718_v36, 16 }
 0x15b   : > { %v1197_v49 = vsel %vm297_vm2, %v1192_v37, %v1196_v58  ;;  %v1200_v57 = vor.u32 %v1198_v62, %v1196_v58  ;;  %v1590_v14 = vsel %vm573_vm4, %v1587_v18, %v1589_v26  ;;  %v1725_v37 = vrot.slane %v1723_v30, 1 }
 0x15c   : > { %3019 = vmatmul.mubr.msk.bf16.gmra.mrb[40].mxu0 %vm1226_vm13, %v1197_v49  ;;  %v1728_v58 = vrot.slane %v1726_v55, 2  ;;  %v1891_v49 = vsel %vm363_vm0, %v1888_v41, %v1890_v50  ;;  %v1720_v60 = vrot.slane %v1718_v54, 2  ;;  %v1735_v1 = vshll.u32 %v3734_v6, 16 }
 0x15d   : > { %v3702_v59 = vld [vmem:[#allocation2 + $0x20] sm:$0xff]   ;;  %3022 = vmatprep.mubr.msk.bf16.mxu0 %vm3305_vm1, %v3304_v0 }
 0x15e   : > { %v1202_v53 = vshll.u32 %v3702_v59, 16  ;;  %v1206_v13 = vshrl.u32 %v3702_v59, 16  ;;  %v1426_v39 = vrot.slane %v3702_v59, 1  ;;  %v1729_v62 = vor.u32 %v1728_v58, %v1725_v37 }
 0x15f   : > { %v3720_v5 = vld [vmem:[#allocation2 + $0x28] ss:$0 sps:$4 sm:$0x11]  }
 0x160   : > { %3051 = vmatmul.mubr.msk.bf16.gmra.mrb[64].mxu1 %vm1226_vm13, %v3702_v59  ;;  %v1204_v63 = vrot.slane %v1202_v53, 1  ;;  %v1210_v9 = vshll.u32 %v3720_v5, 16  ;;  %v3766_v51 = vld [vmem:[#allocation2 + $0x24] sm:$0xff]   ;;  %v1427_v43 = vsel %vm573_vm4, %v1424_v23, %v1426_v39  ;;  %v1428_v47 = vrot.slane %v3720_v5, 1  ;;  %v3875_v23 = vld [vmem:[#allocation2 + $0x18] sm:$0xff]  }
 0x161   : > { %3082 = vmatprep.mubr.msk.bf16.mxu1 %vm3305_vm1, %v3304_v0  ;;  %v1591_v31 = vrot.slane %v3766_v51, 1  ;;  %v3276_v33 = vld [vmem:[#allocation2 + $0x2c] ss:$0 sps:$4 sm:$0x11]   ;;  %v1717_v59 = vrot.slane %v1715_v52, 1  ;;  %v1732_v53 = vshrl.u32 %v3734_v6, 16 }
 0x162   : > { %v1205_v7 = vsel %vm297_vm2, %v1200_v57, %v1204_v63  ;;  %v1208_v42 = vor.u32 %v1206_v13, %v1204_v63  ;;  %v1212_v16 = vrot.slane %v1210_v9, 1  ;;  %v1593_v34 = vrot.slane %v3276_v33, 1  ;;  %v3281_v57 = vld [vmem:[%s4028_s4 + $0x60] sm:$0xff]   ;;  %v3282_v20 = vld [vmem:[#allocation2 + $0x2c] ss:$0 sps:$4 sm:$0x33]  }
 0x163   : > { %v1592_v4 = vsel %vm573_vm4, %v1589_v26, %v1591_v31  ;;  %v1429_v56 = vsel %vm573_vm4, %v1426_v39, %v1428_v47  ;;  %v1721_v3 = vor.u32 %v1720_v60, %v1717_v59  ;;  %v1892_v63 = vrot.slane %v3751_v2, 2 }
 0x164   : > { %3023 = vmatmul.mubr.msk.bf16.gmra.mrb[44].mxu0 %vm1226_vm13, %v1205_v7  ;;  %v1213_v12 = vsel %vm297_vm2, %v1208_v42, %v1212_v16  ;;  %v1594_v24 = vsel %vm573_vm4, %v1591_v31, %v1593_v34  ;;  %v1734_v5 = vrot.slane %v1732_v53, 1  ;;  %v1737_v7 = vrot.slane %v1735_v1, 2 }
 0x165   : > { %3026 = vmatprep.mubr.msk.bf16.mxu0 %vm3305_vm1, %v3304_v0  ;;  %v1730_v36 = vsel %vm698_vm5, %v1721_v3, %v1729_v62  ;;  %v1893_v8 = vsel %vm363_vm0, %v1890_v50, %v1892_v63  ;;  %v1894_v13 = vrot.slane %v3766_v51, 2  ;;  %v1750_v15 = vshrl.u32 %v3766_v51, 16  ;;  %v3887_v50 = vld [vmem:[#allocation2 + $0x20] sm:$0xff]  }
 0x166   : > { %v1738_v9 = vor.u32 %v1737_v7, %v1734_v5  ;;  %v1753_v25 = vshll.u32 %v3766_v51, 16  ;;  %v1759_v38 = vshrl.u32 %v3282_v20, 16  ;;  %v1762_v39 = vshll.u32 %v3282_v20, 16  ;;  %v3289_v3 = vld [vmem:[%s4028_s4 + $0x80] sm:$0xff]  }
 0x167   : > { %v1895_v18 = vsel %vm363_vm0, %v1892_v63, %v1894_v13  ;;  %v1752_v29 = vrot.slane %v1750_v15, 1  ;;  %v2201_v41 = vshrl.u32 %v3875_v23, 16  ;;  %vm2182_vm2 = vsmask.f32 5376 }
 0x168   : > { %3083 = vmatmul.mubr.msk.bf16.vlgmr.msra.gmra.mrb[68].mxu1 %vm1226_vm13, %v1586_v11  ;;  %v1744_v11 = vshll.u32 %v3751_v2, 16  ;;  %v1739_v6 = vsel %vm698_vm5, %v1729_v62, %v1738_v9  ;;  %v1755_v31 = vrot.slane %v1753_v25, 2  ;;  %v1764_v47 = vrot.slane %v1762_v39, 2  ;;  %v3899_v62 = vld [vmem:[#allocation2 + $0x28] sm:$0xff]  }
 0x169   : > { %3086 = vmatprep.mubr.msk.bf16.mxu1 %vm3305_vm1, %v3304_v0  ;;  %3127 = vmatpush3.bf16.msra.mxu1 %v3278_v10  ;;  %v1741_v10 = vshrl.u32 %v3751_v2, 16  ;;  %v2203_v55 = vrot.slane %v2201_v41, 2  ;;  %v2213_v37 = vshll.u32 %v3887_v50, 16  ;;  %v2219_v63 = vshrl.u32 %v3899_v62, 16 }
 0x16a   : > { %3128 = vmatprep.subr.bf16.mxu1 %v3304_v0  ;;  %v1746_v16 = vrot.slane %v1744_v11, 2  ;;  %v2055_v11 = vrot.slane %v3875_v23, 2 }
 0x16b   : > { %v1743_v42 = vrot.slane %v1741_v10, 1  ;;  %v2215_v60 = vrot.slane %v2213_v37, 3  ;;  %v3293_v10 = vld [vmem:[%s4028_s4 + $0x88] sm:$0xff]  }
 0x16c   : > { %3027 = vmatmul.mubr.msk.bf16.gmra.mrb[48].mxu0 %vm1226_vm13, %v1213_v12  ;;  %v2008_v12 = vld [vmem:[#allocation2 + $0x8] sm:$0xc] }
 0x16d   : > { %3129 = vmatpush3.bf16.msra.mxu1 %v3279_v17  ;;  %3058 = vmatprep.mubr.msk.bf16.mxu0 %vm3305_vm1, %v3304_v0  ;;  %v3850_v17 = vld [vmem:[#allocation2 + $0xc] sm:$0xf]  ;;  %v1747_v2 = vor.u32 %v1746_v16, %v1743_v42 }
 0x16e   : > { %3174 = vmatprep.subr.bf16.mxu1 %v3304_v0  ;;  %v3860_v22 = vcombine.low %v2008_v12, %v3850_v17 }
 0x170   : > { %3087 = vmatmul.mubr.msk.bf16.gmra.mrb[72].mxu1 %vm1226_vm13, %v1588_v21  ;;  %v3856_v21 = vld [vmem:[#allocation2 + $0x10] sm:$0xff]   ;;  %v2052_v1 = vrot.slane %v3860_v22, 2 }
 0x171   : > { %3090 = vmatprep.mubr.msk.bf16.mxu1 %vm3305_vm1, %v3304_v0  ;;  %v2192_v26 = vshrl.u32 %v3856_v21, 16  ;;  %v2053_v53 = vrot.slane %v3856_v21, 2 }
 0x173   : > { %v2194_v51 = vrot.slane %v2192_v26, 2  ;;  %v2054_v5 = vsel %vm363_vm0, %v2052_v1, %v2053_v53  ;;  %v2056_v16 = vsel %vm363_vm0, %v2053_v53, %v2055_v11 }
 0x174   : > { %3059 = vmatmul.mubr.msk.bf16.vlgmr.msra.gmra.mrb[52].mxu0 %vm1226_vm13, %v1421_v27  ;;  %v2195_v27 = vshll.u32 %v3856_v21, 16 }
 0x175   : > { %3103 = vmatpush3.bf16.msra.mxu0 %v3273_v19  ;;  %3062 = vmatprep.mubr.msk.bf16.mxu0 %vm3305_vm1, %v3304_v0  ;;  %v1896_v19 = vrot.slane %v3282_v20, 2 }
 0x176   : > { %3104 = vmatprep.subr.bf16.mxu0 %v3304_v0  ;;  %v2197_v33 = vrot.slane %v2195_v27, 3  ;;  %v3294_v27 = vld [vmem:[#allocation2 + $0x30] ss:$0 sps:$4 sm:$0x33]  }
 0x178   : > { %3091 = vmatmul.mubr.msk.bf16.gmra.mrb[76].mxu1 %vm1226_vm13, %v1590_v14  ;;  %v2184_v14 = vshrl.u32 %v3860_v22, 16  ;;  %v2198_v40 = vor.u32 %v2197_v33, %v2194_v51  ;;  %v2359_v33 = vrot.slane %v3875_v23, 3 }
 0x179   : > { %3094 = vmatprep.mubr.msk.bf16.mxu1 %vm3305_vm1, %v3304_v0  ;;  %3105 = vmatpush3.bf16.msra.mxu0 %v3277_v28  ;;  %v1748_v28 = vsel %vm698_vm5, %v1738_v9, %v1747_v2  ;;  %v3292_v9 = vld [vmem:[#allocation2 + $0x30] ss:$0 sps:$4 sm:$0x77]  }
 0x17a   : > { %3150 = vmatprep.subr.bf16.mxu0 %v3304_v0  ;;  %v2186_v34 = vrot.slane %v2184_v14, 2  ;;  %v2231_v42 = vshll.u32 %v3292_v9, 16  ;;  %v2061_v14 = vrot.slane %v3294_v27, 2 }
 0x17c   : > { %3063 = vmatmul.mubr.msk.bf16.gmra.mrb[56].mxu0 %vm1226_vm13, %v1423_v32  ;;  %v2187_v32 = vshll.u32 %v3860_v22, 16  ;;  %v2233_v12 = vrot.slane %v2231_v42, 3  ;;  %v2057_v22 = vrot.slane %v3887_v50, 2 }
 0x17d   : > { %3066 = vmatprep.mubr.msk.bf16.mxu0 %vm3305_vm1, %v3304_v0 }
 0x17e   : > { %v2058_v15 = vsel %vm363_vm0, %v2055_v11, %v2057_v22 }
 0x180   : > { %3095 = vmatmul.mubr.msk.bf16.gmra.mrb[80].mxu1 %vm1226_vm13, %v1592_v4  ;;  %v1897_v4 = vsel %vm363_vm0, %v1894_v13, %v1896_v19  ;;  %v2059_v19 = vrot.slane %v3899_v62, 2 }
 0x181   : > { %3098 = vmatprep.mubr.msk.bf16.mxu1 %vm3305_vm1, %v3304_v0 }
 0x182   : > { %v2060_v26 = vsel %vm363_vm0, %v2057_v22, %v2059_v19 }
 0x184   : > { %3067 = vmatmul.mubr.msk.bf16.gmra.mrb[60].mxu0 %vm1226_vm13, %v1425_v35  ;;  %v1756_v35 = vor.u32 %v1755_v31, %v1752_v29  ;;  %v2346_v29 = vld [vmem:[#allocation2 + $0x8] sm:$0x8] }
 0x185   : > { %3070 = vmatprep.mubr.msk.bf16.mxu0 %vm3305_vm1, %v3304_v0  ;;  %v2790_v31 = vcombine.low %v2346_v29, %v3850_v17  ;;  %v2361_v17 = vrot.slane %v3887_v50, 3 }
 0x186   : > { %v1757_v44 = vsel %vm698_vm5, %v1747_v2, %v1756_v35 }
 0x188   : > { %3099 = vmatmul.mubr.msk.bf16.gmra.mrb[84].mxu1 %vm1226_vm13, %v1594_v24  ;;  %v2189_v24 = vrot.slane %v2187_v32, 3  ;;  %v2357_v32 = vrot.slane %v3856_v21, 3  ;;  %v2362_v21 = vsel %vm2355_vm3, %v2359_v33, %v2361_v17 }
 0x189   : > { %3130 = vmatprep.mubr.msk.bf16.mxu1 %vm3305_vm1, %v3304_v0 }
 0x18c   : > { %3071 = vmatmul.mubr.msk.bf16.gmra.mrb[64].mxu0 %vm1226_vm13, %v1427_v43  ;;  %v2204_v43 = vshll.u32 %v3875_v23, 16 }
 0x18d   : > { %3074 = vmatprep.mubr.msk.bf16.mxu0 %vm3305_vm1, %v3304_v0 }
 0x190   : > { %3131 = vmatmul.mubr.msk.bf16.vlgmr.msra.gmra.mrb[88].mxu1 %vm1226_vm13, %v1889_v46  ;;  %v1761_v46 = vrot.slane %v1759_v38, 1 }
 0x191   : > { %3134 = vmatprep.mubr.msk.bf16.mxu1 %vm3305_vm1, %v3304_v0  ;;  %3175 = vmatpush3.bf16.msra.mxu1 %v3284_v45  ;;  %v2190_v45 = vor.u32 %v2189_v24, %v2186_v34  ;;  %v2360_v34 = vsel %vm2355_vm3, %v2357_v32, %v2359_v33  ;;  %v2365_v24 = vrot.slane %v3292_v9, 3 }
 0x192   : > { %3176 = vmatprep.subr.bf16.mxu1 %v3304_v0  ;;  %v1765_v52 = vor.u32 %v1764_v47, %v1761_v46 }
 0x193   : > { %v2199_v30 = vsel %vm2182_vm2, %v2190_v45, %v2198_v40 }
 0x194   : > { %3075 = vmatmul.mubr.msk.bf16.gmra.mrb[68].mxu0 %vm1226_vm13, %v1429_v56  ;;  %v2210_v56 = vshrl.u32 %v3887_v50, 16  ;;  %v1766_v58 = vsel %vm698_vm5, %v1756_v35, %v1765_v52  ;;  %v2363_v35 = vrot.slane %v3899_v62, 3 }
 0x195   : > { %3177 = vmatpush3.bf16.msra.mxu1 %v3285_v48  ;;  %3106 = vmatprep.mubr.msk.bf16.mxu0 %vm3305_vm1, %v3304_v0  ;;  %v2206_v48 = vrot.slane %v2204_v43, 3 }
 0x196   : > { %v2212_v59 = vrot.slane %v2210_v56, 2  ;;  %v2364_v23 = vsel %vm2355_vm3, %v2361_v17, %v2363_v35  ;;  %v2366_v38 = vsel %vm2355_vm3, %v2363_v35, %v2365_v24 }
 0x197   : > { %v2207_v54 = vor.u32 %v2206_v48, %v2203_v55 }
 0x198   : > { %3135 = vmatmul.mubr.msk.bf16.gmra.mrb[92].mxu1 %vm1226_vm13, %v1891_v49 }
 0x199   : > { %3138 = vmatprep.mubr.msk.bf16.mxu1 %vm3305_vm1, %v3304_v0  ;;  %v2208_v49 = vsel %vm2182_vm2, %v2198_v40, %v2207_v54 }
 0x19c   : > { %3107 = vmatmul.mubr.msk.bf16.vlgmr.msra.gmra.mrb[72].mxu0 %vm1226_vm13, %v1730_v36  ;;  %v2222_v36 = vshll.u32 %v3899_v62, 16 }
 0x19d   : > { %3151 = vmatpush3.bf16.msra.mxu0 %v3281_v57  ;;  %3110 = vmatprep.mubr.msk.bf16.mxu0 %vm3305_vm1, %v3304_v0  ;;  %v2216_v57 = vor.u32 %v2215_v60, %v2212_v59 }
 0x19e   : > { %3152 = vmatprep.subr.bf16.mxu0 %v3304_v0 }
 0x19f   : > { %v2217_v7 = vsel %vm2182_vm2, %v2207_v54, %v2216_v57 }
 0x1a0   : > { %3139 = vmatmul.mubr.msk.bf16.gmra.mrb[96].mxu1 %vm1226_vm13, %v1893_v8  ;;  %v2221_v8 = vrot.slane %v2219_v63, 2 }
 0x1a1   : > { %3142 = vmatprep.mubr.msk.bf16.mxu1 %vm3305_vm1, %v3304_v0  ;;  %3153 = vmatpush3.bf16.msra.mxu0 %v3283_v61  ;;  %v2224_v61 = vrot.slane %v2222_v36, 3 }
 0x1a2   : > { %3198 = vmatprep.subr.bf16.mxu0 %v3304_v0 }
 0x1a3   : > { %v2225_v13 = vor.u32 %v2224_v61, %v2221_v8 }
 0x1a4   : > { %3111 = vmatmul.mubr.msk.bf16.gmra.mrb[76].mxu0 %vm1226_vm13, %v1739_v6  ;;  %v2228_v6 = vshrl.u32 %v3292_v9, 16 }
 0x1a5   : > { %3114 = vmatprep.mubr.msk.bf16.mxu0 %vm3305_vm1, %v3304_v0 }
 0x1a6   : > { %v2230_v20 = vrot.slane %v2228_v6, 2 }
 0x1a8   : > { %3143 = vmatmul.mubr.msk.bf16.gmra.mrb[100].mxu1 %vm1226_vm13, %v1895_v18  ;;  %v2226_v18 = vsel %vm2182_vm2, %v2216_v57, %v2225_v13  ;;  %v2234_v2 = vor.u32 %v2233_v12, %v2230_v20 }
 0x1a9   : > { %3146 = vmatprep.mubr.msk.bf16.mxu1 %vm3305_vm1, %v3304_v0 }
 0x1aa   : > { %v2235_v25 = vsel %vm2182_vm2, %v2225_v13, %v2234_v2 }
 0x1ac   : > { %3115 = vmatmul.mubr.msk.bf16.gmra.mrb[80].mxu0 %vm1226_vm13, %v1748_v28  ;;  %v2062_v28 = vsel %vm363_vm0, %v2059_v19, %v2061_v14 }
 0x1ad   : > { %3118 = vmatprep.mubr.msk.bf16.mxu0 %vm3305_vm1, %v3304_v0 }
 0x1b0   : > { %3147 = vmatmul.mubr.msk.bf16.gmra.mrb[104].mxu1 %vm1226_vm13, %v1897_v4  ;;  %v2356_v4 = vrot.slane %v2790_v31, 3 }
 0x1b1   : > { %3178 = vmatprep.mubr.msk.bf16.mxu1 %vm3305_vm1, %v3304_v0 }
 0x1b2   : > { %v2358_v51 = vsel %vm2355_vm3, %v2356_v4, %v2357_v32 }
 0x1b4   : > { %3119 = vmatmul.mubr.msk.bf16.gmra.mrb[84].mxu0 %vm1226_vm13, %v1757_v44 }
 0x1b5   : > { %3122 = vmatprep.mubr.msk.bf16.mxu0 %vm3305_vm1, %v3304_v0 }
 0x1b8   : > { %3179 = vmatmul.mubr.msk.bf16.vlgmr.msra.gmra.mrb[108].mxu1 %vm1226_vm13, %v2199_v30 }
 0x1b9   : > { %3182 = vmatprep.mubr.msk.bf16.mxu1 %vm3305_vm1, %v3304_v0 }
 0x1bc   : > { %3123 = vmatmul.mubr.msk.bf16.gmra.mrb[88].mxu0 %vm1226_vm13, %v1766_v58 }
 0x1bd   : > { %3154 = vmatprep.mubr.msk.bf16.mxu0 %vm3305_vm1, %v3304_v0 }
 0x1c0   : > { %3183 = vmatmul.mubr.msk.bf16.gmra.mrb[112].mxu1 %vm1226_vm13, %v2208_v49 }
 0x1c1   : > { %3186 = vmatprep.mubr.msk.bf16.mxu1 %vm3305_vm1, %v3304_v0 }
 0x1c4   : > { %3155 = vmatmul.mubr.msk.bf16.vlgmr.msra.gmra.mrb[92].mxu0 %vm1226_vm13, %v2054_v5 }
 0x1c5   : > { %3199 = vmatpush3.bf16.msra.mxu0 %v3289_v3  ;;  %3158 = vmatprep.mubr.msk.bf16.mxu0 %vm3305_vm1, %v3304_v0 }
 0x1c6   : > { %3200 = vmatprep.subr.bf16.mxu0 %v3304_v0 }
 0x1c8   : > { %3187 = vmatmul.mubr.msk.bf16.gmra.mrb[116].mxu1 %vm1226_vm13, %v2217_v7 }
 0x1c9   : > { %3190 = vmatprep.mubr.msk.bf16.mxu1 %vm3305_vm1, %v3304_v0  ;;  %3201 = vmatpush3.bf16.msra.mxu0 %v3293_v10 }
 0x1cc   : > { %3159 = vmatmul.mubr.msk.bf16.gmra.mrb[96].mxu0 %vm1226_vm13, %v2056_v16 }
 0x1cd   : > { %3162 = vmatprep.mubr.msk.bf16.mxu0 %vm3305_vm1, %v3304_v0 }
 0x1d0   : > { %3191 = vmatmul.mubr.msk.bf16.gmra.mrb[120].mxu1 %vm1226_vm13, %v2226_v18 }
 0x1d1   : > { %3194 = vmatprep.mubr.msk.bf16.mxu1 %vm3305_vm1, %v3304_v0 }
 0x1d4   : > { %3163 = vmatmul.mubr.msk.bf16.gmra.mrb[100].mxu0 %vm1226_vm13, %v2058_v15 }
 0x1d5   : > { %3166 = vmatprep.mubr.msk.bf16.mxu0 %vm3305_vm1, %v3304_v0 }
 0x1d8   : > { %3195 = vmatmul.mubr.msk.bf16.gmra.mrb[124].mxu1 %vm1226_vm13, %v2235_v25 }
 0x1dc   : > { %3167 = vmatmul.mubr.msk.bf16.gmra.mrb[104].mxu0 %vm1226_vm13, %v2060_v26 }
 0x1dd   : > { %3170 = vmatprep.mubr.msk.bf16.mxu0 %vm3305_vm1, %v3304_v0 }
 0x1e4   : > { %3171 = vmatmul.mubr.msk.bf16.gmra.mrb[108].mxu0 %vm1226_vm13, %v2062_v28 }
 0x1e5   : > { %3202 = vmatprep.mubr.msk.bf16.mxu0 %vm3305_vm1, %v3304_v0 }
 0x1ec   : > { %3203 = vmatmul.mubr.msk.bf16.vlgmr.msra.gmra.mrb[112].mxu0 %vm1226_vm13, %v2358_v51 }
 0x1ed   : > { %3206 = vmatprep.mubr.msk.bf16.mxu0 %vm3305_vm1, %v3304_v0 }
 0x1f4   : > { %3207 = vmatmul.mubr.msk.bf16.gmra.mrb[116].mxu0 %vm1226_vm13, %v2360_v34 }
 0x1f5   : > { %3210 = vmatprep.mubr.msk.bf16.mxu0 %vm3305_vm1, %v3304_v0 }
 0x1fc   : > { %3211 = vmatmul.mubr.msk.bf16.gmra.mrb[120].mxu0 %vm1226_vm13, %v2362_v21 }
 0x1fd   : > { %3214 = vmatprep.mubr.msk.bf16.mxu0 %vm3305_vm1, %v3304_v0 }
 0x204   : > { %3215 = vmatmul.mubr.msk.bf16.gmra.mrb[124].mxu0 %vm1226_vm13, %v2364_v23 }
 0x205   : > { %3218 = vmatprep.mubr.msk.bf16.mxu0 %vm3305_vm1, %v3304_v0 }
 0x20c   : > { %3219 = vmatmul.mubr.msk.bf16.gmra.mrb[128].mxu0 %vm1226_vm13, %v2366_v38 }
 0x213   : > { %v1371_v39 = vpop.f32.mrb[48].mxu1 }
 0x214   : > { %v3036_v40 = vpop.f32.mrb[49].mxu1 }
 0x215   : > { %v1374_v41 = vpop.f32.mrb[50].mxu1 }
 0x216   : > { %v3037_v43 = vpop.f32.mrb[51].mxu1 }
 0x21b   : > { %v1379_v44 = vpop.f32.mrb[52].mxu1 }
 0x21c   : > { %v3040_v45 = vpop.f32.mrb[53].mxu1 }
 0x21d   : > { %v1382_v46 = vpop.f32.mrb[54].mxu1 }
 0x21e   : > { %v3041_v47 = vpop.f32.mrb[55].mxu1 }
 0x21f   : > { %v1276_v30 = vpop.f32.mrb[32].mxu0 }
 0x220   : > { %v1372_v55 = vadd.f32 %v1371_v39, %v1276_v30  ;;  %v3012_v48 = vpop.f32.mrb[33].mxu0 }
 0x221   : > { %v1279_v50 = vpop.f32.mrb[34].mxu0 }
 0x222   : > { %v1375_v54 = vadd.f32 %v1374_v41, %v1279_v50  ;;  %v3013_v0 = vpop.f32.mrb[35].mxu0 }
 0x223   : > { %v1387_v52 = vpop.f32.mrb[56].mxu1 }
 0x224   : > { %v3044_v56 = vpop.f32.mrb[57].mxu1 }
 0x225   : > { %v1390_v37 = vpop.f32.mrb[58].mxu1 }
 0x226   : > { %v3045_v58 = vpop.f32.mrb[59].mxu1 }
 0x227   : > { %v1284_v49 = vpop.f32.mrb[36].mxu0 }
 0x228   : > { %v1380_v59 = vadd.f32 %v1379_v44, %v1284_v49  ;;  %v3016_v60 = vpop.f32.mrb[37].mxu0 }
 0x229   : > { %v1287_v62 = vpop.f32.mrb[38].mxu0 }
 0x22a   : > { %v1383_v1 = vadd.f32 %v1382_v46, %v1287_v62  ;;  %v3017_v3 = vpop.f32.mrb[39].mxu0 }
 0x22b   : > { %v1395_v53 = vpop.f32.mrb[60].mxu1 }
 0x22c   : > { %v3048_v57 = vpop.f32.mrb[61].mxu1 }
 0x22d   : > { %v1398_v63 = vpop.f32.mrb[62].mxu1 }
 0x22e   : > { %v3049_v36 = vpop.f32.mrb[63].mxu1 }
 0x22f   : > { %v1292_v5 = vpop.f32.mrb[40].mxu0 }
 0x230   : > { %v1388_v7 = vadd.f32 %v1387_v52, %v1292_v5  ;;  %v3020_v8 = vpop.f32.mrb[41].mxu0 }
 0x231   : > { %v1295_v61 = vpop.f32.mrb[42].mxu0 }
 0x232   : > { %v1391_v10 = vadd.f32 %v1390_v37, %v1295_v61  ;;  %v3021_v11 = vpop.f32.mrb[43].mxu0 }
 0x233   : > { %v1403_v9 = vpop.f32.mrb[64].mxu1 }
 0x234   : > { %v3052_v13 = vpop.f32.mrb[65].mxu1 }
 0x235   : > { %v1406_v6 = vpop.f32.mrb[66].mxu1 }
 0x236   : > { %v3053_v42 = vpop.f32.mrb[67].mxu1 }
 0x237   : > { %v1300_v16 = vpop.f32.mrb[44].mxu0 }
 0x238   : > { %v1396_v18 = vadd.f32 %v1395_v53, %v1300_v16  ;;  %v3024_v20 = vpop.f32.mrb[45].mxu0 }
 0x239   : > { %v1303_v12 = vpop.f32.mrb[46].mxu0 }
 0x23a   : > { %v1399_v2 = vadd.f32 %v1398_v63, %v1303_v12  ;;  %v3025_v15 = vpop.f32.mrb[47].mxu0 }
 0x23b   : > { %v1656_v22 = vpop.f32.mrb[68].mxu1 }
 0x23c   : > { %v3084_v25 = vpop.f32.mrb[69].mxu1 }
 0x23d   : > { %v1659_v19 = vpop.f32.mrb[70].mxu1 }
 0x23e   : > { %v3085_v26 = vpop.f32.mrb[71].mxu1 }
 0x23f   : > { %v1308_v27 = vpop.f32.mrb[48].mxu0 }
 0x240   : > { %v1404_v14 = vadd.f32 %v1403_v9, %v1308_v27  ;;  %v3028_v28 = vpop.f32.mrb[49].mxu0 }
 0x241   : > { %v1311_v29 = vpop.f32.mrb[50].mxu0 }
 0x242   : > { %v1407_v32 = vadd.f32 %v1406_v6, %v1311_v29  ;;  %v3029_v4 = vpop.f32.mrb[51].mxu0 }
 0x243   : > { %v1664_v31 = vpop.f32.mrb[72].mxu1 }
 0x244   : > { %v3088_v51 = vpop.f32.mrb[73].mxu1 }
 0x245   : > { %v1667_v33 = vpop.f32.mrb[74].mxu1 }
 0x246   : > { %v3089_v34 = vpop.f32.mrb[75].mxu1 }
 0x247   : > { %v1491_v17 = vpop.f32.mrb[52].mxu0 }
 0x248   : > { %v1530_v21 = vadd.f32 %v1491_v17, %v1372_v55  ;;  %v3060_v35 = vpop.f32.mrb[53].mxu0 }
 0x249   : > { %v1494_v23 = vpop.f32.mrb[54].mxu0 }
 0x24a   : > { %v1531_v38 = vadd.f32 %v1494_v23, %v1375_v54  ;;  %v3061_v39 = vpop.f32.mrb[55].mxu0  ;;  %v1695_v41 = vadd.f32 %v1656_v22, %v1530_v21 }
 0x24b   : > { %v1672_v24 = vpop.f32.mrb[76].mxu1 }
 0x24c   : > { %v3092_v40 = vpop.f32.mrb[77].mxu1  ;;  %v1696_v45 = vadd.f32 %v1659_v19, %v1531_v38 }
 0x24d   : > { %v1675_v43 = vpop.f32.mrb[78].mxu1 }
 0x24e   : > { %v3093_v44 = vpop.f32.mrb[79].mxu1 }
 0x24f   : > { %v1499_v46 = vpop.f32.mrb[56].mxu0 }
 0x250   : > { %v1532_v47 = vadd.f32 %v1499_v46, %v1380_v59  ;;  %v3064_v30 = vpop.f32.mrb[57].mxu0 }
 0x251   : > { %v1502_v48 = vpop.f32.mrb[58].mxu0 }
 0x252   : > { %v1533_v52 = vadd.f32 %v1502_v48, %v1383_v1  ;;  %v3065_v0 = vpop.f32.mrb[59].mxu0  ;;  %v1697_v37 = vadd.f32 %v1664_v31, %v1532_v47 }
 0x253   : > { %v1680_v50 = vpop.f32.mrb[80].mxu1 }
 0x254   : > { %v3096_v56 = vpop.f32.mrb[81].mxu1  ;;  %v1698_v49 = vadd.f32 %v1667_v33, %v1533_v52 }
 0x255   : > { %v1683_v55 = vpop.f32.mrb[82].mxu1 }
 0x256   : > { %v3097_v58 = vpop.f32.mrb[83].mxu1 }
 0x257   : > { %v1507_v60 = vpop.f32.mrb[60].mxu0 }
 0x258   : > { %v1534_v54 = vadd.f32 %v1507_v60, %v1388_v7  ;;  %v3068_v62 = vpop.f32.mrb[61].mxu0 }
 0x259   : > { %v1510_v53 = vpop.f32.mrb[62].mxu0 }
 0x25a   : > { %v1535_v57 = vadd.f32 %v1510_v53, %v1391_v10  ;;  %v3069_v63 = vpop.f32.mrb[63].mxu0  ;;  %v1699_v5 = vadd.f32 %v1672_v24, %v1534_v54 }
 0x25b   : > { %v1688_v3 = vpop.f32.mrb[84].mxu1 }
 0x25c   : > { %v3100_v36 = vpop.f32.mrb[85].mxu1  ;;  %v1700_v61 = vadd.f32 %v1675_v43, %v1535_v57 }
 0x25d   : > { %v1691_v59 = vpop.f32.mrb[86].mxu1 }
 0x25e   : > { %v3101_v8 = vpop.f32.mrb[87].mxu1 }
 0x25f   : > { %v1515_v9 = vpop.f32.mrb[64].mxu0 }
 0x260   : > { %v1536_v1 = vadd.f32 %v1515_v9, %v1396_v18  ;;  %v3072_v11 = vpop.f32.mrb[65].mxu0 }
 0x261   : > { %v1518_v13 = vpop.f32.mrb[66].mxu0 }
 0x262   : > { %v1537_v42 = vadd.f32 %v1518_v13, %v1399_v2  ;;  %v3073_v16 = vpop.f32.mrb[67].mxu0  ;;  %v1701_v12 = vadd.f32 %v1680_v50, %v1536_v1 }
 0x263   : > { %v1959_v6 = vpop.f32.mrb[88].mxu1 }
 0x264   : > { %v3132_v20 = vpop.f32.mrb[89].mxu1  ;;  %v1702_v15 = vadd.f32 %v1683_v55, %v1537_v42 }
 0x265   : > { %v1962_v7 = vpop.f32.mrb[90].mxu1 }
 0x266   : > { %v3133_v22 = vpop.f32.mrb[91].mxu1 }
 0x267   : > { %v1523_v25 = vpop.f32.mrb[68].mxu0 }
 0x268   : > { %v1538_v10 = vadd.f32 %v1523_v25, %v1404_v14  ;;  %v3076_v19 = vpop.f32.mrb[69].mxu0 }
 0x269   : > { %v1526_v26 = vpop.f32.mrb[70].mxu0 }
 0x26a   : > { %v1539_v28 = vadd.f32 %v1526_v26, %v1407_v32  ;;  %v3077_v29 = vpop.f32.mrb[71].mxu0  ;;  %v1703_v4 = vadd.f32 %v1688_v3, %v1538_v10 }
 0x26b   : > { %v1967_v27 = vpop.f32.mrb[92].mxu1 }
 0x26c   : > { %v3136_v31 = vpop.f32.mrb[93].mxu1  ;;  %v1704_v33 = vadd.f32 %v1691_v59, %v1539_v28 }
 0x26d   : > { %v1970_v18 = vpop.f32.mrb[94].mxu1 }
 0x26e   : > { %v3137_v51 = vpop.f32.mrb[95].mxu1 }
 0x26f   : > { %v1828_v34 = vpop.f32.mrb[72].mxu0 }
 0x270   : > { %v1867_v2 = vadd.f32 %v1828_v34, %v1695_v41  ;;  %v3108_v17 = vpop.f32.mrb[73].mxu0 }
 0x271   : > { %v1831_v21 = vpop.f32.mrb[74].mxu0 }
 0x272   : > { %v1868_v23 = vadd.f32 %v1831_v21, %v1696_v45  ;;  %v3109_v24 = vpop.f32.mrb[75].mxu0  ;;  %v1998_v39 = vadd.f32 %v1959_v6, %v1867_v2 }
 0x273   : > { %v1975_v35 = vpop.f32.mrb[96].mxu1 }
 0x274   : > { %v3140_v38 = vpop.f32.mrb[97].mxu1  ;;  %v1999_v43 = vadd.f32 %v1962_v7, %v1868_v23 }
 0x275   : > { %v1978_v14 = vpop.f32.mrb[98].mxu1 }
 0x276   : > { %v3141_v40 = vpop.f32.mrb[99].mxu1 }
 0x277   : > { %v1836_v44 = vpop.f32.mrb[76].mxu0 }
 0x278   : > { %v1869_v32 = vadd.f32 %v1836_v44, %v1697_v37  ;;  %v3112_v46 = vpop.f32.mrb[77].mxu0 }
 0x279   : > { %v1839_v47 = vpop.f32.mrb[78].mxu0 }
 0x27a   : > { %v1870_v48 = vadd.f32 %v1839_v47, %v1698_v49  ;;  %v3113_v50 = vpop.f32.mrb[79].mxu0  ;;  %v2000_v0 = vadd.f32 %v1967_v27, %v1869_v32 }
 0x27b   : > { %v1983_v30 = vpop.f32.mrb[100].mxu1 }
 0x27c   : > { %v3144_v52 = vpop.f32.mrb[101].mxu1  ;;  %v2001_v55 = vadd.f32 %v1970_v18, %v1870_v48 }
 0x27d   : > { %v1986_v41 = vpop.f32.mrb[102].mxu1 }
 0x27e   : > { %v3145_v56 = vpop.f32.mrb[103].mxu1 }
 0x27f   : > { %v1844_v58 = vpop.f32.mrb[80].mxu0 }
 0x280   : > { %v1871_v45 = vadd.f32 %v1844_v58, %v1699_v5  ;;  %v3116_v60 = vpop.f32.mrb[81].mxu0 }
 0x281   : > { %v1847_v54 = vpop.f32.mrb[82].mxu0 }
 0x282   : > { %v1872_v53 = vadd.f32 %v1847_v54, %v1700_v61  ;;  %v3117_v3 = vpop.f32.mrb[83].mxu0  ;;  %v2002_v63 = vadd.f32 %v1975_v35, %v1871_v45 }
 0x283   : > { %v1991_v62 = vpop.f32.mrb[104].mxu1 }
 0x284   : > { %v3148_v57 = vpop.f32.mrb[105].mxu1  ;;  %v2003_v59 = vadd.f32 %v1978_v14, %v1872_v53 }
 0x285   : > { %v1994_v37 = vpop.f32.mrb[106].mxu1 }
 0x286   : > { %v3149_v36 = vpop.f32.mrb[107].mxu1 }
 0x287   : > { %v1852_v8 = vpop.f32.mrb[84].mxu0 }
 0x288   : > { %v1873_v49 = vadd.f32 %v1852_v8, %v1701_v12  ;;  %v3120_v9 = vpop.f32.mrb[85].mxu0 }
 0x289   : > { %v1855_v1 = vpop.f32.mrb[86].mxu0 }
 0x28a   : > { %v1874_v13 = vadd.f32 %v1855_v1, %v1702_v15  ;;  %v3121_v6 = vpop.f32.mrb[87].mxu0  ;;  %v2004_v16 = vadd.f32 %v1983_v30, %v1873_v49 }
 0x28b   : > { %v2297_v11 = vpop.f32.mrb[108].mxu1 }
 0x28c   : > { %v3180_v42 = vpop.f32.mrb[109].mxu1  ;;  %v2005_v7 = vadd.f32 %v1986_v41, %v1874_v13 }
 0x28d   : > { %v2300_v5 = vpop.f32.mrb[110].mxu1 }
 0x28e   : > { %v3181_v20 = vpop.f32.mrb[111].mxu1 }
 0x28f   : > { %v1860_v22 = vpop.f32.mrb[88].mxu0 }
 0x290   : > { %v1875_v61 = vadd.f32 %v1860_v22, %v1703_v4  ;;  %v3124_v25 = vpop.f32.mrb[89].mxu0 }
 0x291   : > { %v1863_v10 = vpop.f32.mrb[90].mxu0 }
 0x292   : > { %v1876_v26 = vadd.f32 %v1863_v10, %v1704_v33  ;;  %v3125_v27 = vpop.f32.mrb[91].mxu0  ;;  %v2006_v29 = vadd.f32 %v1991_v62, %v1875_v61 }
 0x293   : > { %v2305_v19 = vpop.f32.mrb[112].mxu1 }
 0x294   : > { %v3184_v28 = vpop.f32.mrb[113].mxu1  ;;  %v2007_v18 = vadd.f32 %v1994_v37, %v1876_v26 }
 0x295   : > { %v2308_v12 = vpop.f32.mrb[114].mxu1 }
 0x296   : > { %v3185_v31 = vpop.f32.mrb[115].mxu1 }
 0x297   : > { %v2124_v51 = vpop.f32.mrb[92].mxu0 }
 0x298   : > { %v2163_v15 = vadd.f32 %v2124_v51, %v1998_v39  ;;  %v3156_v34 = vpop.f32.mrb[93].mxu0 }
 0x299   : > { %v2127_v2 = vpop.f32.mrb[94].mxu0 }
 0x29a   : > { %v2164_v21 = vadd.f32 %v2127_v2, %v1999_v43  ;;  %v3157_v35 = vpop.f32.mrb[95].mxu0  ;;  %v2336_v24 = vadd.f32 %v2297_v11, %v2163_v15 }
 0x29b   : > { %v2313_v17 = vpop.f32.mrb[116].mxu1 }
 0x29c   : > { %v3188_v23 = vpop.f32.mrb[117].mxu1  ;;  %v2337_v14 = vadd.f32 %v2300_v5, %v2164_v21 }
 0x29d   : > { %v2316_v4 = vpop.f32.mrb[118].mxu1 }
 0x29e   : > { %v3189_v38 = vpop.f32.mrb[119].mxu1 }
 0x29f   : > { %v2132_v40 = vpop.f32.mrb[96].mxu0 }
 0x2a0   : > { %v2165_v33 = vadd.f32 %v2132_v40, %v2000_v0  ;;  %v3160_v44 = vpop.f32.mrb[97].mxu0 }
 0x2a1   : > { %v2135_v32 = vpop.f32.mrb[98].mxu0 }
 0x2a2   : > { %v2166_v47 = vadd.f32 %v2135_v32, %v2001_v55  ;;  %v3161_v30 = vpop.f32.mrb[99].mxu0  ;;  %v2338_v50 = vadd.f32 %v2305_v19, %v2165_v33 }
 0x2a3   : > { %v2321_v46 = vpop.f32.mrb[120].mxu1 }
 0x2a4   : > { %v3192_v48 = vpop.f32.mrb[121].mxu1  ;;  %v2339_v41 = vadd.f32 %v2308_v12, %v2166_v47 }
 0x2a5   : > { %v2324_v39 = vpop.f32.mrb[122].mxu1 }
 0x2a6   : > { %v3193_v52 = vpop.f32.mrb[123].mxu1 }
 0x2a7   : > { %v2140_v56 = vpop.f32.mrb[100].mxu0 }
 0x2a8   : > { %v2167_v43 = vadd.f32 %v2140_v56, %v2002_v63  ;;  %v3164_v58 = vpop.f32.mrb[101].mxu0 }
 0x2a9   : > { %v2143_v45 = vpop.f32.mrb[102].mxu0 }
 0x2aa   : > { %v2168_v54 = vadd.f32 %v2143_v45, %v2003_v59  ;;  %v3165_v62 = vpop.f32.mrb[103].mxu0  ;;  %v2340_v3 = vadd.f32 %v2313_v17, %v2167_v43 }
 0x2ab   : > { %v2329_v60 = vpop.f32.mrb[124].mxu1 }
 0x2ac   : > { %v3196_v53 = vpop.f32.mrb[125].mxu1  ;;  %v2341_v37 = vadd.f32 %v2316_v4, %v2168_v54 }
 0x2ad   : > { %v2332_v0 = vpop.f32.mrb[126].mxu1 }
 0x2ae   : > { %v3197_v57 = vpop.f32.mrb[127].mxu1 }
 0x2af   : > { %v2148_v36 = vpop.f32.mrb[104].mxu0 }
 0x2b0   : > { %v2169_v55 = vadd.f32 %v2148_v36, %v2004_v16  ;;  %v3168_v8 = vpop.f32.mrb[105].mxu0  ;;  %v3980_v16 = vld [vmem:[%s4029_s5] ss:$0 sm:$0xff] }
 0x2b1   : > { %v2151_v49 = vpop.f32.mrb[106].mxu0 }
 0x2b2   : > { %v2170_v9 = vadd.f32 %v2151_v49, %v2005_v7  ;;  %v3169_v1 = vpop.f32.mrb[107].mxu0  ;;  %v2342_v11 = vadd.f32 %v2321_v46, %v2169_v55 }
 0x2b4   : > { %v3971_v13 = vadd.f32 %v2324_v39, %v2170_v9 }
 0x2b7   : > { %v2156_v63 = vpop.f32.mrb[108].mxu0 }
 0x2b8   : > { %v2171_v6 = vadd.f32 %v2156_v63, %v2006_v29  ;;  %v3172_v42 = vpop.f32.mrb[109].mxu0 }
 0x2b9   : > { %v2159_v59 = vpop.f32.mrb[110].mxu0 }
 0x2ba   : > { %v2172_v5 = vadd.f32 %v2159_v59, %v2007_v18  ;;  %v3173_v20 = vpop.f32.mrb[111].mxu0  ;;  %v3973_v22 = vadd.f32 %v2329_v60, %v2171_v6 }
 0x2bc   : > { %v3975_v61 = vadd.f32 %v2332_v0, %v2172_v5 }
 0x2bf   : > { %v2428_v25 = vpop.f32.mrb[112].mxu0 }
 0x2c0   : > { %v2467_v7 = vadd.f32 %v2428_v25, %v2336_v24  ;;  %v3204_v10 = vpop.f32.mrb[113].mxu0 }
 0x2c1   : > { %v2431_v19 = vpop.f32.mrb[114].mxu0 }
 0x2c2   : > { %v2484_v26 = vadd.f32 %v3980_v16, %v2467_v7  ;;  %v2468_v27 = vadd.f32 %v2431_v19, %v2337_v14  ;;  %v3205_v28 = vpop.f32.mrb[115].mxu0 }
 0x2c4   : > { %v2494_v29 = vmul.f32 0.01, %v2484_v26  ;;  %v2485_v12 = vadd.f32 %v3980_v16, %v2468_v27 }
 0x2c6   : > { %v2504_v31 = vmax.f32 %v2484_v26, %v2494_v29  ;;  %v2495_v18 = vmul.f32 0.01, %v2485_v12 }
 0x2c7   : > { %v2436_v51 = vpop.f32.mrb[116].mxu0 }
 0x2c8   : > { %v2821_v15 = vpack.c.bf16 %v2504_v31, %v2504_v31  ;;  %v2505_v34 = vmax.f32 %v2485_v12, %v2495_v18  ;;  %v2469_v2 = vadd.f32 %v2436_v51, %v2338_v50  ;;  %v3208_v17 = vpop.f32.mrb[117].mxu0 }
 0x2c9   : > { %v2439_v21 = vpop.f32.mrb[118].mxu0 }
 0x2ca   : > { %2554 = vst.msk [vmem:[%s3988_s9] sm:$0xf] %vm945_vm6, %v2821_v15  ;;  %v2822_v35 = vpack.c.bf16 %v2505_v34, %v2505_v34  ;;  %v2486_v23 = vadd.f32 %v3980_v16, %v2469_v2  ;;  %v2470_v24 = vadd.f32 %v2439_v21, %v2339_v41  ;;  %v3209_v4 = vpop.f32.mrb[119].mxu0 }
 0x2cc   : > { %2555 = vst.msk [vmem:[%s3988_s9 + $0x4] sm:$0xf] %vm945_vm6, %v2822_v35  ;;  %v2496_v38 = vmul.f32 0.01, %v2486_v23  ;;  %v2487_v14 = vadd.f32 %v3980_v16, %v2470_v24 }
 0x2ce   : > { %v2506_v40 = vmax.f32 %v2486_v23, %v2496_v38  ;;  %v2497_v33 = vmul.f32 0.01, %v2487_v14 }
 0x2cf   : > { %v2444_v44 = vpop.f32.mrb[120].mxu0 }
 0x2d0   : > { %v2823_v32 = vpack.c.bf16 %v2506_v40, %v2506_v40  ;;  %v2507_v46 = vmax.f32 %v2487_v14, %v2497_v33  ;;  %v2471_v47 = vadd.f32 %v2444_v44, %v2340_v3  ;;  %v3212_v30 = vpop.f32.mrb[121].mxu0 }
 0x2d1   : > { %v2447_v48 = vpop.f32.mrb[122].mxu0 }
 0x2d2   : > { %2556 = vst.msk [vmem:[%s3988_s9 + $0x8] sm:$0xf] %vm945_vm6, %v2823_v32  ;;  %v2824_v50 = vpack.c.bf16 %v2507_v46, %v2507_v46  ;;  %v2488_v39 = vadd.f32 %v3980_v16, %v2471_v47  ;;  %v2472_v52 = vadd.f32 %v2447_v48, %v2341_v37  ;;  %v3213_v41 = vpop.f32.mrb[123].mxu0 }
 0x2d4   : > { %2557 = vst.msk [vmem:[%s3988_s9 + $0xc] sm:$0xf] %vm945_vm6, %v2824_v50  ;;  %v2498_v56 = vmul.f32 0.01, %v2488_v39  ;;  %v2489_v43 = vadd.f32 %v3980_v16, %v2472_v52 }
 0x2d6   : > { %v2508_v58 = vmax.f32 %v2488_v39, %v2498_v56  ;;  %v2499_v45 = vmul.f32 0.01, %v2489_v43 }
 0x2d7   : > { %v2452_v60 = vpop.f32.mrb[124].mxu0 }
 0x2d8   : > { %v2825_v54 = vpack.c.bf16 %v2508_v58, %v2508_v58  ;;  %v2509_v62 = vmax.f32 %v2489_v43, %v2499_v45  ;;  %v2473_v53 = vadd.f32 %v2452_v60, %v2342_v11  ;;  %v3216_v3 = vpop.f32.mrb[125].mxu0 }
 0x2d9   : > { %v2455_v0 = vpop.f32.mrb[126].mxu0 }
 0x2da   : > { %2558 = vst.msk [vmem:[%s3988_s9 + $0x10] sm:$0xf] %vm945_vm6, %v2825_v54  ;;  %v2826_v57 = vpack.c.bf16 %v2509_v62, %v2509_v62  ;;  %v2490_v37 = vadd.f32 %v3980_v16, %v2473_v53  ;;  %v2474_v36 = vadd.f32 %v2455_v0, %v3971_v13  ;;  %v3217_v55 = vpop.f32.mrb[127].mxu0 }
 0x2dc   : > { %2559 = vst.msk [vmem:[%s3988_s9 + $0x14] sm:$0xf] %vm945_vm6, %v2826_v57  ;;  %v2500_v8 = vmul.f32 0.01, %v2490_v37  ;;  %v2491_v49 = vadd.f32 %v3980_v16, %v2474_v36 }
 0x2de   : > { %v2510_v9 = vmax.f32 %v2490_v37, %v2500_v8  ;;  %v2501_v1 = vmul.f32 0.01, %v2491_v49 }
 0x2df   : > { %v2460_v11 = vpop.f32.mrb[128].mxu0 }
 0x2e0   : > { %v2827_v63 = vpack.c.bf16 %v2510_v9, %v2510_v9  ;;  %v2511_v6 = vmax.f32 %v2491_v49, %v2501_v1  ;;  %v2475_v42 = vadd.f32 %v2460_v11, %v3973_v22  ;;  %v3220_v59 = vpop.f32.mrb[129].mxu0 }
 0x2e1   : > { %v2463_v5 = vpop.f32.mrb[130].mxu0 }
 0x2e2   : > { %2560 = vst.msk [vmem:[%s3988_s9 + $0x18] sm:$0xf] %vm945_vm6, %v2827_v63  ;;  %v2828_v13 = vpack.c.bf16 %v2511_v6, %v2511_v6  ;;  %v2492_v20 = vadd.f32 %v3980_v16, %v2475_v42  ;;  %v2476_v25 = vadd.f32 %v2463_v5, %v3975_v61  ;;  %v3221_v7 = vpop.f32.mrb[131].mxu0 }
 0x2e4   : > { %2561 = vst.msk [vmem:[%s3988_s9 + $0x1c] sm:$0xf] %vm945_vm6, %v2828_v13  ;;  %v2502_v10 = vmul.f32 0.01, %v2492_v20  ;;  %v2493_v19 = vadd.f32 %v3980_v16, %v2476_v25 }
 0x2e6   : > { %v2512_v26 = vmax.f32 %v2492_v20, %v2502_v10  ;;  %v2503_v27 = vmul.f32 0.01, %v2493_v19 }
 0x2e8   : > { %v2829_v28 = vpack.c.bf16 %v2512_v26, %v2512_v26  ;;  %v2513_v22 = vmax.f32 %v2493_v19, %v2503_v27 }
 0x2ea   : > { %2562 = vst.msk [vmem:[%s3988_s9 + $0x20] sm:$0xf] %vm945_vm6, %v2829_v28  ;;  %v2830_v29 = vpack.c.bf16 %v2513_v22, %v2513_v22 }
 0x2ec   : > { %2563 = vst.msk [vmem:[%s3988_s9 + $0x24] sm:$0xf] %vm945_vm6, %v2830_v29 }
 0x2ed PF: > { %s16_s21 = sadd.s32 1, %s3302_s21  }
 0x2ee   : > { %p13_p4 = scmp.ge.s32.totalorder %s16_s21, 4  }
 0x2f0   :  { %15 = sbr.rel (!%p13_p4) target bundleno = 1 (0x1), region = 85 }

// kernel: lrencoder_forward.4
= control target key start
LH: loop header
LB: loop body
LE: loop exit
PB: predicated region body
PF: predicated region fallthrough
CT: control target
= control target key end

     0   :  { %s2554_s21 = smov 0   ;;  %s2903_s0 = inlined_call_operand.vmem [shape: bf16[2,40,128], index: 0, kind: input, shape index: {}]   ;;  %s2904_s1 = inlined_call_operand.vmem [shape: bf16[4,128,64], index: 1, kind: input, shape index: {}]   ;;  %s2905_s2 = inlined_call_operand.vmem [shape: f32[1,64], index: 2, kind: input, shape index: {}]   ;;  %s2906_s3 = inlined_call_operand.vmem [shape: f32[24,1], index: 3, kind: input, shape index: {}]   ;;  %s2907_s4 = inlined_call_operand.vmem [shape: bf16[9,64,64], index: 4, kind: input, shape index: {}]   ;;  %s2908_s5 = inlined_call_operand.vmem [shape: f32[1,64], index: 5, kind: input, shape index: {}]   ;;  %s2909_s6 = inlined_call_operand.vmem [shape: bf16[2,24,64], index: 6, kind: output, shape index: {}]  }
   0x1 LB: > { %s1888_s22 = sadd.s32 4294967295, %s2516_s21   ;;  %p1892_p0 = scmp.ge.s32.totalorder %s2516_s21, 1  ;;  %s2516_s21 = sphi %s2554_s21, %s16_s21  }
   0x2   : > { %p212_p1 = scmp.lt.s32.totalorder %s2516_s21, 3 }
   0x4   : > { %p213_p2 = pnand %p1892_p0, %p212_p1 }
   0x5   : > { %v2423_v0 = vld [vmem:[%s2904_s1 + $0x40] sm:$0xff] (!%p213_p2)   ;;  %p242_p3 = scmp.lt.s32.totalorder (!%p213_p2), %s1888_s22, 1  ;;  %v2425_v2 = vld [vmem:[%s2904_s1 + $0x48] sm:$0xff] (!%p213_p2)   ;;  %v2427_v4 = vld [vmem:[%s2904_s1 + $0x50] sm:$0xff] (!%p213_p2)   ;;  %vm814_vm0 = vcmask (!%p213_p2), 519168   ;;  %v2518_v6 = vmov (!%p213_p2), 0  }
   0x6   : > { %216 = sbr.rel (%p213_p2) target bundleno = 610 (0x262), region = 44  ;;  %v2424_v1 = vld [vmem:[%s2904_s1] sm:$0xff] (!%p213_p2)   ;;  %2222 = vmatprep.subr.bf16.mxu0 (!%p213_p2), %v2423_v0  ;;  %v2426_v3 = vld [vmem:[%s2904_s1 + $0x8] sm:$0xff] (!%p213_p2)   ;;  %v2428_v5 = vld [vmem:[%s2904_s1 + $0x10] sm:$0xff] (!%p213_p2)   ;;  %2421 = vset.pattern.permute.xlu0 (!%p213_p2), %v2518_v6  ;;  %819 = vst.msk [vmem:[#allocation2 + $0x10] sm:$0xf] (!%p213_p2), %vm814_vm0, %v2518_v6 }
   0x7   : > { %2242 = vmatprep.subr.bf16.mxu1 (!%p213_p2), %v2424_v1  ;;  %2223 = vmatpush3.bf16.msra.mxu0 (!%p213_p2), %v2423_v0  ;;  %815 = vst.msk [vmem:[#allocation2] sm:$0xf] (!%p213_p2), %vm814_vm0, %v2518_v6  ;;  %816 = vst.msk [vmem:[#allocation2 + $0x4] sm:$0xf] (!%p213_p2), %vm814_vm0, %v2518_v6  ;;  %v2429_v7 = vld [vmem:[%s2904_s1 + $0x58] sm:$0xff] (!%p213_p2)   ;;  %v2431_v9 = vld [vmem:[%s2904_s1 + $0x60] sm:$0xff] (!%p213_p2)  }
   0x8   : > { %2243 = vmatpush3.bf16.msra.mxu1 (!%p213_p2), %v2424_v1  ;;  %2224 = vmatprep.subr.bf16.mxu0 (!%p213_p2), %v2425_v2  ;;  %817 = vst.msk [vmem:[#allocation2 + $0x8] sm:$0xf] (!%p213_p2), %vm814_vm0, %v2518_v6  ;;  %818 = vst.msk [vmem:[#allocation2 + $0xc] sm:$0xf] (!%p213_p2), %vm814_vm0, %v2518_v6  ;;  %v2430_v8 = vld [vmem:[%s2904_s1 + $0x18] sm:$0xff] (!%p213_p2)   ;;  %v2432_v10 = vld [vmem:[%s2904_s1 + $0x20] sm:$0xff] (!%p213_p2)  }
   0x9   : > { %2244 = vmatprep.subr.bf16.mxu1 (!%p213_p2), %v2426_v3  ;;  %2422 = vset.pattern.permute.xlu1 (!%p213_p2), %v2518_v6  ;;  %v2433_v11 = vld [vmem:[%s2904_s1 + $0x68] sm:$0xff] (!%p213_p2)   ;;  %vm300_vm1 = vsmask.f32 (!%p213_p2), 7424  ;;  %v2435_v21 = vld [vmem:[%s2904_s1 + $0x70] sm:$0xff] (!%p213_p2)   ;;  %v2437_v27 = vld [vmem:[%s2904_s1 + $0x78] sm:$0xff] (!%p213_p2)   ;;  %vm538_vm2 = vcmask (!%p213_p2), 1044480  }
   0xa   : > { %v2434_v15 = vld [vmem:[%s2904_s1 + $0x28] sm:$0xff] (!%p213_p2)   ;;  %v2436_v23 = vld [vmem:[%s2904_s1 + $0x30] sm:$0xff] (!%p213_p2)   ;;  %v2438_v28 = vld [vmem:[%s2904_s1 + $0x38] sm:$0xff] (!%p213_p2)   ;;  %vm664_vm3 = vsmask.f32 (!%p213_p2), 4352  ;;  %vm866_vm4 = vcmask (!%p213_p2), 519171  }
   0xb   : > { %2225 = vmatpush3.bf16.msra.mxu0 (!%p213_p2), %v2425_v2  ;;  %v2442_v31 = vld [vmem:[%s2904_s1 + $0x80] sm:$0xff] (!%p213_p2)   ;;  %v2444_v35 = vld [vmem:[%s2904_s1 + $0x88] sm:$0xff] (!%p213_p2)   ;;  %v2446_v37 = vld [vmem:[%s2904_s1 + $0x90] sm:$0xff] (!%p213_p2)   ;;  %vm867_vm5 = vsmask.f32 (!%p213_p2), 7950  ;;  %vm949_vm11 = vcmask (!%p213_p2), 523264  }
   0xc   : > { %2245 = vmatpush3.bf16.msra.mxu1 (!%p213_p2), %v2426_v3  ;;  %2226 = vmatprep.subr.bf16.mxu0 (!%p213_p2), %v2427_v4  ;;  %v2443_v32 = vld [vmem:[%s2904_s1 + $0xc0] sm:$0xff] (!%p213_p2)   ;;  %v2445_v36 = vld [vmem:[%s2904_s1 + $0xc8] sm:$0xff] (!%p213_p2)   ;;  %v2447_v41 = vld [vmem:[%s2904_s1 + $0xd0] sm:$0xff] (!%p213_p2)   ;;  %vm830_vm7 = vsmask.f32 (!%p213_p2), 3328  ;;  %vm1095_vm12 = vcmask (!%p213_p2), 1046528  }
   0xd   : > { %s2913_s22 = smov (!%p242_p3, %s1888_s22), 1  ;;  %2246 = vmatprep.subr.bf16.mxu1 %v2428_v5  ;;  %v793_v45 = vld [vmem:[%s2906_s3] sm:$0xff]  ;;  %v795_v46 = vld [vmem:[%s2906_s3 + $0x10] sm:$0xff]  ;;  %v794_v51 = vld [vmem:[%s2906_s3 + $0x8] sm:$0xff]  ;;  %vm831_vm8 = vsmask.f32 7440 }
   0xe   : > { %s2410_s15 = smul.u32 20, %s2913_s22  ;;  %798 = vperm.xlu0 %2421, %v793_v45   ;;  %v2448_v52 = vld [vmem:[%s2904_s1 + $0x98] sm:$0xff]   ;;  %808 = vperm.xlu1 %2422, %v795_v46   ;;  %v2450_v62 = vld [vmem:[%s2904_s1 + $0xa0] sm:$0xff]   ;;  %v2452_v2 = vld [vmem:[%s2904_s1 + $0xa8] sm:$0xff]   ;;  %vm1605_vm13 = vsmask.f32 5376 }
   0xf   : > { %2227 = vmatpush3.bf16.msra.mxu0 %v2427_v4  ;;  %v2449_v55 = vld [vmem:[%s2904_s1 + $0xd8] sm:$0xff]   ;;  %v2451_v0 = vld [vmem:[%s2904_s1 + $0xe0] sm:$0xff]   ;;  %v2453_v3 = vld [vmem:[%s2904_s1 + $0xe8] sm:$0xff]   ;;  %vm1507_vm14 = vcmask 1045504   ;;  %s2411_s17 = smul.u32 12, %s2913_s22 }
  0x10   : > { %2247 = vmatpush3.bf16.msra.mxu1 %v2428_v5  ;;  %2228 = vmatprep.subr.bf16.mxu0 %v2429_v7  ;;  %s2603_s24 = scalar_lea.vmem %s2903_s0, %s2410_s15  ;;  %v2454_v4 = vld [vmem:[%s2904_s1 + $0xb0] sm:$0xff]   ;;  %v2456_v6 = vld [vmem:[%s2904_s1 + $0xb8] sm:$0xff]   ;;  %vm2729_vm6 = vmand %vm866_vm4, %vm867_vm5 }
  0x11   : > { %2248 = vmatprep.subr.bf16.mxu1 %v2430_v8  ;;  %v253_v12 = vld [vmem:[%s2603_s24] sm:$0xf]  ;;  %v254_v13 = vld [vmem:[%s2603_s24 + $0x4] sm:$0xf]  ;;  %v255_v14 = vld [vmem:[%s2603_s24 + $0x8] sm:$0xf]  ;;  %s251_s20 = scalar_lea.vmem %s2909_s6, %s2411_s17 }
  0x12   : > { %v272_v16 = vld [vmem:[%s2603_s24 + $0xc] sm:$0x1]  ;;  %v1911_v17 = vcombine.low %v253_v12, %v254_v13  ;;  %v1921_v34 = vcombine.low %v255_v14, %v255_v14  ;;  %v513_v38 = vld [vmem:[%s2603_s24] sm:$0x8]  ;;  %803 = vperm.xlu0 %2421, %v794_v51   ;;  %v2455_v5 = vld [vmem:[%s2904_s1 + $0xf0] sm:$0xff]  }
  0x13   : > { %2229 = vmatpush3.bf16.msra.mxu0 %v2429_v7  ;;  %v1912_v18 = vcombine.low %v255_v14, %v272_v16  ;;  %v514_v39 = vld [vmem:[%s2603_s24 + $0xc] sm:$0x7]  ;;  %v1946_v42 = vcombine.low %v513_v38, %v254_v13  ;;  %v2457_v7 = vld [vmem:[%s2904_s1 + $0xf8] sm:$0xff]   ;;  %vm875_vm9 = vmand %vm814_vm0, %vm830_vm7 }
  0x14   : > { %2249 = vmatpush3.bf16.msra.mxu1 %v2430_v8  ;;  %2230 = vmatprep.subr.bf16.mxu0 %v2431_v9  ;;  %v302_v19 = vshrl.u32 %v1911_v17, 16  ;;  %v304_v20 = vshll.u32 %v1911_v17, 16  ;;  %v643_v40 = vld [vmem:[%s2603_s24 + $0xc] sm:$0xf]  ;;  %v1947_v43 = vcombine.low %v255_v14, %v514_v39  ;;  %v2461_v8 = vld [vmem:[%s2907_s4] sm:$0xff]   ;;  %v2466_v13 = vld [vmem:[%s2907_s4 + $0x18] sm:$0xff]  }
  0x15   : > { %2250 = vmatprep.subr.bf16.mxu1 %v2432_v10  ;;  %2258 = vmatprep.mubr.bf16.mxu1 %v1911_v17  ;;  %v309_v22 = vshll.u32 %v1912_v18, 16  ;;  %v313_v30 = vshrl.u32 %v1912_v18, 16  ;;  %v1972_v44 = vcombine.low %v255_v14, %v643_v40  ;;  %v539_v47 = vrot.slane %v1946_v42, 3  ;;  %v2465_v12 = vld [vmem:[%s2907_s4 + $0x28] sm:$0xff]   ;;  %v2467_v14 = vld [vmem:[%s2907_s4 + $0x30] sm:$0xff]   ;;  %v2471_v16 = vld [vmem:[%s2907_s4 + $0x38] sm:$0xff]  }
  0x16   : > { %v306_v24 = vrot.slane %v304_v20, 1  ;;  %v540_v48 = vrot.slane %v1947_v43, 3  ;;  %v666_v49 = vshrl.u32 %v1946_v42, 16  ;;  %v669_v50 = vshll.u32 %v1946_v42, 16  ;;  %v2723_v17 = vld [vmem:[%s2907_s4 + $0x40] sm:$0xff]   ;;  %vm832_vm10 = vmor %vm830_vm7, %vm831_vm8 }
  0x17   : > { %2231 = vmatpush3.bf16.msra.mxu0 %v2431_v9  ;;  %v311_v25 = vrot.slane %v309_v22, 1  ;;  %v674_v53 = vshrl.u32 %v1972_v44, 16  ;;  %v677_v54 = vshll.u32 %v1972_v44, 16  ;;  %v2462_v9 = vld [vmem:[%s2907_s4 + $0x8] sm:$0xff]  }
  0x18   : > { %2251 = vmatpush3.bf16.msra.mxu1 %v2432_v10  ;;  %2232 = vmatprep.subr.bf16.mxu0 %v2433_v11  ;;  %v307_v26 = vor.u32 %v306_v24, %v302_v19  ;;  %v541_v56 = vsel %vm538_vm2, %v539_v47, %v540_v48  ;;  %v668_v57 = vrot.slane %v666_v49, 3  ;;  %v671_v58 = vrot.slane %v669_v50, 4  ;;  %v2463_v10 = vld [vmem:[%s2907_s4 + $0x20] sm:$0xff]  }
  0x19   : > { %2252 = vmatprep.subr.bf16.mxu1 %v2434_v15  ;;  %v315_v33 = vor.u32 %v313_v30, %v311_v25  ;;  %v676_v59 = vrot.slane %v674_v53, 3  ;;  %v679_v60 = vrot.slane %v677_v54, 4 }
  0x1a   : > { %v312_v29 = vsel %vm300_vm1, %v307_v26, %v311_v25  ;;  %v672_v61 = vor.u32 %v671_v58, %v668_v57 }
  0x1b   : > { %2233 = vmatpush3.bf16.msra.mxu0 %v2433_v11  ;;  %2238 = vmatprep.mubr.bf16.mxu0 %v312_v29  ;;  %v680_v63 = vor.u32 %v679_v60, %v676_v59  ;;  %v2464_v11 = vld [vmem:[%s2907_s4 + $0x10] sm:$0xff]   ;;  %v869_v59 = vld [vmem:[#allocation2] sm:$0x8] }
  0x1c   : > { %2253 = vmatpush3.bf16.msra.mxu1 %v2434_v15  ;;  %2234 = vmatprep.subr.bf16.mxu0 %v2435_v21  ;;  %v2714_v15 = vld [vmem:[%s2907_s4 + $0x60] sm:$0xff]  }
  0x1d   : > { %2254 = vmatprep.subr.bf16.mxu1 %v2436_v23  ;;  %v681_v1 = vsel %vm664_vm3, %v672_v61, %v680_v63 }
  0x1f   : > { %2235 = vmatpush3.bf16.msra.mxu0 %v2435_v21 }
  0x20   : > { %2255 = vmatpush3.bf16.msra.mxu1 %v2436_v23  ;;  %2236 = vmatprep.subr.bf16.mxu0 %v2437_v27 }
  0x21   : > { %2256 = vmatprep.subr.bf16.mxu1 %v2438_v28 }
  0x23   : > { %2237 = vmatpush3.bf16.msra.mxu0 %v2437_v27 }
  0x24   : > { %2257 = vmatpush3.bf16.msra.mxu1 %v2438_v28  ;;  %2262 = vmatprep.subr.bf16.mxu0 %v2442_v31 }
  0x25   : > { %2282 = vmatprep.subr.bf16.mxu1 %v2443_v32 }
  0x26   : > { %2239 = vmatmul.mubr.bf16.vlgmr.msra.gmra.mrb[0].mxu0 %v315_v33 }
  0x27   : > { %2259 = vmatmul.mubr.bf16.vlgmr.msra.gmra.mrb[0].mxu1 %v1921_v34  ;;  %2263 = vmatpush3.bf16.msra.mxu0 %v2442_v31 }
  0x28   : > { %2283 = vmatpush3.bf16.msra.mxu1 %v2443_v32  ;;  %2264 = vmatprep.subr.bf16.mxu0 %v2444_v35 }
  0x29   : > { %2284 = vmatprep.subr.bf16.mxu1 %v2445_v36  ;;  %2278 = vmatprep.mubr.bf16.mxu0 %v541_v56 }
  0x2a   : > { %2298 = vmatprep.mubr.bf16.mxu1 %v681_v1 }
  0x2b   : > { %2265 = vmatpush3.bf16.msra.mxu0 %v2444_v35 }
  0x2c   : > { %2285 = vmatpush3.bf16.msra.mxu1 %v2445_v36  ;;  %2266 = vmatprep.subr.bf16.mxu0 %v2446_v37  ;;  %v1981_v36 = vld [vmem:[%s2905_s2] ss:$0 sm:$0xff] }
  0x2d   : > { %2286 = vmatprep.subr.bf16.mxu1 %v2447_v41 }
  0x2f   : > { %2267 = vmatpush3.bf16.msra.mxu0 %v2446_v37 }
  0x30   : > { %2287 = vmatpush3.bf16.msra.mxu1 %v2447_v41  ;;  %2268 = vmatprep.subr.bf16.mxu0 %v2448_v52 }
  0x31   : > { %2288 = vmatprep.subr.bf16.mxu1 %v2449_v55 }
  0x33   : > { %2269 = vmatpush3.bf16.msra.mxu0 %v2448_v52 }
  0x34   : > { %2289 = vmatpush3.bf16.msra.mxu1 %v2449_v55  ;;  %2270 = vmatprep.subr.bf16.mxu0 %v2450_v62 }
  0x35   : > { %2290 = vmatprep.subr.bf16.mxu1 %v2451_v0 }
  0x37   : > { %2271 = vmatpush3.bf16.msra.mxu0 %v2450_v62 }
  0x38   : > { %2291 = vmatpush3.bf16.msra.mxu1 %v2451_v0  ;;  %2272 = vmatprep.subr.bf16.mxu0 %v2452_v2 }
  0x39   : > { %2292 = vmatprep.subr.bf16.mxu1 %v2453_v3 }
  0x3b   : > { %2273 = vmatpush3.bf16.msra.mxu0 %v2452_v2 }
  0x3c   : > { %2293 = vmatpush3.bf16.msra.mxu1 %v2453_v3  ;;  %2274 = vmatprep.subr.bf16.mxu0 %v2454_v4 }
  0x3d   : > { %2294 = vmatprep.subr.bf16.mxu1 %v2455_v5 }
  0x3f   : > { %2275 = vmatpush3.bf16.msra.mxu0 %v2454_v4 }
  0x40   : > { %2295 = vmatpush3.bf16.msra.mxu1 %v2455_v5  ;;  %2276 = vmatprep.subr.bf16.mxu0 %v2456_v6 }
  0x41   : > { %2296 = vmatprep.subr.bf16.mxu1 %v2457_v7 }
  0x43   : > { %2277 = vmatpush3.bf16.msra.mxu0 %v2456_v6 }
  0x44   : > { %2297 = vmatpush3.bf16.msra.mxu1 %v2457_v7  ;;  %2302 = vmatprep.subr.bf16.mxu0 %v2463_v10 }
  0x45   : > { %2314 = vmatprep.subr.bf16.mxu1 %v2461_v8 }
  0x46   : > { %2279 = vmatmul.mubr.bf16.vlgmr.msra.gmra.mrb[4].mxu0 %v540_v48 }
  0x47   : > { %2299 = vmatmul.mubr.bf16.vlgmr.msra.gmra.mrb[4].mxu1 %v680_v63  ;;  %2303 = vmatpush3.bf16.msra.mxu0 %v2463_v10 }
  0x48   : > { %2315 = vmatpush3.bf16.msra.mxu1 %v2461_v8  ;;  %2304 = vmatprep.subr.bf16.mxu0 %v2465_v12 }
  0x49   : > { %2316 = vmatprep.subr.bf16.mxu1 %v2462_v9 }
  0x4b   : > { %2305 = vmatpush3.bf16.msra.mxu0 %v2465_v12 }
  0x4c   : > { %2317 = vmatpush3.bf16.msra.mxu1 %v2462_v9  ;;  %2306 = vmatprep.subr.bf16.mxu0 %v2467_v14  ;;  %v876_v9 = vld [vmem:[#allocation2 + $0xc] sm:$0xf] }
  0x4d   : > { %2318 = vmatprep.subr.bf16.mxu1 %v2464_v11 }
  0x4f   : > { %2307 = vmatpush3.bf16.msra.mxu0 %v2467_v14 }
  0x50   : > { %2319 = vmatpush3.bf16.msra.mxu1 %v2464_v11  ;;  %2308 = vmatprep.subr.bf16.mxu0 %v2471_v16 }
  0x51   : > { %2320 = vmatprep.subr.bf16.mxu1 %v2466_v13 }
  0x53   : > { %2309 = vmatpush3.bf16.msra.mxu0 %v2471_v16 }
  0x54   : > { %2321 = vmatpush3.bf16.msra.mxu1 %v2466_v13  ;;  %2326 = vmatprep.subr.bf16.mxu0 %v2723_v17 }
  0x55   : > { %2338 = vmatprep.subr.bf16.mxu1 %v2714_v15 }
  0x8d   : > { %v799_v30 = vpop.permute.xlu0 %798  ;;  %v809_v44 = vpop.permute.xlu1 %808 }
  0x91   : > { %v804_v51 = vpop.permute.xlu0 %803 }
  0xf9   : > { %v2240_v18 = vpop.f32.mrb[0].mxu0 }
  0xfa   : > { %v2260_v19 = vpop.f32.mrb[0].mxu1  ;;  %v400_v20 = vpop.f32.mrb[1].mxu0 }
  0xfb   : > { %v508_v21 = vadd.f32 %v2260_v19, %v2240_v18  ;;  %v499_v22 = vpop.f32.mrb[1].mxu1  ;;  %v2241_v23 = vpop.f32.mrb[2].mxu0 }
  0xfc   : > { %v500_v24 = vadd.f32 %v499_v22, %v400_v20  ;;  %v2261_v25 = vpop.f32.mrb[2].mxu1  ;;  %v403_v26 = vpop.f32.mrb[3].mxu0 }
  0xfd   : > { %v502_v27 = vpop.f32.mrb[3].mxu1 }
  0xfe   : > { %v503_v28 = vadd.f32 %v502_v27, %v403_v26 }
 0x119   : > { %v2280_v29 = vpop.f32.mrb[4].mxu0 }
 0x11a   : > { %v642_v31 = vadd.f32 %v2280_v29, %v508_v21  ;;  %v2300_v32 = vpop.f32.mrb[4].mxu1  ;;  %v626_v33 = vpop.f32.mrb[5].mxu0 }
 0x11b   : > { %v640_v34 = vadd.f32 %v626_v33, %v500_v24  ;;  %v766_v35 = vpop.f32.mrb[5].mxu1  ;;  %v2281_v37 = vpop.f32.mrb[6].mxu0 }
 0x11c   : > { %v782_v38 = vadd.f32 %v2300_v32, %v642_v31  ;;  %v2301_v39 = vpop.f32.mrb[6].mxu1  ;;  %v629_v40 = vpop.f32.mrb[7].mxu0 }
 0x11d   : > { %v780_v41 = vadd.f32 %v766_v35, %v640_v34  ;;  %v641_v42 = vadd.f32 %v629_v40, %v503_v28  ;;  %v769_v43 = vpop.f32.mrb[7].mxu1  ;;  %v2472_v28 = vld [vmem:[%s2907_s4 + $0x68] sm:$0xff]  }
 0x11e   : > { %v792_v45 = vadd.f32 %v1981_v36, %v782_v38 }
 0x11f   : > { %v790_v46 = vadd.f32 %v1981_v36, %v780_v41  ;;  %v781_v47 = vadd.f32 %v769_v43, %v641_v42  ;;  %v2478_v42 = vld [vmem:[%s2907_s4 + $0x70] sm:$0xff]  }
 0x120   : > { %v813_v48 = vmul.f32 %v809_v44, %v792_v45 }
 0x121   : > { %v811_v49 = vmul.f32 %v799_v30, %v790_v46  ;;  %v791_v50 = vadd.f32 %v1981_v36, %v781_v47  ;;  %v2479_v47 = vld [vmem:[%s2907_s4 + $0x48] sm:$0xff]  }
 0x122   : > { %v2124_v52 = vpack.c.bf16 %v813_v48, %v813_v48  ;;  %v2480_v48 = vld [vmem:[%s2907_s4 + $0x78] sm:$0xff]  }
 0x123   : > { %v2122_v53 = vpack.c.bf16 %v811_v49, %v811_v49  ;;  %v812_v54 = vmul.f32 %v804_v51, %v791_v50 }
 0x124   : > { %v853_v55 = vshll.u32 %v2124_v52, 16  ;;  %v857_v56 = vshrl.u32 %v2124_v52, 16  ;;  %v2481_v52 = vld [vmem:[%s2907_s4 + $0x50] sm:$0xff]  }
 0x125   : > { %v834_v57 = vshll.u32 %v2122_v53, 16  ;;  %v837_v58 = vshrl.u32 %v2122_v53, 16  ;;  %v2123_v60 = vpack.c.bf16 %v812_v54, %v812_v54  ;;  %v2482_v53 = vld [vmem:[%s2907_s4 + $0xa0] sm:$0xff]  }
 0x126   : > { %v855_v62 = vrot.slane %v853_v55, 5  ;;  %v859_v63 = vrot.slane %v857_v56, 4 }
 0x127   : > { %v836_v0 = vrot.slane %v834_v57, 5  ;;  %v839_v1 = vrot.slane %v837_v58, 4  ;;  %v843_v2 = vshll.u32 %v2123_v60, 16  ;;  %v847_v3 = vshrl.u32 %v2123_v60, 16  ;;  %v2484_v58 = vld [vmem:[%s2907_s4 + $0x58] sm:$0xff]  }
 0x128   : > { %v860_v4 = vor.u32 %v859_v63, %v855_v62  ;;  %v1592_v60 = vld [vmem:[#allocation2 + $0x10] sm:$0x7] }
 0x129   : > { %v840_v5 = vor.u32 %v839_v1, %v836_v0  ;;  %v870_v6 = vsel %vm2729_vm6, %v836_v0, %v869_v59  ;;  %v845_v7 = vrot.slane %v843_v2, 5  ;;  %v849_v8 = vrot.slane %v847_v3, 4  ;;  %v2485_v59 = vld [vmem:[%s2907_s4 + $0xa8] sm:$0xff]   ;;  %v2486_v3 = vld [vmem:[%s2907_s4 + $0x80] sm:$0xff]  }
 0x12a   : > { %871 = vst [vmem:[#allocation2] sm:$0x8] %v870_v6  ;;  %v861_v10 = vrot.slane %v860_v4, 4  ;;  %v2488_v6 = vld [vmem:[%s2907_s4 + $0xb0] sm:$0xff]  }
 0x12b   : > { %v841_v11 = vrot.slane %v840_v5, 4  ;;  %v850_v12 = vor.u32 %v849_v8, %v845_v7 }
 0x12c   : > { %v877_v13 = vsel %vm875_vm9, %v861_v10, %v876_v9 }
 0x12d   : > { %v846_v14 = vsel %vm832_vm10, %v841_v11, %v845_v7  ;;  %v851_v16 = vrot.slane %v850_v12, 4  ;;  %878 = vst [vmem:[#allocation2 + $0xc] sm:$0xf] %v877_v13  ;;  %v2489_v12 = vld [vmem:[%s2907_s4 + $0x88] sm:$0xff]   ;;  %v2490_v13 = vld [vmem:[%s2907_s4 + $0xb8] sm:$0xff]  }
 0x12e   : > { %872 = vst.msk [vmem:[#allocation2 + $0x4] sm:$0xf] %vm814_vm0, %v846_v14 }
 0x12f   : > { %v856_v18 = vsel %vm832_vm10, %v851_v16, %v855_v62 }
 0x130   : > { %873 = vst.msk [vmem:[#allocation2 + $0x8] sm:$0xf] %vm814_vm0, %v856_v18 }
 0x131   : > { %v879_v19 = vld [vmem:[#allocation2] sm:$0xf] }
 0x132   : > { %v1180_v21 = vld [vmem:[#allocation2] sm:$0x8] }
 0x133   : > { %v1082_v35 = vld [vmem:[#allocation2] sm:$0xe] }
 0x134   : > { %v1181_v25 = vld [vmem:[#allocation2 + $0xc] sm:$0x7] }
 0x135   : > { %v2741_v20 = vld [vmem:[#allocation2 + $0x4] sm:$0xf]  ;;  %v890_v26 = vld [vmem:[#allocation2 + $0xc] sm:$0x1] }
 0x136   : > { %v1993_v22 = vcombine.low %v879_v19, %v2741_v20  ;;  %v2745_v23 = vcombine.low %v1180_v21, %v2741_v20  ;;  %v2016_v38 = vcombine.low %v1082_v35, %v2741_v20  ;;  %v2779_v49 = vld [vmem:[#allocation2 + $0xc] sm:$0xf]  ;;  %v1484_v0 = vld [vmem:[#allocation2 + $0x4] sm:$0xc]  ;;  %v2491_v21 = vld [vmem:[%s2907_s4 + $0x90] sm:$0xff]  }
 0x137   : > { %v2747_v24 = vld [vmem:[#allocation2 + $0x8] sm:$0xf]  ;;  %v2804_v1 = vld [vmem:[#allocation2 + $0xc] sm:$0xf] }
 0x138   : > { %2322 = vmatprep.mubr.msk.bf16.mxu1 %vm949_vm11, %v1993_v22  ;;  %v2001_v27 = vcombine.low %v2747_v24, %v2747_v24  ;;  %v2032_v29 = vcombine.low %v2747_v24, %v1181_v25  ;;  %v2757_v30 = vcombine.low %v2747_v24, %v890_v26  ;;  %v913_v31 = vshll.u32 %v1993_v22, 16  ;;  %v2794_v57 = vld [vmem:[#allocation2 + $0x8] sm:$0xf] }
 0x139   : > { %v1197_v32 = vrot.slane %v2745_v23, 3  ;;  %v911_v36 = vshrl.u32 %v1993_v22, 16  ;;  %v1096_v46 = vrot.slane %v2016_v38, 1  ;;  %v2047_v51 = vcombine.low %v2747_v24, %v2779_v49  ;;  %v2493_v22 = vld [vmem:[%s2907_s4 + $0xe0] sm:$0xff]   ;;  %v2502_v38 = vld [vmem:[%s2907_s4 + $0xf8] sm:$0xff]  }
 0x13a   : > { %2323 = vmatmul.mubr.msk.bf16.vlgmr.msra.gmra.mrb[8].mxu1 %vm949_vm11, %v2001_v27  ;;  %v1198_v33 = vrot.slane %v2032_v29, 3  ;;  %v918_v34 = vshll.u32 %v2757_v30, 16  ;;  %v915_v37 = vrot.slane %v913_v31, 1  ;;  %v922_v41 = vshrl.u32 %v2757_v30, 16  ;;  %v2497_v29 = vld [vmem:[%s2907_s4 + $0xe8] sm:$0xff]  }
 0x13b   : > { %2339 = vmatpush3.bf16.msra.mxu1 %v2714_v15  ;;  %v1097_v44 = vrot.slane %v2757_v30, 1  ;;  %v1303_v54 = vshrl.u32 %v2047_v51, 16  ;;  %v1306_v55 = vshll.u32 %v2047_v51, 16  ;;  %v1298_v56 = vshll.u32 %v2745_v23, 16  ;;  %v1487_v30 = vld [vmem:[#allocation2 + $0x10] sm:$0x3] }
 0x13c   : > { %2340 = vmatprep.subr.bf16.mxu1 %v2472_v28  ;;  %v1199_v39 = vsel %vm538_vm2, %v1197_v32, %v1198_v33  ;;  %v920_v40 = vrot.slane %v918_v34, 1  ;;  %v916_v43 = vor.u32 %v915_v37, %v911_v36  ;;  %v2062_v61 = vcombine.low %v2741_v20, %v2747_v24  ;;  %v2498_v32 = vld [vmem:[%s2907_s4 + $0xc0] sm:$0xff]   ;;  %v2500_v34 = vld [vmem:[%s2907_s4 + $0xf0] sm:$0xff]   ;;  %v2501_v37 = vld [vmem:[%s2907_s4 + $0xc8] sm:$0xff]  }
 0x13d   : > { %2346 = vmatprep.mubr.msk.bf16.mxu1 %vm949_vm11, %v1199_v39  ;;  %v1098_v50 = vsel %vm1095_vm12, %v1096_v46, %v1097_v44  ;;  %v1305_v62 = vrot.slane %v1303_v54, 3  ;;  %v1308_v63 = vrot.slane %v1306_v55, 4  ;;  %v2808_v2 = vcombine.low %v1484_v0, %v2794_v57  ;;  %v2507_v46 = vld [vmem:[%s2907_s4 + $0x108] sm:$0xff]  }
 0x13e   : > { %v924_v15 = vor.u32 %v922_v41, %v920_v40  ;;  %v921_v45 = vsel %vm300_vm1, %v916_v43, %v920_v40  ;;  %v1300_v5 = vrot.slane %v1298_v56, 4  ;;  %v2818_v7 = vcombine.low %v2804_v1, %v1592_v60  ;;  %v2503_v40 = vld [vmem:[%s2907_s4 + $0xd0] sm:$0xff]   ;;  %v2504_v41 = vld [vmem:[%s2907_s4 + $0xd8] sm:$0xff]  }
 0x13f   : > { %2341 = vmatpush3.bf16.msra.mxu1 %v2472_v28  ;;  %2310 = vmatprep.mubr.msk.bf16.mxu0 %vm949_vm11, %v921_v45  ;;  %v1309_v8 = vor.u32 %v1308_v63, %v1305_v62  ;;  %v1607_v9 = vshrl.u32 %v2808_v2, 16  ;;  %v1610_v10 = vshll.u32 %v2808_v2, 16  ;;  %v2063_v26 = vcombine.low %v2779_v49, %v2779_v49  ;;  %v2496_v28 = vld [vmem:[%s2907_s4 + $0x98] sm:$0xff]  }
 0x140   : > { %2342 = vmatprep.subr.bf16.mxu1 %v2478_v42  ;;  %2311 = vmatmul.mubr.msk.bf16.vlgmr.msra.gmra.mrb[8].mxu0 %vm949_vm11, %v924_v15  ;;  %v1615_v14 = vshrl.u32 %v2818_v7, 16  ;;  %v1618_v16 = vshll.u32 %v2818_v7, 16  ;;  %v1508_v35 = vrot.slane %v2808_v2, 2  ;;  %v1718_v45 = vrot.slane %v2818_v7, 3  ;;  %v2509_v49 = vld [vmem:[%s2907_s4 + $0x118] sm:$0xff]  }
 0x141   : > { %2327 = vmatpush3.bf16.msra.mxu0 %v2723_v17  ;;  %2334 = vmatprep.mubr.msk.bf16.mxu0 %vm949_vm11, %v1098_v50  ;;  %v1295_v17 = vshrl.u32 %v2745_v23, 16  ;;  %v1609_v19 = vrot.slane %v1607_v9, 2  ;;  %v1612_v20 = vrot.slane %v1610_v10, 3 }
 0x142   : > { %2328 = vmatprep.subr.bf16.mxu0 %v2479_v47  ;;  %v1617_v23 = vrot.slane %v1615_v14, 2  ;;  %v1620_v24 = vrot.slane %v1618_v16, 3 }
 0x143   : > { %2343 = vmatpush3.bf16.msra.mxu1 %v2478_v42  ;;  %v1297_v4 = vrot.slane %v1295_v17, 3  ;;  %v1613_v25 = vor.u32 %v1612_v20, %v1609_v19  ;;  %v1704_v42 = vld [vmem:[#allocation2 + $0x4] sm:$0x8] }
 0x144   : > { %2344 = vmatprep.subr.bf16.mxu1 %v2480_v48  ;;  %v1621_v27 = vor.u32 %v1620_v24, %v1617_v23  ;;  %v2109_v43 = vcombine.low %v1704_v42, %v2794_v57 }
 0x145   : > { %2329 = vmatpush3.bf16.msra.mxu0 %v2479_v47  ;;  %v1301_v11 = vor.u32 %v1300_v5, %v1297_v4 }
 0x146   : > { %2330 = vmatprep.subr.bf16.mxu0 %v2481_v52  ;;  %v1622_v31 = vsel %vm1605_vm13, %v1613_v25, %v1621_v27  ;;  %v1717_v15 = vrot.slane %v2109_v43, 3 }
 0x147   : > { %2345 = vmatpush3.bf16.msra.mxu1 %v2480_v48  ;;  %v1310_v18 = vsel %vm664_vm3, %v1301_v11, %v1309_v8  ;;  %v2508_v48 = vld [vmem:[%s2907_s4 + $0x110] sm:$0xff]  }
 0x148   : > { %2362 = vmatprep.subr.bf16.mxu1 %v2482_v53  ;;  %v1719_v47 = vsel %vm538_vm2, %v1717_v15, %v1718_v45 }
 0x149   : > { %2331 = vmatpush3.bf16.msra.mxu0 %v2481_v52 }
 0x14a   : > { %2347 = vmatmul.mubr.msk.bf16.vlgmr.msra.gmra.mrb[12].mxu1 %vm949_vm11, %v1198_v33  ;;  %2332 = vmatprep.subr.bf16.mxu0 %v2484_v58  ;;  %v2079_v33 = vcombine.low %v2804_v1, %v1487_v30 }
 0x14b   : > { %2363 = vmatpush3.bf16.msra.mxu1 %v2482_v53  ;;  %2370 = vmatprep.mubr.msk.bf16.mxu1 %vm949_vm11, %v2062_v61 }
 0x14c   : > { %2364 = vmatprep.subr.bf16.mxu1 %v2485_v59  ;;  %v1509_v36 = vrot.slane %v2079_v33, 2 }
 0x14d   : > { %2333 = vmatpush3.bf16.msra.mxu0 %v2484_v58 }
 0x14e   : > { %2350 = vmatprep.subr.bf16.mxu0 %v2486_v3  ;;  %v1510_v39 = vsel %vm1507_vm14, %v1508_v35, %v1509_v36 }
 0x14f   : > { %2365 = vmatpush3.bf16.msra.mxu1 %v2485_v59 }
 0x150   : > { %2366 = vmatprep.subr.bf16.mxu1 %v2488_v6  ;;  %2335 = vmatmul.mubr.msk.bf16.vlgmr.msra.gmra.mrb[12].mxu0 %vm949_vm11, %v1097_v44  ;;  %v2505_v44 = vld [vmem:[%s2907_s4 + $0x100] sm:$0xff]  }
 0x151   : > { %2351 = vmatpush3.bf16.msra.mxu0 %v2486_v3  ;;  %2358 = vmatprep.mubr.msk.bf16.mxu0 %vm949_vm11, %v1310_v18 }
 0x152   : > { %2352 = vmatprep.subr.bf16.mxu0 %v2489_v12 }
 0x153   : > { %2367 = vmatpush3.bf16.msra.mxu1 %v2488_v6 }
 0x154   : > { %2368 = vmatprep.subr.bf16.mxu1 %v2490_v13 }
 0x155   : > { %2353 = vmatpush3.bf16.msra.mxu0 %v2489_v12 }
 0x156   : > { %2354 = vmatprep.subr.bf16.mxu0 %v2491_v21 }
 0x157   : > { %2369 = vmatpush3.bf16.msra.mxu1 %v2490_v13 }
 0x158   : > { %2386 = vmatprep.subr.bf16.mxu1 %v2493_v22 }
 0x159   : > { %2355 = vmatpush3.bf16.msra.mxu0 %v2491_v21 }
 0x15a   : > { %2371 = vmatmul.mubr.msk.bf16.vlgmr.msra.gmra.mrb[16].mxu1 %vm949_vm11, %v2063_v26  ;;  %2356 = vmatprep.subr.bf16.mxu0 %v2496_v28 }
 0x15b   : > { %2387 = vmatpush3.bf16.msra.mxu1 %v2493_v22  ;;  %2394 = vmatprep.mubr.msk.bf16.mxu1 %vm949_vm11, %v1622_v31 }
 0x15c   : > { %2388 = vmatprep.subr.bf16.mxu1 %v2497_v29 }
 0x15d   : > { %2357 = vmatpush3.bf16.msra.mxu0 %v2496_v28 }
 0x15e   : > { %2374 = vmatprep.subr.bf16.mxu0 %v2498_v32 }
 0x15f   : > { %2389 = vmatpush3.bf16.msra.mxu1 %v2497_v29 }
 0x160   : > { %2390 = vmatprep.subr.bf16.mxu1 %v2500_v34  ;;  %2359 = vmatmul.mubr.msk.bf16.vlgmr.msra.gmra.mrb[16].mxu0 %vm949_vm11, %v1309_v8 }
 0x161   : > { %2375 = vmatpush3.bf16.msra.mxu0 %v2498_v32  ;;  %2382 = vmatprep.mubr.msk.bf16.mxu0 %vm949_vm11, %v1510_v39 }
 0x162   : > { %2376 = vmatprep.subr.bf16.mxu0 %v2501_v37 }
 0x163   : > { %2391 = vmatpush3.bf16.msra.mxu1 %v2500_v34 }
 0x164   : > { %2392 = vmatprep.subr.bf16.mxu1 %v2502_v38 }
 0x165   : > { %2377 = vmatpush3.bf16.msra.mxu0 %v2501_v37 }
 0x166   : > { %2378 = vmatprep.subr.bf16.mxu0 %v2503_v40 }
 0x167   : > { %2393 = vmatpush3.bf16.msra.mxu1 %v2502_v38 }
 0x169   : > { %2379 = vmatpush3.bf16.msra.mxu0 %v2503_v40 }
 0x16a   : > { %2395 = vmatmul.mubr.msk.bf16.vlgmr.msra.gmra.mrb[20].mxu1 %vm949_vm11, %v1621_v27  ;;  %2380 = vmatprep.subr.bf16.mxu0 %v2504_v41 }
 0x16d   : > { %2381 = vmatpush3.bf16.msra.mxu0 %v2504_v41  ;;  %v2116_v41 = vld [vmem:[%s2908_s5] ss:$0 sm:$0xff] }
 0x16e   : > { %2398 = vmatprep.subr.bf16.mxu0 %v2505_v44 }
 0x170   : > { %2383 = vmatmul.mubr.msk.bf16.vlgmr.msra.gmra.mrb[20].mxu0 %vm949_vm11, %v1509_v36 }
 0x171   : > { %2399 = vmatpush3.bf16.msra.mxu0 %v2505_v44  ;;  %2406 = vmatprep.mubr.msk.bf16.mxu0 %vm949_vm11, %v1719_v47 }
 0x172   : > { %2400 = vmatprep.subr.bf16.mxu0 %v2507_v46 }
 0x175   : > { %2401 = vmatpush3.bf16.msra.mxu0 %v2507_v46 }
 0x176   : > { %2402 = vmatprep.subr.bf16.mxu0 %v2508_v48 }
 0x179   : > { %2403 = vmatpush3.bf16.msra.mxu0 %v2508_v48 }
 0x17a   : > { %2404 = vmatprep.subr.bf16.mxu0 %v2509_v49 }
 0x17d   : > { %2405 = vmatpush3.bf16.msra.mxu0 %v2509_v49 }
 0x180   : > { %2407 = vmatmul.mubr.msk.bf16.vlgmr.msra.gmra.mrb[24].mxu0 %vm949_vm11, %v1718_v45 }
 0x20d   : > { %v2324_v50 = vpop.f32.mrb[8].mxu1 }
 0x20e   : > { %v1068_v51 = vpop.f32.mrb[9].mxu1 }
 0x20f   : > { %v2325_v52 = vpop.f32.mrb[10].mxu1 }
 0x210   : > { %v1071_v53 = vpop.f32.mrb[11].mxu1 }
 0x213   : > { %v2312_v54 = vpop.f32.mrb[8].mxu0 }
 0x214   : > { %v1077_v55 = vadd.f32 %v2324_v50, %v2312_v54  ;;  %v990_v17 = vpop.f32.mrb[9].mxu0 }
 0x215   : > { %v1069_v56 = vadd.f32 %v1068_v51, %v990_v17  ;;  %v2313_v57 = vpop.f32.mrb[10].mxu0 }
 0x216   : > { %v993_v58 = vpop.f32.mrb[11].mxu0 }
 0x217   : > { %v1072_v59 = vadd.f32 %v1071_v53, %v993_v58 }
 0x21d   : > { %v2348_v60 = vpop.f32.mrb[12].mxu1 }
 0x21e   : > { %v1264_v61 = vpop.f32.mrb[13].mxu1 }
 0x21f   : > { %v2349_v62 = vpop.f32.mrb[14].mxu1 }
 0x220   : > { %v1267_v63 = vpop.f32.mrb[15].mxu1 }
 0x223   : > { %v2336_v0 = vpop.f32.mrb[12].mxu0 }
 0x224   : > { %v1179_v1 = vadd.f32 %v2336_v0, %v1077_v55  ;;  %v1163_v2 = vpop.f32.mrb[13].mxu0 }
 0x225   : > { %v1177_v3 = vadd.f32 %v1163_v2, %v1069_v56  ;;  %v2337_v4 = vpop.f32.mrb[14].mxu0 }
 0x226   : > { %v1166_v5 = vpop.f32.mrb[15].mxu0  ;;  %v1280_v6 = vadd.f32 %v2348_v60, %v1179_v1 }
 0x227   : > { %v1178_v7 = vadd.f32 %v1166_v5, %v1072_v59  ;;  %v1278_v8 = vadd.f32 %v1264_v61, %v1177_v3 }
 0x229   : > { %v1279_v9 = vadd.f32 %v1267_v63, %v1178_v7 }
 0x22d   : > { %v2372_v10 = vpop.f32.mrb[16].mxu1 }
 0x22e   : > { %v1467_v11 = vpop.f32.mrb[17].mxu1 }
 0x22f   : > { %v2373_v12 = vpop.f32.mrb[18].mxu1 }
 0x230   : > { %v1470_v13 = vpop.f32.mrb[19].mxu1 }
 0x233   : > { %v2360_v14 = vpop.f32.mrb[16].mxu0 }
 0x234   : > { %v1391_v16 = vadd.f32 %v2360_v14, %v1280_v6  ;;  %v1375_v18 = vpop.f32.mrb[17].mxu0 }
 0x235   : > { %v1389_v19 = vadd.f32 %v1375_v18, %v1278_v8  ;;  %v2361_v20 = vpop.f32.mrb[18].mxu0 }
 0x236   : > { %v1378_v21 = vpop.f32.mrb[19].mxu0  ;;  %v1483_v22 = vadd.f32 %v2372_v10, %v1391_v16 }
 0x237   : > { %v1390_v23 = vadd.f32 %v1378_v21, %v1279_v9  ;;  %v1481_v24 = vadd.f32 %v1467_v11, %v1389_v19 }
 0x239   : > { %v1482_v25 = vadd.f32 %v1470_v13, %v1390_v23 }
 0x23d   : > { %v2396_v26 = vpop.f32.mrb[20].mxu1 }
 0x23e   : > { %v1687_v27 = vpop.f32.mrb[21].mxu1 }
 0x23f   : > { %v2397_v28 = vpop.f32.mrb[22].mxu1 }
 0x240   : > { %v1690_v29 = vpop.f32.mrb[23].mxu1 }
 0x243   : > { %v2384_v30 = vpop.f32.mrb[20].mxu0 }
 0x244   : > { %v1591_v31 = vadd.f32 %v2384_v30, %v1483_v22  ;;  %v1575_v32 = vpop.f32.mrb[21].mxu0 }
 0x245   : > { %v1589_v33 = vadd.f32 %v1575_v32, %v1481_v24  ;;  %v2385_v34 = vpop.f32.mrb[22].mxu0 }
 0x246   : > { %v1578_v35 = vpop.f32.mrb[23].mxu0  ;;  %v1703_v36 = vadd.f32 %v2396_v26, %v1591_v31 }
 0x247   : > { %v1590_v37 = vadd.f32 %v1578_v35, %v1482_v25  ;;  %v1701_v38 = vadd.f32 %v1687_v27, %v1589_v33 }
 0x249   : > { %v1702_v39 = vadd.f32 %v1690_v29, %v1590_v37 }
 0x253   : > { %v2408_v40 = vpop.f32.mrb[24].mxu0 }
 0x254   : > { %v1800_v42 = vadd.f32 %v2408_v40, %v1703_v36  ;;  %v1784_v43 = vpop.f32.mrb[25].mxu0 }
 0x255   : > { %v1798_v44 = vadd.f32 %v1784_v43, %v1701_v38  ;;  %v2409_v15 = vpop.f32.mrb[26].mxu0 }
 0x256   : > { %v1810_v45 = vadd.f32 %v2116_v41, %v1800_v42  ;;  %v1787_v46 = vpop.f32.mrb[27].mxu0 }
 0x257   : > { %v1808_v47 = vadd.f32 %v2116_v41, %v1798_v44  ;;  %v1799_v48 = vadd.f32 %v1787_v46, %v1702_v39 }
 0x258   : > { %v1813_v49 = vmul.f32 0.01, %v1810_v45 }
 0x259   : > { %v1811_v50 = vmul.f32 0.01, %v1808_v47  ;;  %v1809_v51 = vadd.f32 %v2116_v41, %v1799_v48 }
 0x25a   : > { %v1816_v52 = vmax.f32 %v1810_v45, %v1813_v49 }
 0x25b   : > { %v1814_v53 = vmax.f32 %v1808_v47, %v1811_v50  ;;  %v1812_v54 = vmul.f32 0.01, %v1809_v51 }
 0x25c   : > { %v2127_v55 = vpack.c.bf16 %v1816_v52, %v1816_v52 }
 0x25d   : > { %v2125_v17 = vpack.c.bf16 %v1814_v53, %v1814_v53  ;;  %v1815_v56 = vmax.f32 %v1809_v51, %v1812_v54 }
 0x25e   : > { %1832 = vst.msk [vmem:[%s251_s20 + $0x8] sm:$0xf] %vm814_vm0, %v2127_v55 }
 0x25f   : > { %1830 = vst.msk [vmem:[%s251_s20] sm:$0xf] %vm814_vm0, %v2125_v17  ;;  %v2126_v57 = vpack.c.bf16 %v1815_v56, %v1815_v56 }
 0x261   : > { %1831 = vst.msk [vmem:[%s251_s20 + $0x4] sm:$0xf] %vm814_vm0, %v2126_v57 }
 0x262 PF: > { %s16_s21 = sadd.s32 1, %s2516_s21  }
 0x263   : > { %p13_p4 = scmp.ge.s32.totalorder %s16_s21, 4  }
 0x265   :  { %15 = sbr.rel (!%p13_p4) target bundleno = 1 (0x1), region = 85 }

// kernel: lrencoder_forward.5
= control target key start
LH: loop header
LB: loop body
LE: loop exit
PB: predicated region body
PF: predicated region fallthrough
CT: control target
= control target key end

     0   :  { %s3079_s21 = smov 0   ;;  %s3630_s0 = inlined_call_operand.vmem [shape: bf16[2,16,256], index: 0, kind: input, shape index: {}]   ;;  %s3631_s1 = inlined_call_operand.vmem [shape: bf16[4,256,128], index: 1, kind: input, shape index: {}]   ;;  %s3632_s2 = inlined_call_operand.vmem [shape: f32[1,128], index: 2, kind: input, shape index: {}]   ;;  %s3633_s3 = inlined_call_operand.vmem [shape: f32[8,1], index: 3, kind: input, shape index: {}]   ;;  %s3634_s4 = inlined_call_operand.vmem [shape: bf16[9,128,128], index: 4, kind: input, shape index: {}]   ;;  %s3635_s5 = inlined_call_operand.vmem [shape: f32[1,128], index: 5, kind: input, shape index: {}]   ;;  %s3636_s6 = inlined_call_operand.vmem [shape: f32[2,8,128], index: 6, kind: output, shape index: {}]  }
   0x1 LB: > { %s2131_s22 = sadd.s32 4294967295, %s3039_s21   ;;  %p2135_p0 = scmp.ge.s32.totalorder %s3039_s21, 1  ;;  %s3039_s21 = sphi %s3079_s21, %s16_s21  }
   0x2   : > { %p212_p1 = scmp.lt.s32.totalorder %s3039_s21, 3 }
   0x4   : > { %p213_p2 = pnand %p2135_p0, %p212_p1 }
   0x5   : > { %v2882_v0 = vld [vmem:[%s3631_s1 + $0xc0] sm:$0xff] (!%p213_p2)   ;;  %v3041_v3 = vmov (!%p213_p2), 0   ;;  %v2886_v5 = vld [vmem:[%s3631_s1 + $0xc8] sm:$0xff] (!%p213_p2)   ;;  %v2890_v9 = vld [vmem:[%s3631_s1 + $0xd0] sm:$0xff] (!%p213_p2)   ;;  %p241_p3 = scmp.lt.s32.totalorder (!%p213_p2), %s2131_s22, 1  ;;  %vm3043_vm0 = vmmov (!%p213_p2), 0  }
   0x6   : > { %216 = sbr.rel (%p213_p2) target bundleno = 670 (0x29e), region = 44  ;;  %v2883_v1 = vld [vmem:[%s3631_s1 + $0x40] sm:$0xff] (!%p213_p2)   ;;  %2521 = vmatprep.subr.bf16.mxu0 (!%p213_p2), %v2882_v0  ;;  %2881 = vset.pattern.permute.xlu0 (!%p213_p2), %v3041_v3  ;;  %1015 = vst [vmem:[#allocation2] sm:$0xf] (!%p213_p2), %v3041_v3  ;;  %1016 = vst [vmem:[#allocation2 + $0x4] sm:$0xf] (!%p213_p2), %v3041_v3 }
   0x7   : > { %v2884_v2 = vld [vmem:[%s3631_s1 + $0x80] sm:$0xff] (!%p213_p2)   ;;  %1017 = vst [vmem:[#allocation2 + $0x8] sm:$0xf] (!%p213_p2), %v3041_v3  ;;  %2543 = vmatprep.subr.bf16.mxu1 (!%p213_p2), %v2883_v1  ;;  %v2887_v6 = vld [vmem:[%s3631_s1 + $0x48] sm:$0xff] (!%p213_p2)   ;;  %v2891_v10 = vld [vmem:[%s3631_s1 + $0x50] sm:$0xff] (!%p213_p2)   ;;  %vm1033_vm1 = vcmask (!%p213_p2), 1043458  }
   0x8   : > { %v2885_v4 = vld [vmem:[%s3631_s1] sm:$0xff] (!%p213_p2)   ;;  %2522 = vmatpush3.bf16.msra.mxu0 (!%p213_p2), %v2884_v2  ;;  %v2888_v7 = vld [vmem:[%s3631_s1 + $0x88] sm:$0xff] (!%p213_p2)   ;;  %v2892_v11 = vld [vmem:[%s3631_s1 + $0x90] sm:$0xff] (!%p213_p2)   ;;  %vm1034_vm2 = vsmask.f32 (!%p213_p2), 7946  ;;  %vm1039_vm3 = vcmask (!%p213_p2), 1042432  }
   0x9   : > { %2544 = vmatpush3.bf16.msra.mxu1 (!%p213_p2), %v2885_v4  ;;  %2523 = vmatprep.subr.bf16.mxu0 (!%p213_p2), %v2886_v5  ;;  %v2889_v8 = vld [vmem:[%s3631_s1 + $0x8] sm:$0xff] (!%p213_p2)   ;;  %v2893_v12 = vld [vmem:[%s3631_s1 + $0x10] sm:$0xff] (!%p213_p2)   ;;  %v2894_v13 = vld [vmem:[%s3631_s1 + $0xd8] sm:$0xff] (!%p213_p2)   ;;  %vm1040_vm4 = vsmask.f32 (!%p213_p2), 2304 }
   0xa   : > { %2545 = vmatprep.subr.bf16.mxu1 (!%p213_p2), %v2887_v6  ;;  %v2895_v14 = vld [vmem:[%s3631_s1 + $0x58] sm:$0xff] (!%p213_p2)   ;;  %v2898_v17 = vld [vmem:[%s3631_s1 + $0xe0] sm:$0xff] (!%p213_p2)   ;;  %v2902_v21 = vld [vmem:[%s3631_s1 + $0xe8] sm:$0xff] (!%p213_p2)  }
   0xb   : > { %v2896_v15 = vld [vmem:[%s3631_s1 + $0x98] sm:$0xff] (!%p213_p2)   ;;  %v2899_v18 = vld [vmem:[%s3631_s1 + $0x60] sm:$0xff] (!%p213_p2)   ;;  %v2903_v22 = vld [vmem:[%s3631_s1 + $0x68] sm:$0xff] (!%p213_p2)  }
   0xc   : > { %2524 = vmatpush3.bf16.msra.mxu0 (!%p213_p2), %v2888_v7  ;;  %v2897_v16 = vld [vmem:[%s3631_s1 + $0x18] sm:$0xff] (!%p213_p2)   ;;  %v2900_v19 = vld [vmem:[%s3631_s1 + $0xa0] sm:$0xff] (!%p213_p2)   ;;  %v2904_v23 = vld [vmem:[%s3631_s1 + $0xa8] sm:$0xff] (!%p213_p2)  }
   0xd   : > { %2546 = vmatpush3.bf16.msra.mxu1 %v2889_v8  ;;  %2525 = vmatprep.subr.bf16.mxu0 %v2890_v9  ;;  %v2901_v20 = vld [vmem:[%s3631_s1 + $0x20] sm:$0xff]   ;;  %s3638_s22 = smov (!%p241_p3, %s2131_s22), 1  ;;  %v2905_v24 = vld [vmem:[%s3631_s1 + $0x28] sm:$0xff]   ;;  %v2906_v25 = vld [vmem:[%s3631_s1 + $0xf0] sm:$0xff]  }
   0xe   : > { %2547 = vmatprep.subr.bf16.mxu1 %v2891_v10  ;;  %v2907_v26 = vld [vmem:[%s3631_s1 + $0x70] sm:$0xff]   ;;  %s2519_s9 = sshll.u32 %s3638_s22, 4  ;;  %v2910_v29 = vld [vmem:[%s3631_s1 + $0xf8] sm:$0xff]   ;;  %v2918_v39 = vld [vmem:[%s3631_s1 + $0x140] sm:$0xff]   ;;  %s2138_s20 = sshll.u32 %s3638_s22, 3 }
   0xf   : > { %v2908_v27 = vld [vmem:[%s3631_s1 + $0xb0] sm:$0xff]   ;;  %v2911_v30 = vld [vmem:[%s3631_s1 + $0x78] sm:$0xff]   ;;  %s3187_s18 = scalar_lea.vmem %s3630_s0, %s2519_s9  ;;  %v2919_v40 = vld [vmem:[%s3631_s1 + $0x1c0] sm:$0xff]   ;;  %s249_s25 = scalar_lea.vmem %s3636_s6, %s2138_s20 }
  0x10   : > { %2526 = vmatpush3.bf16.msra.mxu0 %v2892_v11  ;;  %v2909_v28 = vld [vmem:[%s3631_s1 + $0x30] sm:$0xff]   ;;  %v2912_v31 = vld [vmem:[%s3631_s1 + $0xb8] sm:$0xff]   ;;  %v284_v33 = vld [vmem:[%s3187_s18] sm:$0xff] }
  0x11   : > { %2548 = vmatpush3.bf16.msra.mxu1 %v2893_v12  ;;  %2527 = vmatprep.subr.bf16.mxu0 %v2894_v13  ;;  %v2913_v32 = vld [vmem:[%s3631_s1 + $0x38] sm:$0xff]   ;;  %v285_v34 = vld [vmem:[%s3187_s18 + $0x8] sm:$0x11]  ;;  %v2189_v37 = vcombine.low %v284_v33, %v284_v33  ;;  %v2190_v38 = vcombine.high %v284_v33, %v284_v33  ;;  %v2920_v47 = vld [vmem:[%s3631_s1 + $0x100] sm:$0xff]  }
  0x12   : > { %2549 = vmatprep.subr.bf16.mxu1 %v2895_v14  ;;  %v2171_v35 = vcombine.low %v284_v33, %v285_v34  ;;  %v2172_v36 = vcombine.high %v284_v33, %v285_v34  ;;  %v2921_v48 = vld [vmem:[%s3631_s1 + $0x180] sm:$0xff]   ;;  %v2923_v51 = vld [vmem:[%s3631_s1 + $0x1c8] sm:$0xff]   ;;  %v2927_v55 = vld [vmem:[%s3631_s1 + $0x1d0] sm:$0xff]  }
  0x13   : > { %614 = vmatprep.mubr.bf16.mxu1 %v2190_v38  ;;  %v2922_v52 = vld [vmem:[%s3631_s1 + $0x148] sm:$0xff]   ;;  %v2926_v56 = vld [vmem:[%s3631_s1 + $0x150] sm:$0xff]   ;;  %v2931_v59 = vld [vmem:[%s3631_s1 + $0x1d8] sm:$0xff]  }
  0x14   : > { %2528 = vmatpush3.bf16.msra.mxu0 %v2896_v15  ;;  %v335_v41 = vshrl.u32 %v2172_v36, 16  ;;  %v337_v42 = vshll.u32 %v2172_v36, 16  ;;  %v328_v43 = vshrl.u32 %v2171_v35, 16  ;;  %v330_v44 = vshll.u32 %v2171_v35, 16  ;;  %v2925_v53 = vld [vmem:[%s3631_s1 + $0x188] sm:$0xff]   ;;  %v2929_v57 = vld [vmem:[%s3631_s1 + $0x190] sm:$0xff]   ;;  %vm1035_vm5 = vmand %vm1033_vm1, %vm1034_vm2 }
  0x15   : > { %2550 = vmatpush3.bf16.msra.mxu1 %v2897_v16  ;;  %2529 = vmatprep.subr.bf16.mxu0 %v2898_v17  ;;  %v2924_v54 = vld [vmem:[%s3631_s1 + $0x108] sm:$0xff]   ;;  %v2928_v58 = vld [vmem:[%s3631_s1 + $0x110] sm:$0xff]   ;;  %v2930_v60 = vld [vmem:[%s3631_s1 + $0x158] sm:$0xff]   ;;  %v3042_v36 = vmov 0.0  }
  0x16   : > { %2551 = vmatprep.subr.bf16.mxu1 %v2899_v18  ;;  %v339_v45 = vrot.slane %v337_v42, 1  ;;  %v332_v46 = vrot.slane %v330_v44, 1  ;;  %v2933_v61 = vld [vmem:[%s3631_s1 + $0x198] sm:$0xff]   ;;  %v2935_v63 = vld [vmem:[%s3631_s1 + $0x1e0] sm:$0xff]   ;;  %v2939_v3 = vld [vmem:[%s3631_s1 + $0x1e8] sm:$0xff]  }
  0x17   : > { %v2932_v62 = vld [vmem:[%s3631_s1 + $0x118] sm:$0xff]   ;;  %v2934_v0 = vld [vmem:[%s3631_s1 + $0x160] sm:$0xff]   ;;  %v2938_v4 = vld [vmem:[%s3631_s1 + $0x168] sm:$0xff]  }
  0x18   : > { %2530 = vmatpush3.bf16.msra.mxu0 %v2900_v19  ;;  %v340_v49 = vor.u32 %v339_v45, %v335_v41  ;;  %v333_v50 = vor.u32 %v332_v46, %v328_v43  ;;  %v2937_v1 = vld [vmem:[%s3631_s1 + $0x1a0] sm:$0xff]   ;;  %v2941_v5 = vld [vmem:[%s3631_s1 + $0x1a8] sm:$0xff]   ;;  %v2943_v7 = vld [vmem:[%s3631_s1 + $0x1f0] sm:$0xff]  }
  0x19   : > { %2552 = vmatpush3.bf16.msra.mxu1 %v2901_v20  ;;  %2531 = vmatprep.subr.bf16.mxu0 %v2902_v21  ;;  %v2936_v2 = vld [vmem:[%s3631_s1 + $0x120] sm:$0xff]   ;;  %v2940_v6 = vld [vmem:[%s3631_s1 + $0x128] sm:$0xff]   ;;  %v2942_v8 = vld [vmem:[%s3631_s1 + $0x170] sm:$0xff]  }
  0x1a   : > { %2553 = vmatprep.subr.bf16.mxu1 %v2903_v22  ;;  %471 = vmatprep.mubr.bf16.mxu0 %v340_v49  ;;  %v2945_v9 = vld [vmem:[%s3631_s1 + $0x1b0] sm:$0xff]   ;;  %v2947_v11 = vld [vmem:[%s3631_s1 + $0x1f8] sm:$0xff]   ;;  %v622_v15 = vld [vmem:[%s3187_s18] sm:$0xcc] }
  0x1b   : > { %v2944_v10 = vld [vmem:[%s3631_s1 + $0x130] sm:$0xff]   ;;  %v2946_v12 = vld [vmem:[%s3631_s1 + $0x178] sm:$0xff]   ;;  %v623_v16 = vld [vmem:[%s3187_s18 + $0x8] sm:$0x33] }
  0x1c   : > { %2532 = vmatpush3.bf16.msra.mxu0 %v2904_v23  ;;  %v2948_v13 = vld [vmem:[%s3631_s1 + $0x138] sm:$0xff]   ;;  %v2239_v17 = vcombine.low %v622_v15, %v623_v16  ;;  %v2240_v18 = vcombine.high %v622_v15, %v623_v16  ;;  %v806_v19 = vld [vmem:[%s3187_s18 + $0x8] sm:$0x77]  ;;  %v1008_v20 = vld [vmem:[%s3633_s3] sm:$0xff] }
  0x1d   : > { %2554 = vmatpush3.bf16.msra.mxu1 %v2905_v24  ;;  %2533 = vmatprep.subr.bf16.mxu0 %v2906_v25  ;;  %v2949_v14 = vld [vmem:[%s3631_s1 + $0x1b8] sm:$0xff]   ;;  %v2289_v21 = vcombine.low %v622_v15, %v806_v19  ;;  %v2290_v22 = vcombine.high %v622_v15, %v806_v19  ;;  %v2954_v35 = vld [vmem:[%s3634_s4] sm:$0xff]   ;;  %v2956_v38 = vld [vmem:[%s3634_s4 + $0x10] sm:$0xff]  }
  0x1e   : > { %2555 = vmatprep.subr.bf16.mxu1 %v2907_v26  ;;  %v665_v23 = vrot.slane %v2239_v17, 2  ;;  %v666_v24 = vrot.slane %v2240_v18, 2  ;;  %1011 = vperm.xlu0 %2881, %v1008_v20   ;;  %v2959_v41 = vld [vmem:[%s3634_s4 + $0x48] sm:$0xff]   ;;  %v2960_v42 = vld [vmem:[%s3634_s4 + $0x20] sm:$0xff]   ;;  %v2961_v43 = vld [vmem:[%s3634_s4 + $0x50] sm:$0xff]  }
  0x1f   : > { %v854_v25 = vshrl.u32 %v2290_v22, 16  ;;  %v857_v26 = vshll.u32 %v2290_v22, 16  ;;  %v2962_v44 = vld [vmem:[%s3634_s4 + $0x28] sm:$0xff]   ;;  %v2963_v45 = vld [vmem:[%s3634_s4 + $0x58] sm:$0xff]   ;;  %v2964_v46 = vld [vmem:[%s3634_s4 + $0x30] sm:$0xff]  }
  0x20   : > { %2534 = vmatpush3.bf16.msra.mxu0 %v2908_v27  ;;  %v846_v27 = vshrl.u32 %v2289_v21, 16  ;;  %v2967_v49 = vld [vmem:[%s3634_s4 + $0x68] sm:$0xff]   ;;  %v1036_v20 = vld [vmem:[#allocation2] sm:$0xc]  ;;  %vm1041_vm6 = vmand %vm1039_vm3, %vm1040_vm4 }
  0x21   : > { %2556 = vmatpush3.bf16.msra.mxu1 %v2909_v28  ;;  %2535 = vmatprep.subr.bf16.mxu0 %v2910_v29  ;;  %v849_v28 = vshll.u32 %v2289_v21, 16  ;;  %v856_v29 = vrot.slane %v854_v25, 2  ;;  %v1042_v22 = vld [vmem:[#allocation2 + $0x4] sm:$0x7] }
  0x22   : > { %2557 = vmatprep.subr.bf16.mxu1 %v2911_v30  ;;  %v859_v30 = vrot.slane %v857_v26, 3  ;;  %v2970_v26 = vld [vmem:[%s3634_s4 + $0xc0] sm:$0xff]  }
  0x24   : > { %2536 = vmatpush3.bf16.msra.mxu0 %v2912_v31  ;;  %v848_v31 = vrot.slane %v846_v27, 2  ;;  %v860_v33 = vor.u32 %v859_v30, %v856_v29  ;;  %v2972_v29 = vld [vmem:[%s3634_s4 + $0xc8] sm:$0xff]  }
  0x25   : > { %2558 = vmatpush3.bf16.msra.mxu1 %v2913_v32  ;;  %2565 = vmatprep.subr.bf16.mxu0 %v2918_v39  ;;  %v851_v32 = vrot.slane %v849_v28, 3  ;;  %v2957_v39 = vld [vmem:[%s3634_s4 + $0x40] sm:$0xff]  }
  0x26   : > { %2587 = vmatprep.subr.bf16.mxu1 %v2919_v40  ;;  %v2958_v40 = vld [vmem:[%s3634_s4 + $0x18] sm:$0xff]  }
  0x27   : > { %472 = vmatmul.mubr.bf16.vlgmr.msra.gmra.mrb[0].mxu0 %v333_v50  ;;  %v852_v34 = vor.u32 %v851_v32, %v848_v31  ;;  %v2971_v50 = vld [vmem:[%s3634_s4 + $0x70] sm:$0xff]  }
  0x28   : > { %615 = vmatmul.mubr.bf16.vlgmr.msra.gmra.mrb[0].mxu1 %v2189_v37  ;;  %2566 = vmatpush3.bf16.msra.mxu0 %v2920_v47  ;;  %v2955_v37 = vld [vmem:[%s3634_s4 + $0x8] sm:$0xff]   ;;  %v2965_v47 = vld [vmem:[%s3634_s4 + $0x60] sm:$0xff]   ;;  %v2974_v32 = vld [vmem:[%s3634_s4 + $0xd0] sm:$0xff]  }
  0x29   : > { %2588 = vmatpush3.bf16.msra.mxu1 %v2921_v48  ;;  %2567 = vmatprep.subr.bf16.mxu0 %v2922_v52  ;;  %v2966_v48 = vld [vmem:[%s3634_s4 + $0x38] sm:$0xff]  }
  0x2a   : > { %2589 = vmatprep.subr.bf16.mxu1 %v2923_v51  ;;  %797 = vmatprep.mubr.bf16.mxu0 %v666_v24  ;;  %v2973_v51 = vld [vmem:[%s3634_s4 + $0x78] sm:$0xff]  }
  0x2b   : > { %991 = vmatprep.mubr.bf16.mxu1 %v860_v33 }
  0x2c   : > { %2568 = vmatpush3.bf16.msra.mxu0 %v2924_v54 }
  0x2d   : > { %2590 = vmatpush3.bf16.msra.mxu1 %v2925_v53  ;;  %2569 = vmatprep.subr.bf16.mxu0 %v2926_v56 }
  0x2e   : > { %2591 = vmatprep.subr.bf16.mxu1 %v2927_v55 }
  0x30   : > { %2570 = vmatpush3.bf16.msra.mxu0 %v2928_v58 }
  0x31   : > { %2592 = vmatpush3.bf16.msra.mxu1 %v2929_v57  ;;  %2571 = vmatprep.subr.bf16.mxu0 %v2930_v60 }
  0x32   : > { %2593 = vmatprep.subr.bf16.mxu1 %v2931_v59 }
  0x34   : > { %2572 = vmatpush3.bf16.msra.mxu0 %v2932_v62 }
  0x35   : > { %2594 = vmatpush3.bf16.msra.mxu1 %v2933_v61  ;;  %2573 = vmatprep.subr.bf16.mxu0 %v2934_v0 }
  0x36   : > { %2595 = vmatprep.subr.bf16.mxu1 %v2935_v63 }
  0x38   : > { %2574 = vmatpush3.bf16.msra.mxu0 %v2936_v2 }
  0x39   : > { %2596 = vmatpush3.bf16.msra.mxu1 %v2937_v1  ;;  %2575 = vmatprep.subr.bf16.mxu0 %v2938_v4 }
  0x3a   : > { %2597 = vmatprep.subr.bf16.mxu1 %v2939_v3 }
  0x3c   : > { %2576 = vmatpush3.bf16.msra.mxu0 %v2940_v6 }
  0x3d   : > { %2598 = vmatpush3.bf16.msra.mxu1 %v2941_v5  ;;  %2577 = vmatprep.subr.bf16.mxu0 %v2942_v8 }
  0x3e   : > { %2599 = vmatprep.subr.bf16.mxu1 %v2943_v7 }
  0x40   : > { %2578 = vmatpush3.bf16.msra.mxu0 %v2944_v10  ;;  %v2307_v10 = vld [vmem:[%s3632_s2] ss:$0 sm:$0xff] }
  0x41   : > { %2600 = vmatpush3.bf16.msra.mxu1 %v2945_v9  ;;  %2579 = vmatprep.subr.bf16.mxu0 %v2946_v12 }
  0x42   : > { %2601 = vmatprep.subr.bf16.mxu1 %v2947_v11 }
  0x44   : > { %2580 = vmatpush3.bf16.msra.mxu0 %v2948_v13 }
  0x45   : > { %2602 = vmatpush3.bf16.msra.mxu1 %v2949_v14  ;;  %2690 = vmatprep.subr.bf16.mxu0 %v3042_v36 }
  0x46   : > { %2710 = vmatprep.subr.bf16.mxu1 %v3042_v36 }
  0x47   : > { %798 = vmatmul.mubr.bf16.vlgmr.msra.gmra.mrb[4].mxu0 %v665_v23 }
  0x48   : > { %992 = vmatmul.mubr.bf16.vlgmr.msra.gmra.mrb[4].mxu1 %v852_v34  ;;  %2691 = vmatpush3.bf16.msra.mxu0 %v2957_v39  ;;  %v2977_v39 = vld [vmem:[%s3634_s4 + $0x88] sm:$0xff]  }
  0x49   : > { %2711 = vmatpush3.bf16.msra.mxu1 %v2954_v35  ;;  %2692 = vmatprep.subr.bf16.mxu0 %v3042_v36  ;;  %v2975_v35 = vld [vmem:[%s3634_s4 + $0x80] sm:$0xff]  }
  0x4a   : > { %2712 = vmatprep.subr.bf16.mxu1 %v3042_v36  ;;  %2726 = vmatprep.mubr.msk.bf16.mxu1 %vm3043_vm0, %v3042_v36 }
  0x4b   : > { %2706 = vmatprep.mubr.msk.bf16.mxu0 %vm3043_vm0, %v3042_v36 }
  0x4c   : > { %2693 = vmatpush3.bf16.msra.mxu0 %v2959_v41  ;;  %v2979_v41 = vld [vmem:[%s3634_s4 + $0x90] sm:$0xff]  }
  0x4d   : > { %2713 = vmatpush3.bf16.msra.mxu1 %v2955_v37  ;;  %2694 = vmatprep.subr.bf16.mxu0 %v3042_v36 }
  0x4e   : > { %2714 = vmatprep.subr.bf16.mxu1 %v3042_v36 }
  0x50   : > { %2695 = vmatpush3.bf16.msra.mxu0 %v2961_v43  ;;  %v2981_v43 = vld [vmem:[%s3634_s4 + $0x98] sm:$0xff]  }
  0x51   : > { %2715 = vmatpush3.bf16.msra.mxu1 %v2956_v38  ;;  %2696 = vmatprep.subr.bf16.mxu0 %v3042_v36  ;;  %v2976_v38 = vld [vmem:[%s3634_s4 + $0xd8] sm:$0xff]  }
  0x52   : > { %2716 = vmatprep.subr.bf16.mxu1 %v3042_v36 }
  0x54   : > { %2697 = vmatpush3.bf16.msra.mxu0 %v2963_v45  ;;  %v2983_v45 = vld [vmem:[%s3634_s4 + $0xa0] sm:$0xff]  }
  0x55   : > { %2717 = vmatpush3.bf16.msra.mxu1 %v2958_v40  ;;  %2698 = vmatprep.subr.bf16.mxu0 %v3042_v36  ;;  %v2978_v40 = vld [vmem:[%s3634_s4 + $0xe0] sm:$0xff]  }
  0x56   : > { %2718 = vmatprep.subr.bf16.mxu1 %v3042_v36 }
  0x58   : > { %2699 = vmatpush3.bf16.msra.mxu0 %v2965_v47  ;;  %v2984_v47 = vld [vmem:[%s3634_s4 + $0xf8] sm:$0xff]  }
  0x59   : > { %2719 = vmatpush3.bf16.msra.mxu1 %v2960_v42  ;;  %2700 = vmatprep.subr.bf16.mxu0 %v3042_v36  ;;  %v2980_v42 = vld [vmem:[%s3634_s4 + $0xe8] sm:$0xff]  }
  0x5a   : > { %2720 = vmatprep.subr.bf16.mxu1 %v3042_v36 }
  0x5c   : > { %2701 = vmatpush3.bf16.msra.mxu0 %v2967_v49 }
  0x5d   : > { %2721 = vmatpush3.bf16.msra.mxu1 %v2962_v44  ;;  %2702 = vmatprep.subr.bf16.mxu0 %v3042_v36  ;;  %v2982_v44 = vld [vmem:[%s3634_s4 + $0xf0] sm:$0xff]  }
  0x5e   : > { %2722 = vmatprep.subr.bf16.mxu1 %v3042_v36 }
  0x60   : > { %2703 = vmatpush3.bf16.msra.mxu0 %v2971_v50  ;;  %v2985_v50 = vld [vmem:[%s3634_s4 + $0xa8] sm:$0xff]  }
  0x61   : > { %2723 = vmatpush3.bf16.msra.mxu1 %v2964_v46  ;;  %2704 = vmatprep.subr.bf16.mxu0 %v3042_v36 }
  0x62   : > { %2724 = vmatprep.subr.bf16.mxu1 %v3042_v36 }
  0x64   : > { %2705 = vmatpush3.bf16.msra.mxu0 %v2973_v51  ;;  %v2987_v51 = vld [vmem:[%s3634_s4 + $0x140] sm:$0xff]  }
  0x65   : > { %2725 = vmatpush3.bf16.msra.mxu1 %v2966_v48  ;;  %2730 = vmatprep.subr.bf16.mxu0 %v3042_v36 }
  0x66   : > { %2750 = vmatprep.subr.bf16.mxu1 %v3042_v36 }
  0x9d   : > { %v1012_v12 = vpop.permute.xlu0 %1011 }
  0xfa   : > { %v2537_v57 = vpop.f32.mrb[0].mxu0 }
  0xfb   : > { %v2559_v52 = vpop.f32.mrb[0].mxu1  ;;  %v2538_v58 = vpop.f32.mrb[1].mxu0 }
  0xfc   : > { %v2560_v53 = vpop.f32.mrb[1].mxu1  ;;  %v2539_v59 = vadd.f32 %v2538_v58, %v2537_v57  ;;  %v2540_v60 = vpop.f32.mrb[2].mxu0  ;;  %v2991_v58 = vld [vmem:[%s3634_s4 + $0x150] sm:$0xff]  }
  0xfd   : > { %v2561_v54 = vadd.f32 %v2560_v53, %v2559_v52  ;;  %v2562_v55 = vpop.f32.mrb[2].mxu1  ;;  %v2541_v61 = vpop.f32.mrb[3].mxu0  ;;  %v2988_v53 = vld [vmem:[%s3634_s4 + $0xb0] sm:$0xff]  }
  0xfe   : > { %v2563_v56 = vpop.f32.mrb[3].mxu1  ;;  %v2993_v61 = vld [vmem:[%s3634_s4 + $0x158] sm:$0xff]  }
  0xff   : > { %v617_v62 = vadd.f32 %v2561_v54, %v2539_v59  ;;  %v2989_v54 = vld [vmem:[%s3634_s4 + $0x148] sm:$0xff]   ;;  %v2990_v56 = vld [vmem:[%s3634_s4 + $0xb8] sm:$0xff]   ;;  %v2992_v59 = vld [vmem:[%s3634_s4 + $0x100] sm:$0xff]  }
 0x11a   : > { %v2581_v63 = vpop.f32.mrb[4].mxu0 }
 0x11b   : > { %v2582_v0 = vpop.f32.mrb[5].mxu0  ;;  %v2603_v1 = vpop.f32.mrb[4].mxu1 }
 0x11c   : > { %v2583_v2 = vadd.f32 %v2582_v0, %v2581_v63  ;;  %v2584_v3 = vpop.f32.mrb[6].mxu0  ;;  %v2604_v4 = vpop.f32.mrb[5].mxu1  ;;  %v2995_v63 = vld [vmem:[%s3634_s4 + $0x160] sm:$0xff]   ;;  %v2996_v0 = vld [vmem:[%s3634_s4 + $0x110] sm:$0xff]  }
 0x11d   : > { %v2585_v5 = vpop.f32.mrb[7].mxu0  ;;  %v2605_v7 = vadd.f32 %v2604_v4, %v2603_v1  ;;  %v2606_v8 = vpop.f32.mrb[6].mxu1  ;;  %v2997_v1 = vld [vmem:[%s3634_s4 + $0x168] sm:$0xff]   ;;  %v2999_v3 = vld [vmem:[%s3634_s4 + $0x170] sm:$0xff]   ;;  %v3000_v4 = vld [vmem:[%s3634_s4 + $0x120] sm:$0xff]  }
 0x11e   : > { %v805_v6 = vadd.f32 %v2583_v2, %v617_v62  ;;  %v2607_v9 = vpop.f32.mrb[7].mxu1  ;;  %v2994_v62 = vld [vmem:[%s3634_s4 + $0x108] sm:$0xff]   ;;  %v2998_v2 = vld [vmem:[%s3634_s4 + $0x118] sm:$0xff]  }
 0x11f   : > { %v3002_v9 = vld [vmem:[%s3634_s4 + $0x128] sm:$0xff]  }
 0x120   : > { %v999_v11 = vadd.f32 %v2605_v7, %v805_v6  ;;  %v3001_v6 = vld [vmem:[%s3634_s4 + $0x178] sm:$0xff]  }
 0x122   : > { %v1007_v13 = vadd.f32 %v2307_v10, %v999_v11  ;;  %v3005_v11 = vld [vmem:[%s3634_s4 + $0x1c0] sm:$0xff]  }
 0x124   : > { %v1014_v14 = vmul.f32 %v1012_v12, %v1007_v13  ;;  %v3006_v13 = vld [vmem:[%s3634_s4 + $0x130] sm:$0xff]  }
 0x126   : > { %v2520_v15 = vpack.c.bf16 %v1014_v14, %v1014_v14 }
 0x128   : > { %v1023_v16 = vshrl.u32 %v2520_v15, 16  ;;  %v1026_v17 = vshll.u32 %v2520_v15, 16 }
 0x12a   : > { %v1025_v18 = vrot.slane %v1023_v16, 5  ;;  %v1028_v19 = vrot.slane %v1026_v17, 6  ;;  %v3007_v16 = vld [vmem:[%s3634_s4 + $0x1c8] sm:$0xff]   ;;  %v3008_v17 = vld [vmem:[%s3634_s4 + $0x138] sm:$0xff]  }
 0x12c   : > { %v1029_v21 = vor.u32 %v1028_v19, %v1025_v18 }
 0x12e   : > { %v1030_v23 = vrot.slane %v1029_v21, 4  ;;  %v1037_v24 = vsel %vm1035_vm5, %v1029_v21, %v1036_v20  ;;  %v3009_v20 = vld [vmem:[%s3634_s4 + $0x1d0] sm:$0xff]   ;;  %v3010_v21 = vld [vmem:[%s3634_s4 + $0x180] sm:$0xff]  }
 0x12f   : > { %1038 = vst [vmem:[#allocation2] sm:$0xc] %v1037_v24  ;;  %v3012_v24 = vld [vmem:[%s3634_s4 + $0x188] sm:$0xff]  }
 0x130   : > { %v1043_v25 = vsel %vm1041_vm6, %v1030_v23, %v1042_v22  ;;  %v3011_v23 = vld [vmem:[%s3634_s4 + $0x1d8] sm:$0xff]  }
 0x131   : > { %1044 = vst [vmem:[#allocation2 + $0x4] sm:$0x7] %v1043_v25  ;;  %v3013_v25 = vld [vmem:[%s3634_s4 + $0x1e0] sm:$0xff]  }
 0x136   : > { %v1045_v27 = vld [vmem:[#allocation2] sm:$0xf] }
 0x137   : > { %2727 = vmatmul.mubr.bf16.vlgmr.msra.gmra.mrb[8].mxu1 %v1045_v27  ;;  %v3428_v48 = vld [vmem:[#allocation2] sm:$0xc] }
 0x138   : > { %v3375_v28 = vld [vmem:[#allocation2 + $0x4] sm:$0x1]  ;;  %2751 = vmatpush3.bf16.msra.mxu1 %v2970_v26  ;;  %2766 = vmatprep.mubr.msk.bf16.mxu1 %vm3043_vm0, %v3042_v36  ;;  %v1269_v55 = vld [vmem:[#allocation2] sm:$0xe]  ;;  %v3014_v26 = vld [vmem:[%s3634_s4 + $0x190] sm:$0xff]  }
 0x139   : > { %v2325_v30 = vcombine.low %v1045_v27, %v3375_v28  ;;  %2752 = vmatprep.subr.bf16.mxu1 %v3042_v36  ;;  %v1382_v46 = vld [vmem:[#allocation2 + $0x4] sm:$0x3]  ;;  %v2358_v57 = vcombine.low %v1269_v55, %v3375_v28  ;;  %v1615_v7 = vld [vmem:[#allocation2] sm:$0x8]  ;;  %v3549_v28 = vld [vmem:[#allocation2 + $0x8] sm:$0x1] }
 0x13a   : > { %v2383_v49 = vcombine.low %v3428_v48, %v1382_v46  ;;  %v1496_v5 = vld [vmem:[#allocation2 + $0x4] sm:$0x7]  ;;  %v3026_v46 = vld [vmem:[%s3634_s4 + $0x210] sm:$0xff]  }
 0x13b   : > { %v1088_v31 = vshll.u32 %v2325_v30, 16  ;;  %v1086_v33 = vshrl.u32 %v2325_v30, 16  ;;  %v1290_v60 = vrot.slane %v2358_v57, 1  ;;  %v2433_v8 = vcombine.low %v1615_v7, %v1496_v5  ;;  %v1834_v27 = vld [vmem:[#allocation2 + $0x4] sm:$0xf] }
 0x13c   : > { %2753 = vmatpush3.bf16.msra.mxu1 %v2972_v29  ;;  %v1405_v52 = vrot.slane %v2383_v49, 2  ;;  %v2408_v10 = vcombine.low %v3428_v48, %v1496_v5  ;;  %v3015_v29 = vld [vmem:[%s3634_s4 + $0x1e8] sm:$0xff]   ;;  %v2482_v30 = vcombine.low %v1834_v27, %v3549_v28  ;;  %v3028_v48 = vld [vmem:[%s3634_s4 + $0x220] sm:$0xff]  }
 0x13d   : > { %v1090_v34 = vrot.slane %v1088_v31, 1  ;;  %2754 = vmatprep.subr.bf16.mxu1 %v3042_v36  ;;  %v1636_v12 = vrot.slane %v2433_v8, 3  ;;  %v3016_v31 = vld [vmem:[%s3634_s4 + $0x198] sm:$0xff]   ;;  %v3029_v49 = vld [vmem:[%s3634_s4 + $0x228] sm:$0xff]  }
 0x13e   : > { %v1518_v14 = vshrl.u32 %v2408_v10, 16  ;;  %v1521_v15 = vshll.u32 %v2408_v10, 16 }
 0x13f   : > { %v1091_v37 = vor.u32 %v1090_v34, %v1086_v33  ;;  %v1861_v33 = vshll.u32 %v2482_v30, 16  ;;  %v3018_v34 = vld [vmem:[%s3634_s4 + $0x1a0] sm:$0xff]  }
 0x140   : > { %2755 = vmatpush3.bf16.msra.mxu1 %v2974_v32  ;;  %v1520_v18 = vrot.slane %v1518_v14, 2  ;;  %v1523_v19 = vrot.slane %v1521_v15, 3  ;;  %v3017_v32 = vld [vmem:[%s3634_s4 + $0x1f0] sm:$0xff]  }
 0x141   : > { %2707 = vmatmul.mubr.bf16.vlgmr.msra.gmra.mrb[8].mxu0 %v1091_v37  ;;  %2756 = vmatprep.subr.bf16.mxu1 %v3042_v36  ;;  %v1863_v37 = vrot.slane %v1861_v33, 1 }
 0x142   : > { %2731 = vmatpush3.bf16.msra.mxu0 %v2975_v35  ;;  %2746 = vmatprep.mubr.msk.bf16.mxu0 %vm3043_vm0, %v3042_v36  ;;  %v1524_v22 = vor.u32 %v1523_v19, %v1520_v18  ;;  %v3019_v35 = vld [vmem:[%s3634_s4 + $0x1f8] sm:$0xff]  }
 0x143   : > { %2732 = vmatprep.subr.bf16.mxu0 %v3042_v36 }
 0x144   : > { %2757 = vmatpush3.bf16.msra.mxu1 %v2976_v38  ;;  %v3020_v38 = vld [vmem:[%s3634_s4 + $0x1a8] sm:$0xff]  }
 0x145   : > { %2758 = vmatprep.subr.bf16.mxu1 %v3042_v36 }
 0x146   : > { %2733 = vmatpush3.bf16.msra.mxu0 %v2977_v39  ;;  %v1859_v39 = vshrl.u32 %v2482_v30, 16  ;;  %v2516_v30 = vld [vmem:[%s3635_s5] ss:$0 sm:$0xff] }
 0x147   : > { %2734 = vmatprep.subr.bf16.mxu0 %v3042_v36 }
 0x148   : > { %2759 = vmatpush3.bf16.msra.mxu1 %v2978_v40  ;;  %v1864_v40 = vor.u32 %v1863_v37, %v1859_v39 }
 0x149   : > { %2760 = vmatprep.subr.bf16.mxu1 %v3042_v36 }
 0x14a   : > { %2735 = vmatpush3.bf16.msra.mxu0 %v2979_v41  ;;  %v3022_v41 = vld [vmem:[%s3634_s4 + $0x1b0] sm:$0xff]  }
 0x14b   : > { %2736 = vmatprep.subr.bf16.mxu0 %v3042_v36 }
 0x14c   : > { %2761 = vmatpush3.bf16.msra.mxu1 %v2980_v42  ;;  %v3023_v42 = vld [vmem:[%s3634_s4 + $0x1b8] sm:$0xff]  }
 0x14d   : > { %2762 = vmatprep.subr.bf16.mxu1 %v3042_v36 }
 0x14e   : > { %2737 = vmatpush3.bf16.msra.mxu0 %v2981_v43  ;;  %v3024_v43 = vld [vmem:[%s3634_s4 + $0x200] sm:$0xff]  }
 0x14f   : > { %2738 = vmatprep.subr.bf16.mxu0 %v3042_v36 }
 0x150   : > { %2763 = vmatpush3.bf16.msra.mxu1 %v2982_v44  ;;  %v1727_v44 = vld [vmem:[#allocation2 + $0x4] sm:$0xf] }
 0x151   : > { %2764 = vmatprep.subr.bf16.mxu1 %v3042_v36 }
 0x152   : > { %2739 = vmatpush3.bf16.msra.mxu0 %v2983_v45  ;;  %v3025_v45 = vld [vmem:[%s3634_s4 + $0x208] sm:$0xff]  }
 0x153   : > { %2740 = vmatprep.subr.bf16.mxu0 %v3042_v36 }
 0x154   : > { %2765 = vmatpush3.bf16.msra.mxu1 %v2984_v47  ;;  %v3027_v47 = vld [vmem:[%s3634_s4 + $0x218] sm:$0xff]  }
 0x155   : > { %2790 = vmatprep.subr.bf16.mxu1 %v3042_v36 }
 0x156   : > { %2741 = vmatpush3.bf16.msra.mxu0 %v2985_v50  ;;  %v3030_v50 = vld [vmem:[%s3634_s4 + $0x230] sm:$0xff]  }
 0x157   : > { %2767 = vmatmul.mubr.bf16.vlgmr.msra.gmra.mrb[12].mxu1 %v1405_v52  ;;  %2742 = vmatprep.subr.bf16.mxu0 %v3042_v36  ;;  %v3031_v52 = vld [vmem:[%s3634_s4 + $0x238] sm:$0xff]  }
 0x158   : > { %2791 = vmatpush3.bf16.msra.mxu1 %v2987_v51  ;;  %2806 = vmatprep.mubr.msk.bf16.mxu1 %vm3043_vm0, %v3042_v36  ;;  %v1955_v51 = vld [vmem:[#allocation2 + $0x4] sm:$0xe] }
 0x159   : > { %2792 = vmatprep.subr.bf16.mxu1 %v3042_v36 }
 0x15a   : > { %2743 = vmatpush3.bf16.msra.mxu0 %v2988_v53  ;;  %v2507_v53 = vcombine.low %v1955_v51, %v3549_v28 }
 0x15b   : > { %2744 = vmatprep.subr.bf16.mxu0 %v3042_v36 }
 0x15c   : > { %2793 = vmatpush3.bf16.msra.mxu1 %v2989_v54  ;;  %v1976_v54 = vrot.slane %v2507_v53, 1 }
 0x15d   : > { %2794 = vmatprep.subr.bf16.mxu1 %v3042_v36 }
 0x15e   : > { %2745 = vmatpush3.bf16.msra.mxu0 %v2990_v56 }
 0x15f   : > { %2770 = vmatprep.subr.bf16.mxu0 %v3042_v36 }
 0x160   : > { %2795 = vmatpush3.bf16.msra.mxu1 %v2991_v58 }
 0x161   : > { %2747 = vmatmul.mubr.bf16.vlgmr.msra.gmra.mrb[12].mxu0 %v1290_v60  ;;  %2796 = vmatprep.subr.bf16.mxu1 %v3042_v36 }
 0x162   : > { %2771 = vmatpush3.bf16.msra.mxu0 %v2992_v59  ;;  %2786 = vmatprep.mubr.msk.bf16.mxu0 %vm3043_vm0, %v3042_v36 }
 0x163   : > { %2772 = vmatprep.subr.bf16.mxu0 %v3042_v36 }
 0x164   : > { %2797 = vmatpush3.bf16.msra.mxu1 %v2993_v61 }
 0x165   : > { %2798 = vmatprep.subr.bf16.mxu1 %v3042_v36 }
 0x166   : > { %2773 = vmatpush3.bf16.msra.mxu0 %v2994_v62 }
 0x167   : > { %2774 = vmatprep.subr.bf16.mxu0 %v3042_v36 }
 0x168   : > { %2799 = vmatpush3.bf16.msra.mxu1 %v2995_v63 }
 0x169   : > { %2800 = vmatprep.subr.bf16.mxu1 %v3042_v36 }
 0x16a   : > { %2775 = vmatpush3.bf16.msra.mxu0 %v2996_v0 }
 0x16b   : > { %2776 = vmatprep.subr.bf16.mxu0 %v3042_v36 }
 0x16c   : > { %2801 = vmatpush3.bf16.msra.mxu1 %v2997_v1 }
 0x16d   : > { %2802 = vmatprep.subr.bf16.mxu1 %v3042_v36 }
 0x16e   : > { %2777 = vmatpush3.bf16.msra.mxu0 %v2998_v2 }
 0x16f   : > { %2778 = vmatprep.subr.bf16.mxu0 %v3042_v36 }
 0x170   : > { %2803 = vmatpush3.bf16.msra.mxu1 %v2999_v3 }
 0x171   : > { %2804 = vmatprep.subr.bf16.mxu1 %v3042_v36 }
 0x172   : > { %2779 = vmatpush3.bf16.msra.mxu0 %v3000_v4 }
 0x173   : > { %2780 = vmatprep.subr.bf16.mxu0 %v3042_v36 }
 0x174   : > { %2805 = vmatpush3.bf16.msra.mxu1 %v3001_v6 }
 0x175   : > { %2830 = vmatprep.subr.bf16.mxu1 %v3042_v36 }
 0x176   : > { %2781 = vmatpush3.bf16.msra.mxu0 %v3002_v9 }
 0x177   : > { %2807 = vmatmul.mubr.bf16.vlgmr.msra.gmra.mrb[16].mxu1 %v1636_v12  ;;  %2782 = vmatprep.subr.bf16.mxu0 %v3042_v36 }
 0x178   : > { %2831 = vmatpush3.bf16.msra.mxu1 %v3005_v11  ;;  %2846 = vmatprep.mubr.msk.bf16.mxu1 %vm3043_vm0, %v3042_v36 }
 0x179   : > { %2832 = vmatprep.subr.bf16.mxu1 %v3042_v36 }
 0x17a   : > { %2783 = vmatpush3.bf16.msra.mxu0 %v3006_v13 }
 0x17b   : > { %2784 = vmatprep.subr.bf16.mxu0 %v3042_v36 }
 0x17c   : > { %2833 = vmatpush3.bf16.msra.mxu1 %v3007_v16 }
 0x17d   : > { %2834 = vmatprep.subr.bf16.mxu1 %v3042_v36 }
 0x17e   : > { %2785 = vmatpush3.bf16.msra.mxu0 %v3008_v17 }
 0x17f   : > { %2810 = vmatprep.subr.bf16.mxu0 %v3042_v36 }
 0x180   : > { %2835 = vmatpush3.bf16.msra.mxu1 %v3009_v20 }
 0x181   : > { %2787 = vmatmul.mubr.bf16.vlgmr.msra.gmra.mrb[16].mxu0 %v1524_v22  ;;  %2836 = vmatprep.subr.bf16.mxu1 %v3042_v36 }
 0x182   : > { %2811 = vmatpush3.bf16.msra.mxu0 %v3010_v21  ;;  %2826 = vmatprep.mubr.msk.bf16.mxu0 %vm3043_vm0, %v3042_v36 }
 0x183   : > { %2812 = vmatprep.subr.bf16.mxu0 %v3042_v36 }
 0x184   : > { %2837 = vmatpush3.bf16.msra.mxu1 %v3011_v23 }
 0x185   : > { %2838 = vmatprep.subr.bf16.mxu1 %v3042_v36 }
 0x186   : > { %2813 = vmatpush3.bf16.msra.mxu0 %v3012_v24 }
 0x187   : > { %2814 = vmatprep.subr.bf16.mxu0 %v3042_v36 }
 0x188   : > { %2839 = vmatpush3.bf16.msra.mxu1 %v3013_v25 }
 0x189   : > { %2840 = vmatprep.subr.bf16.mxu1 %v3042_v36 }
 0x18a   : > { %2815 = vmatpush3.bf16.msra.mxu0 %v3014_v26 }
 0x18b   : > { %2816 = vmatprep.subr.bf16.mxu0 %v3042_v36 }
 0x18c   : > { %2841 = vmatpush3.bf16.msra.mxu1 %v3015_v29 }
 0x18d   : > { %2842 = vmatprep.subr.bf16.mxu1 %v3042_v36 }
 0x18e   : > { %2817 = vmatpush3.bf16.msra.mxu0 %v3016_v31 }
 0x18f   : > { %2818 = vmatprep.subr.bf16.mxu0 %v3042_v36 }
 0x190   : > { %2843 = vmatpush3.bf16.msra.mxu1 %v3017_v32 }
 0x191   : > { %2844 = vmatprep.subr.bf16.mxu1 %v3042_v36 }
 0x192   : > { %2819 = vmatpush3.bf16.msra.mxu0 %v3018_v34 }
 0x193   : > { %2820 = vmatprep.subr.bf16.mxu0 %v3042_v36 }
 0x194   : > { %2845 = vmatpush3.bf16.msra.mxu1 %v3019_v35 }
 0x196   : > { %2821 = vmatpush3.bf16.msra.mxu0 %v3020_v38 }
 0x197   : > { %2847 = vmatmul.mubr.bf16.vlgmr.msra.gmra.mrb[20].mxu1 %v1864_v40  ;;  %2822 = vmatprep.subr.bf16.mxu0 %v3042_v36 }
 0x19a   : > { %2823 = vmatpush3.bf16.msra.mxu0 %v3022_v41 }
 0x19b   : > { %2824 = vmatprep.subr.bf16.mxu0 %v3042_v36 }
 0x19e   : > { %2825 = vmatpush3.bf16.msra.mxu0 %v3023_v42 }
 0x19f   : > { %2850 = vmatprep.subr.bf16.mxu0 %v3042_v36 }
 0x1a1   : > { %2827 = vmatmul.mubr.bf16.vlgmr.msra.gmra.mrb[20].mxu0 %v1727_v44 }
 0x1a2   : > { %2851 = vmatpush3.bf16.msra.mxu0 %v3024_v43  ;;  %2866 = vmatprep.mubr.msk.bf16.mxu0 %vm3043_vm0, %v3042_v36 }
 0x1a3   : > { %2852 = vmatprep.subr.bf16.mxu0 %v3042_v36 }
 0x1a6   : > { %2853 = vmatpush3.bf16.msra.mxu0 %v3025_v45 }
 0x1a7   : > { %2854 = vmatprep.subr.bf16.mxu0 %v3042_v36 }
 0x1aa   : > { %2855 = vmatpush3.bf16.msra.mxu0 %v3026_v46 }
 0x1ab   : > { %2856 = vmatprep.subr.bf16.mxu0 %v3042_v36 }
 0x1ae   : > { %2857 = vmatpush3.bf16.msra.mxu0 %v3027_v47 }
 0x1af   : > { %2858 = vmatprep.subr.bf16.mxu0 %v3042_v36 }
 0x1b2   : > { %2859 = vmatpush3.bf16.msra.mxu0 %v3028_v48 }
 0x1b3   : > { %2860 = vmatprep.subr.bf16.mxu0 %v3042_v36 }
 0x1b6   : > { %2861 = vmatpush3.bf16.msra.mxu0 %v3029_v49 }
 0x1b7   : > { %2862 = vmatprep.subr.bf16.mxu0 %v3042_v36 }
 0x1ba   : > { %2863 = vmatpush3.bf16.msra.mxu0 %v3030_v50 }
 0x1bb   : > { %2864 = vmatprep.subr.bf16.mxu0 %v3042_v36 }
 0x1be   : > { %2865 = vmatpush3.bf16.msra.mxu0 %v3031_v52 }
 0x1c1   : > { %2867 = vmatmul.mubr.bf16.vlgmr.msra.gmra.mrb[24].mxu0 %v1976_v54 }
 0x20a   : > { %v1263_v55 = vpop.f32.mrb[8].mxu1 }
 0x20b   : > { %v2728_v56 = vpop.f32.mrb[9].mxu1 }
 0x20c   : > { %v1266_v57 = vpop.f32.mrb[10].mxu1 }
 0x20d   : > { %v2729_v58 = vpop.f32.mrb[11].mxu1 }
 0x214   : > { %v1175_v59 = vpop.f32.mrb[8].mxu0 }
 0x215   : > { %v1264_v60 = vadd.f32 %v1263_v55, %v1175_v59  ;;  %v2708_v61 = vpop.f32.mrb[9].mxu0 }
 0x216   : > { %v1178_v62 = vpop.f32.mrb[10].mxu0 }
 0x217   : > { %v2709_v63 = vpop.f32.mrb[11].mxu0 }
 0x22a   : > { %v1489_v0 = vpop.f32.mrb[12].mxu1 }
 0x22b   : > { %v2768_v1 = vpop.f32.mrb[13].mxu1 }
 0x22c   : > { %v1492_v2 = vpop.f32.mrb[14].mxu1 }
 0x22d   : > { %v2769_v3 = vpop.f32.mrb[15].mxu1 }
 0x234   : > { %v1374_v4 = vpop.f32.mrb[12].mxu0 }
 0x235   : > { %v1380_v36 = vadd.f32 %v1374_v4, %v1264_v60  ;;  %v2748_v5 = vpop.f32.mrb[13].mxu0 }
 0x236   : > { %v1377_v6 = vpop.f32.mrb[14].mxu0 }
 0x237   : > { %v2749_v7 = vpop.f32.mrb[15].mxu0  ;;  %v1495_v8 = vadd.f32 %v1489_v0, %v1380_v36 }
 0x24a   : > { %v1720_v9 = vpop.f32.mrb[16].mxu1 }
 0x24b   : > { %v2808_v10 = vpop.f32.mrb[17].mxu1 }
 0x24c   : > { %v1723_v11 = vpop.f32.mrb[18].mxu1 }
 0x24d   : > { %v2809_v12 = vpop.f32.mrb[19].mxu1 }
 0x254   : > { %v1608_v13 = vpop.f32.mrb[16].mxu0 }
 0x255   : > { %v1614_v14 = vadd.f32 %v1608_v13, %v1495_v8  ;;  %v2788_v15 = vpop.f32.mrb[17].mxu0 }
 0x256   : > { %v1611_v16 = vpop.f32.mrb[18].mxu0 }
 0x257   : > { %v2789_v17 = vpop.f32.mrb[19].mxu0  ;;  %v1726_v18 = vadd.f32 %v1720_v9, %v1614_v14 }
 0x26a   : > { %v1948_v19 = vpop.f32.mrb[20].mxu1 }
 0x26b   : > { %v2848_v20 = vpop.f32.mrb[21].mxu1 }
 0x26c   : > { %v1951_v21 = vpop.f32.mrb[22].mxu1 }
 0x26d   : > { %v2849_v22 = vpop.f32.mrb[23].mxu1 }
 0x274   : > { %v1827_v23 = vpop.f32.mrb[20].mxu0 }
 0x275   : > { %v1833_v24 = vadd.f32 %v1827_v23, %v1726_v18  ;;  %v2828_v25 = vpop.f32.mrb[21].mxu0 }
 0x276   : > { %v1830_v26 = vpop.f32.mrb[22].mxu0 }
 0x277   : > { %v2829_v27 = vpop.f32.mrb[23].mxu0  ;;  %v1954_v28 = vadd.f32 %v1948_v19, %v1833_v24 }
 0x294   : > { %v2060_v29 = vpop.f32.mrb[24].mxu0 }
 0x295   : > { %v2066_v31 = vadd.f32 %v2060_v29, %v1954_v28  ;;  %v2868_v32 = vpop.f32.mrb[25].mxu0 }
 0x296   : > { %v2063_v33 = vpop.f32.mrb[26].mxu0 }
 0x297   : > { %v2074_v34 = vadd.f32 %v2516_v30, %v2066_v31  ;;  %v2869_v35 = vpop.f32.mrb[27].mxu0 }
 0x299   : > { %v2075_v37 = vmul.f32 0.01, %v2074_v34 }
 0x29b   : > { %v2076_v38 = vmax.f32 %v2074_v34, %v2075_v37 }
 0x29d   : > { %2077 = vst [vmem:[%s249_s25] sm:$0xff] %v2076_v38 }
 0x29e PF: > { %s16_s21 = sadd.s32 1, %s3039_s21  }
 0x29f   : > { %p13_p4 = scmp.ge.s32.totalorder %s16_s21, 4  }
 0x2a1   :  { %15 = sbr.rel (!%p13_p4) target bundleno = 1 (0x1), region = 85 }

</bundles_post_ra>
